<compile_context>
chip_gen: v6e
topology: v6e:2x2x1
jax: 0.10.0
libtpu: 0.0.40
codegen_flags: <defaults>
</compile_context>

<pallas_src>
import functools

import numpy as np
import jax
import jax.numpy as jnp
from jax import lax
from jax.experimental import pallas as pl
from jax.experimental.pallas import tpu as pltpu  # noqa: F401  (TPU backend)

# ----------------------------- configuration --------------------------------
FEATURE_SIZE = 3                 # spatial size of hyperpixel features (3x3)
HYPERPIXEL_DIMS = (4, 8)         # channel split per hyperpixel layer
WAY = 2
NUM_QRY = 3
NUM_CLASS = 5
TEMPERATURE = 0.2
TEMPERATURE_ATTN = 5.0
EPS_L2 = 1e-6
EPS_GAUSS = 1e-5
EPS_COS = 1e-8


# --------------------------- in-kernel fast helpers --------------------------
def _softmax(x, axis):
    m = jnp.max(x, axis=axis, keepdims=True)
    e = jnp.exp(x - m)
    s = jnp.sum(e, axis=axis, keepdims=True)
    # exact reciprocal (per review: approx form only buys noise here)
    return e * pl.reciprocal(s, approx=False)


def _gaussian_normalize(x, axis):
    # torch.mean + unbiased torch.var + div by sqrt(var + eps), via rsqrt
    n = x.shape[axis]
    mean = jnp.mean(x, axis=axis, keepdims=True)
    d = x - mean
    var = jnp.sum(d * d, axis=axis, keepdims=True) * (1.0 / (n - 1))
    return d * lax.rsqrt(var + EPS_GAUSS)


# ------------------------------- cca kernel ----------------------------------
def cca_kernel(spt_b_ref, qry_b_ref, spt_f_ref, qry_f_ref, out_ref, *,
               hyperpixel_dims, inv_temp_attn, inv_temp):
    """All (num_qry x way) similarities in a single invocation.

    spt_b_ref : (way, HW, C)      support features  (spatial on sublanes, C on lanes)
    qry_b_ref : (nq,  HW, C)      query features
    spt_f_ref : (way*HW, C)       flat support layout (matmul rhs for orientation B)
    qry_f_ref : (nq*HW, C)        flat query layout   (matmul rhs for orientation A)
    out_ref   : (nq, way)         cosine similarities / temperature (one dense store)
    """
    spt_b = spt_b_ref[...]
    qry_b = qry_b_ref[...]
    spt_f = spt_f_ref[...]
    qry_f = qry_f_ref[...]

    way, hw, C = spt_b.shape
    nq = qry_b.shape[0]
    inv_hw = 1.0 / hw

    # normalize_feature: subtract per-position channel mean (lane-axis reduce).
    spt_b = spt_b - jnp.mean(spt_b, axis=2, keepdims=True)
    qry_b = qry_b - jnp.mean(qry_b, axis=2, keepdims=True)
    spt_f = spt_f - jnp.mean(spt_f, axis=1, keepdims=True)
    qry_f = qry_f - jnp.mean(qry_f, axis=1, keepdims=True)

    sp_parts = []   # per split: (nq, way, ci) attended-pooled support features
    qp_parts = []   # per split: (nq, way, ci) attended-pooled query features

    off = 0
    for ci in hyperpixel_dims:
        src_b = spt_b[:, :, off:off + ci]      # (way, hw, ci)  mean-normalized
        tgt_b = qry_b[:, :, off:off + ci]      # (nq,  hw, ci)
        src_f = spt_f[:, off:off + ci]         # (way*hw, ci)
        tgt_f = qry_f[:, off:off + ci]         # (nq*hw,  ci)
        off += ci

        # FeatureL2Norm over channels (lane reduce + EUP rsqrt)
        src_nb = src_b * lax.rsqrt(jnp.sum(src_b * src_b, axis=2, keepdims=True) + EPS_L2)
        tgt_nb = tgt_b * lax.rsqrt(jnp.sum(tgt_b * tgt_b, axis=2, keepdims=True) + EPS_L2)
        src_nf = src_f * lax.rsqrt(jnp.sum(src_f * src_f, axis=1, keepdims=True) + EPS_L2)
        tgt_nf = tgt_f * lax.rsqrt(jnp.sum(tgt_f * tgt_f, axis=1, keepdims=True) + EPS_L2)

        # ---- orientation A: rows = support positions of one way,
        #                     cols = all query positions (q-major blocks of hw).
        # corr_a[w, s, q*hw + t] = <spt_l2[w, s, :], qry_l2[q, t, :]>
        tgt_nf_b = jnp.broadcast_to(tgt_nf[None], (way, nq * hw, ci))
        corr_a = lax.dot_general(src_nb, tgt_nf_b, (((2,), (2,)), ((0,), (0,))),
                                 preferred_element_type=jnp.float32)   # (way, hw, nq*hw)
        # gaussian-normalize + softmax over the source axis (sublanes)
        cs = _softmax(_gaussian_normalize(corr_a, axis=1) * inv_temp_attn, axis=1)

        sp_q = []
        for q in range(nq):
            # attn_s[(q,w), s] = sum over this query's hw target columns
            attn = jnp.sum(cs[:, :, q * hw:(q + 1) * hw], axis=2, keepdims=True)  # (way,hw,1)
            # attended support pooled over spatial positions (VPU mul + sublane reduce)
            sp_q.append(jnp.sum(attn * src_b, axis=1) * inv_hw)                   # (way, ci)
        sp_parts.append(jnp.stack(sp_q, axis=0))                                  # (nq, way, ci)

        # ---- orientation B: rows = target positions of one query,
        #                     cols = all support positions (w-major blocks of hw).
        # corr_b[q, t, w*hw + s] = <qry_l2[q, t, :], spt_l2[w, s, :]>
        src_nf_b = jnp.broadcast_to(src_nf[None], (nq, way * hw, ci))
        corr_b = lax.dot_general(tgt_nb, src_nf_b, (((2,), (2,)), ((0,), (0,))),
                                 preferred_element_type=jnp.float32)   # (nq, hw, way*hw)
        cq = _softmax(_gaussian_normalize(corr_b, axis=1) * inv_temp_attn, axis=1)

        qp_w = []
        for w in range(way):
            attn = jnp.sum(cq[:, :, w * hw:(w + 1) * hw], axis=2, keepdims=True)  # (nq,hw,1)
            qp_w.append(jnp.sum(attn * tgt_b, axis=1) * inv_hw)                   # (nq, ci)
        qp_parts.append(jnp.stack(qp_w, axis=1))                                  # (nq, way, ci)

    # deferred cosine-similarity reductions over the full channel dim (once)
    sp = jnp.concatenate(sp_parts, axis=2)        # (nq, way, C)
    qp = jnp.concatenate(qp_parts, axis=2)        # (nq, way, C)
    num = jnp.sum(sp * qp, axis=2)                # (nq, way)
    sp_sq = jnp.sum(sp * sp, axis=2)
    qp_sq = jnp.sum(qp * qp, axis=2)
    den_sq = jnp.maximum(sp_sq * qp_sq, EPS_COS * EPS_COS)
    out_ref[...] = (num * lax.rsqrt(den_sq)) * inv_temp   # one dense store


def cca_pallas(spt, qry, hyperpixel_dims, temperature_attn, temperature):
    """spt: (1, way, C, H, W), qry: (num_qry, C, H, W) — NCHW like PyTorch."""
    spt = jnp.squeeze(spt, axis=0)
    way, C, H, W = spt.shape
    num_qry = qry.shape[0]
    hw = H * W

    # (HW, C) slabs: spatial positions on sublanes, channels on lanes.
    spt_b = jnp.transpose(spt.reshape(way, C, hw), (0, 2, 1)).astype(jnp.float32)
    qry_b = jnp.transpose(qry.reshape(num_qry, C, hw), (0, 2, 1)).astype(jnp.float32)
    # flat (all positions, C) layouts for the cross-product matmul rhs
    spt_f = spt_b.reshape(way * hw, C)
    qry_f = qry_b.reshape(num_qry * hw, C)

    kernel = functools.partial(
        cca_kernel,
        hyperpixel_dims=tuple(int(c) for c in hyperpixel_dims),
        inv_temp_attn=1.0 / float(temperature_attn),
        inv_temp=1.0 / float(temperature))

    sim = pl.pallas_call(
        kernel,
        out_shape=jax.ShapeDtypeStruct((num_qry, way), jnp.float32),
    )(spt_b, qry_b, spt_f, qry_f)
    return sim


# -------------------------------- fc kernel ----------------------------------
def fc_kernel(x_ref, w_ref, b_ref, o_ref):
    # x_ref: (B, HW, C), w_ref: (C, num_class), b_ref: (1, num_class)
    pooled = jnp.mean(x_ref[...], axis=1)                         # (B, C) sublane reduce
    o_ref[...] = jnp.dot(pooled, w_ref[...],
                         preferred_element_type=jnp.float32) + b_ref[...]


def fc_forward_pallas(x, fc_w, fc_b):
    """x: (B, C, H, W) NCHW; fc_w: (num_class, C); fc_b: (num_class,)."""
    B, C, H, W = x.shape
    # keep channels on lanes (same (HW, C) convention as cca)
    x_f = jnp.transpose(x.reshape(B, C, H * W), (0, 2, 1)).astype(jnp.float32)
    w_t = fc_w.T.astype(jnp.float32)
    b2 = fc_b.reshape(1, -1).astype(jnp.float32)
    return pl.pallas_call(
        fc_kernel,
        out_shape=jax.ShapeDtypeStruct((B, fc_w.shape[0]), jnp.float32),
    )(x_f, w_t, b2)


# ---------------------------- pure-JAX references ----------------------------
def _softmax_ref(x, axis):
    m = jnp.max(x, axis=axis, keepdims=True)
    e = jnp.exp(x - m)
    return e / jnp.sum(e, axis=axis, keepdims=True)


def _gaussian_normalize_ref(x, axis):
    n = x.shape[axis]
    mean = jnp.mean(x, axis=axis, keepdims=True)
    var = jnp.sum((x - mean) ** 2, axis=axis, keepdims=True) / (n - 1)
    return (x - mean) / jnp.sqrt(var + EPS_GAUSS)


def cca_reference(spt, qry, hyperpixel_dims, temp_attn, temp):
    spt = jnp.squeeze(spt, 0)
    way, C, H, W = spt.shape
    num_qry = qry.shape[0]
    fs = H
    L = len(hyperpixel_dims)

    spt = spt - spt.mean(axis=1, keepdims=True)
    qry = qry - qry.mean(axis=1, keepdims=True)

    spt_feats = jnp.broadcast_to(spt[None], (num_qry, way, C, H, W)).reshape(-1, C, H, W)
    qry_feats = jnp.broadcast_to(qry[:, None], (num_qry, way, C, H, W)).reshape(-1, C, H, W)
    splits = list(np.cumsum(hyperpixel_dims)[:-1])
    spt_splits = jnp.split(spt_feats, splits, axis=1)
    qry_splits = jnp.split(qry_feats, splits, axis=1)

    corrs = []
    for src, tgt in zip(spt_splits, qry_splits):
        src = src / jnp.sqrt(jnp.sum(src ** 2, axis=1, keepdims=True) + EPS_L2)
        tgt = tgt / jnp.sqrt(jnp.sum(tgt ** 2, axis=1, keepdims=True) + EPS_L2)
        srcf = src.reshape(src.shape[0], src.shape[1], -1)
        tgtf = tgt.reshape(tgt.shape[0], tgt.shape[1], -1)
        corrs.append(jnp.einsum('bcs,bct->bst', srcf, tgtf))
    corr = jnp.stack(corrs, axis=1)                               # (B, L, HW, HW)

    refined = corr.reshape(num_qry, way, L, fs, fs, fs, fs)
    corr_s = refined.reshape(num_qry, way, L, fs * fs, fs, fs)
    corr_q = refined.reshape(num_qry, way, L, fs, fs, fs * fs)
    corr_s = _softmax_ref(_gaussian_normalize_ref(corr_s, 3) / temp_attn, axis=3)
    corr_q = _softmax_ref(_gaussian_normalize_ref(corr_q, 5) / temp_attn, axis=5)
    corr_s = corr_s.reshape(num_qry, way, L, fs, fs, fs, fs)
    corr_q = corr_q.reshape(num_qry, way, L, fs, fs, fs, fs)
    attn_s = corr_s.sum(axis=(5, 6))                              # (nq, way, L, fs, fs)
    attn_q = corr_q.sum(axis=(3, 4))

    spt_att = jnp.concatenate(
        [jnp.broadcast_to(attn_s[:, :, i:i + 1], (num_qry, way, c, fs, fs))
         for i, c in enumerate(hyperpixel_dims)], axis=2) * spt[None]
    qry_att = jnp.concatenate(
        [jnp.broadcast_to(attn_q[:, :, i:i + 1], (num_qry, way, c, fs, fs))
         for i, c in enumerate(hyperpixel_dims)], axis=2) * qry[:, None]

    sp = spt_att.mean(axis=(-1, -2))
    qp = qry_att.mean(axis=(-1, -2))
    num = jnp.sum(sp * qp, axis=-1)
    den = jnp.maximum(jnp.linalg.norm(sp, axis=-1) * jnp.linalg.norm(qp, axis=-1),
                      EPS_COS)
    return (num / den) / temp


def fc_reference(x, fc_w, fc_b):
    return x.mean(axis=(-1, -2)) @ fc_w.T + fc_b


# ----------------------------------- main ------------------------------------
if __name__ == "__main__":
    key = jax.random.PRNGKey(0)
    k1, k2, k3, k4 = jax.random.split(key, 4)

    C = sum(HYPERPIXEL_DIMS)
    spt = jax.random.normal(k1, (1, WAY, C, FEATURE_SIZE, FEATURE_SIZE), jnp.float32)
    qry = jax.random.normal(k2, (NUM_QRY, C, FEATURE_SIZE, FEATURE_SIZE), jnp.float32)
    fc_w = 0.1 * jax.random.normal(k3, (NUM_CLASS, C), jnp.float32)
    fc_b = 0.01 * jax.random.normal(k4, (NUM_CLASS,), jnp.float32)

    # ---- cca mode (inference path, matcher_prob == 0, shot == 1) ----
    sim = cca_pallas(spt, qry, HYPERPIXEL_DIMS, TEMPERATURE_ATTN, TEMPERATURE)
    sim = jax.block_until_ready(sim)
    sim_ref = cca_reference(spt, qry, HYPERPIXEL_DIMS, TEMPERATURE_ATTN, TEMPERATURE)
    np.testing.assert_allclose(np.asarray(sim), np.asarray(sim_ref),
                               rtol=2e-3, atol=2e-3)

    # ---- fc mode ----
    logits = fc_forward_pallas(qry, fc_w, fc_b)
    logits = jax.block_until_ready(logits)
    logits_ref = fc_reference(qry, fc_w, fc_b)
    np.testing.assert_allclose(np.asarray(logits), np.asarray(logits_ref),
                               rtol=1e-3, atol=1e-3)

    print("KERNEL_OK")
</pallas_src>

<mosaic_0001>
module attributes {stable_mosaic.version = 11 : i64} {
  func.func @cca_kernel(%arg0: memref<2x9x12xf32, #tpu.memory_space<vmem>>, %arg1: memref<3x9x12xf32, #tpu.memory_space<vmem>>, %arg2: memref<18x12xf32, #tpu.memory_space<vmem>>, %arg3: memref<27x12xf32, #tpu.memory_space<vmem>>, %arg4: memref<3x2xf32, #tpu.memory_space<vmem>>) attributes {dimension_semantics = [], scalar_prefetch = 0 : i64, scratch_operands = 0 : i64, tpu.core_type = #tpu.core_type<tc>} {
    %c0 = arith.constant 0 : index
    %c0_0 = arith.constant 0 : index
    %c0_1 = arith.constant 0 : index
    %0 = vector.load %arg0[%c0, %c0_0, %c0_1] : memref<2x9x12xf32, #tpu.memory_space<vmem>>, vector<2x9x12xf32>
    %c0_2 = arith.constant 0 : index
    %c0_3 = arith.constant 0 : index
    %c0_4 = arith.constant 0 : index
    %1 = vector.load %arg1[%c0_2, %c0_3, %c0_4] : memref<3x9x12xf32, #tpu.memory_space<vmem>>, vector<3x9x12xf32>
    %c0_5 = arith.constant 0 : index
    %c0_6 = arith.constant 0 : index
    %2 = vector.load %arg2[%c0_5, %c0_6] : memref<18x12xf32, #tpu.memory_space<vmem>>, vector<18x12xf32>
    %c0_7 = arith.constant 0 : index
    %c0_8 = arith.constant 0 : index
    %3 = vector.load %arg3[%c0_7, %c0_8] : memref<27x12xf32, #tpu.memory_space<vmem>>, vector<27x12xf32>
    %cst = arith.constant dense<0.000000e+00> : vector<2x9xf32>
    %4 = vector.multi_reduction <add>, %0, %cst [2] : vector<2x9x12xf32> to vector<2x9xf32>
    %5 = vector.shape_cast %4 : vector<2x9xf32> to vector<2x9x1xf32>
    %cst_9 = arith.constant 1.200000e+01 : f32
    %6 = vector.broadcast %cst_9 : f32 to vector<2x9x1xf32>
    %7 = arith.divf %5, %6 : vector<2x9x1xf32>
    %8 = vector.broadcast %7 : vector<2x9x1xf32> to vector<2x9x12xf32>
    %9 = arith.subf %0, %8 : vector<2x9x12xf32>
    %cst_10 = arith.constant dense<0.000000e+00> : vector<3x9xf32>
    %10 = vector.multi_reduction <add>, %1, %cst_10 [2] : vector<3x9x12xf32> to vector<3x9xf32>
    %11 = vector.shape_cast %10 : vector<3x9xf32> to vector<3x9x1xf32>
    %cst_11 = arith.constant 1.200000e+01 : f32
    %12 = vector.broadcast %cst_11 : f32 to vector<3x9x1xf32>
    %13 = arith.divf %11, %12 : vector<3x9x1xf32>
    %14 = vector.broadcast %13 : vector<3x9x1xf32> to vector<3x9x12xf32>
    %15 = arith.subf %1, %14 : vector<3x9x12xf32>
    %cst_12 = arith.constant dense<0.000000e+00> : vector<18xf32>
    %16 = vector.multi_reduction <add>, %2, %cst_12 [1] : vector<18x12xf32> to vector<18xf32>
    %17 = vector.shape_cast %16 : vector<18xf32> to vector<18x1xf32>
    %cst_13 = arith.constant 1.200000e+01 : f32
    %18 = vector.broadcast %cst_13 : f32 to vector<18x1xf32>
    %19 = arith.divf %17, %18 : vector<18x1xf32>
    %20 = vector.broadcast %19 : vector<18x1xf32> to vector<18x12xf32>
    %21 = arith.subf %2, %20 : vector<18x12xf32>
    %cst_14 = arith.constant dense<0.000000e+00> : vector<27xf32>
    %22 = vector.multi_reduction <add>, %3, %cst_14 [1] : vector<27x12xf32> to vector<27xf32>
    %23 = vector.shape_cast %22 : vector<27xf32> to vector<27x1xf32>
    %cst_15 = arith.constant 1.200000e+01 : f32
    %24 = vector.broadcast %cst_15 : f32 to vector<27x1xf32>
    %25 = arith.divf %23, %24 : vector<27x1xf32>
    %26 = vector.broadcast %25 : vector<27x1xf32> to vector<27x12xf32>
    %27 = arith.subf %3, %26 : vector<27x12xf32>
    %28 = vector.extract_strided_slice %9 {offsets = [0, 0, 0], sizes = [2, 9, 4], strides = [1, 1, 1]} : vector<2x9x12xf32> to vector<2x9x4xf32>
    %29 = vector.extract_strided_slice %15 {offsets = [0, 0, 0], sizes = [3, 9, 4], strides = [1, 1, 1]} : vector<3x9x12xf32> to vector<3x9x4xf32>
    %30 = vector.extract_strided_slice %21 {offsets = [0, 0], sizes = [18, 4], strides = [1, 1]} : vector<18x12xf32> to vector<18x4xf32>
    %31 = vector.extract_strided_slice %27 {offsets = [0, 0], sizes = [27, 4], strides = [1, 1]} : vector<27x12xf32> to vector<27x4xf32>
    %32 = arith.mulf %28, %28 : vector<2x9x4xf32>
    %cst_16 = arith.constant dense<0.000000e+00> : vector<2x9xf32>
    %33 = vector.multi_reduction <add>, %32, %cst_16 [2] : vector<2x9x4xf32> to vector<2x9xf32>
    %34 = vector.shape_cast %33 : vector<2x9xf32> to vector<2x9x1xf32>
    %cst_17 = arith.constant 9.99999997E-7 : f32
    %35 = vector.broadcast %cst_17 : f32 to vector<2x9x1xf32>
    %36 = arith.addf %34, %35 : vector<2x9x1xf32>
    %37 = math.rsqrt %36 : vector<2x9x1xf32>
    %38 = vector.broadcast %37 : vector<2x9x1xf32> to vector<2x9x4xf32>
    %39 = arith.mulf %28, %38 : vector<2x9x4xf32>
    %40 = arith.mulf %29, %29 : vector<3x9x4xf32>
    %cst_18 = arith.constant dense<0.000000e+00> : vector<3x9xf32>
    %41 = vector.multi_reduction <add>, %40, %cst_18 [2] : vector<3x9x4xf32> to vector<3x9xf32>
    %42 = vector.shape_cast %41 : vector<3x9xf32> to vector<3x9x1xf32>
    %cst_19 = arith.constant 9.99999997E-7 : f32
    %43 = vector.broadcast %cst_19 : f32 to vector<3x9x1xf32>
    %44 = arith.addf %42, %43 : vector<3x9x1xf32>
    %45 = math.rsqrt %44 : vector<3x9x1xf32>
    %46 = vector.broadcast %45 : vector<3x9x1xf32> to vector<3x9x4xf32>
    %47 = arith.mulf %29, %46 : vector<3x9x4xf32>
    %48 = arith.mulf %30, %30 : vector<18x4xf32>
    %cst_20 = arith.constant dense<0.000000e+00> : vector<18xf32>
    %49 = vector.multi_reduction <add>, %48, %cst_20 [1] : vector<18x4xf32> to vector<18xf32>
    %50 = vector.shape_cast %49 : vector<18xf32> to vector<18x1xf32>
    %cst_21 = arith.constant 9.99999997E-7 : f32
    %51 = vector.broadcast %cst_21 : f32 to vector<18x1xf32>
    %52 = arith.addf %50, %51 : vector<18x1xf32>
    %53 = math.rsqrt %52 : vector<18x1xf32>
    %54 = vector.broadcast %53 : vector<18x1xf32> to vector<18x4xf32>
    %55 = arith.mulf %30, %54 : vector<18x4xf32>
    %56 = arith.mulf %31, %31 : vector<27x4xf32>
    %cst_22 = arith.constant dense<0.000000e+00> : vector<27xf32>
    %57 = vector.multi_reduction <add>, %56, %cst_22 [1] : vector<27x4xf32> to vector<27xf32>
    %58 = vector.shape_cast %57 : vector<27xf32> to vector<27x1xf32>
    %cst_23 = arith.constant 9.99999997E-7 : f32
    %59 = vector.broadcast %cst_23 : f32 to vector<27x1xf32>
    %60 = arith.addf %58, %59 : vector<27x1xf32>
    %61 = math.rsqrt %60 : vector<27x1xf32>
    %62 = vector.broadcast %61 : vector<27x1xf32> to vector<27x4xf32>
    %63 = arith.mulf %31, %62 : vector<27x4xf32>
    %64 = vector.shape_cast %63 : vector<27x4xf32> to vector<1x27x4xf32>
    %65 = vector.shape_cast %64 : vector<1x27x4xf32> to vector<1x27x4xf32>
    %66 = vector.broadcast %65 : vector<1x27x4xf32> to vector<2x27x4xf32>
    %cst_24 = arith.constant dense<0.000000e+00> : vector<2x9x27xf32>
    %67 = tpu.matmul %39, %66, %cst_24 {dimension_numbers = #tpu.dot_dimension_numbers<[2], [2], [1], [1], [0, 0, 0, 1, 1, 1], [0], [0]>} : vector<2x9x4xf32>, vector<2x27x4xf32>, vector<2x9x27xf32> -> vector<2x9x27xf32>
    %cst_25 = arith.constant dense<0.000000e+00> : vector<2x27xf32>
    %68 = vector.multi_reduction <add>, %67, %cst_25 [1] : vector<2x9x27xf32> to vector<2x27xf32>
    %69 = vector.shape_cast %68 : vector<2x27xf32> to vector<2x1x27xf32>
    %cst_26 = arith.constant 9.000000e+00 : f32
    %70 = vector.broadcast %cst_26 : f32 to vector<2x1x27xf32>
    %71 = arith.divf %69, %70 : vector<2x1x27xf32>
    %72 = vector.broadcast %71 : vector<2x1x27xf32> to vector<2x9x27xf32>
    %73 = arith.subf %67, %72 : vector<2x9x27xf32>
    %74 = arith.mulf %73, %73 : vector<2x9x27xf32>
    %cst_27 = arith.constant dense<0.000000e+00> : vector<2x27xf32>
    %75 = vector.multi_reduction <add>, %74, %cst_27 [1] : vector<2x9x27xf32> to vector<2x27xf32>
    %76 = vector.shape_cast %75 : vector<2x27xf32> to vector<2x1x27xf32>
    %cst_28 = arith.constant 1.250000e-01 : f32
    %77 = vector.broadcast %cst_28 : f32 to vector<2x1x27xf32>
    %78 = arith.mulf %76, %77 : vector<2x1x27xf32>
    %cst_29 = arith.constant 9.99999974E-6 : f32
    %79 = vector.broadcast %cst_29 : f32 to vector<2x1x27xf32>
    %80 = arith.addf %78, %79 : vector<2x1x27xf32>
    %81 = math.rsqrt %80 : vector<2x1x27xf32>
    %82 = vector.broadcast %81 : vector<2x1x27xf32> to vector<2x9x27xf32>
    %83 = arith.mulf %73, %82 : vector<2x9x27xf32>
    %cst_30 = arith.constant 2.000000e-01 : f32
    %84 = vector.broadcast %cst_30 : f32 to vector<2x9x27xf32>
    %85 = arith.mulf %83, %84 : vector<2x9x27xf32>
    %cst_31 = arith.constant dense<0xFF800000> : vector<2x27xf32>
    %86 = vector.multi_reduction <maximumf>, %85, %cst_31 [1] : vector<2x9x27xf32> to vector<2x27xf32>
    %87 = vector.shape_cast %86 : vector<2x27xf32> to vector<2x1x27xf32>
    %88 = vector.broadcast %87 : vector<2x1x27xf32> to vector<2x9x27xf32>
    %89 = arith.subf %85, %88 : vector<2x9x27xf32>
    %90 = math.exp %89 : vector<2x9x27xf32>
    %cst_32 = arith.constant dense<0.000000e+00> : vector<2x27xf32>
    %91 = vector.multi_reduction <add>, %90, %cst_32 [1] : vector<2x9x27xf32> to vector<2x27xf32>
    %92 = vector.shape_cast %91 : vector<2x27xf32> to vector<2x1x27xf32>
    %93 = tpu.reciprocal %92 : vector<2x1x27xf32> -> vector<2x1x27xf32>
    %94 = vector.broadcast %93 : vector<2x1x27xf32> to vector<2x9x27xf32>
    %95 = arith.mulf %90, %94 : vector<2x9x27xf32>
    %96 = vector.extract_strided_slice %95 {offsets = [0, 0, 0], sizes = [2, 9, 9], strides = [1, 1, 1]} : vector<2x9x27xf32> to vector<2x9x9xf32>
    %cst_33 = arith.constant dense<0.000000e+00> : vector<2x9xf32>
    %97 = vector.multi_reduction <add>, %96, %cst_33 [2] : vector<2x9x9xf32> to vector<2x9xf32>
    %98 = vector.shape_cast %97 : vector<2x9xf32> to vector<2x9x1xf32>
    %99 = vector.broadcast %98 : vector<2x9x1xf32> to vector<2x9x4xf32>
    %100 = arith.mulf %99, %28 : vector<2x9x4xf32>
    %cst_34 = arith.constant dense<0.000000e+00> : vector<2x4xf32>
    %101 = vector.multi_reduction <add>, %100, %cst_34 [1] : vector<2x9x4xf32> to vector<2x4xf32>
    %cst_35 = arith.constant 0.111111112 : f32
    %102 = vector.broadcast %cst_35 : f32 to vector<2x4xf32>
    %103 = arith.mulf %101, %102 : vector<2x4xf32>
    %104 = vector.extract_strided_slice %95 {offsets = [0, 0, 9], sizes = [2, 9, 9], strides = [1, 1, 1]} : vector<2x9x27xf32> to vector<2x9x9xf32>
    %cst_36 = arith.constant dense<0.000000e+00> : vector<2x9xf32>
    %105 = vector.multi_reduction <add>, %104, %cst_36 [2] : vector<2x9x9xf32> to vector<2x9xf32>
    %106 = vector.shape_cast %105 : vector<2x9xf32> to vector<2x9x1xf32>
    %107 = vector.broadcast %106 : vector<2x9x1xf32> to vector<2x9x4xf32>
    %108 = arith.mulf %107, %28 : vector<2x9x4xf32>
    %cst_37 = arith.constant dense<0.000000e+00> : vector<2x4xf32>
    %109 = vector.multi_reduction <add>, %108, %cst_37 [1] : vector<2x9x4xf32> to vector<2x4xf32>
    %cst_38 = arith.constant 0.111111112 : f32
    %110 = vector.broadcast %cst_38 : f32 to vector<2x4xf32>
    %111 = arith.mulf %109, %110 : vector<2x4xf32>
    %112 = vector.extract_strided_slice %95 {offsets = [0, 0, 18], sizes = [2, 9, 9], strides = [1, 1, 1]} : vector<2x9x27xf32> to vector<2x9x9xf32>
    %cst_39 = arith.constant dense<0.000000e+00> : vector<2x9xf32>
    %113 = vector.multi_reduction <add>, %112, %cst_39 [2] : vector<2x9x9xf32> to vector<2x9xf32>
    %114 = vector.shape_cast %113 : vector<2x9xf32> to vector<2x9x1xf32>
    %115 = vector.broadcast %114 : vector<2x9x1xf32> to vector<2x9x4xf32>
    %116 = arith.mulf %115, %28 : vector<2x9x4xf32>
    %cst_40 = arith.constant dense<0.000000e+00> : vector<2x4xf32>
    %117 = vector.multi_reduction <add>, %116, %cst_40 [1] : vector<2x9x4xf32> to vector<2x4xf32>
    %cst_41 = arith.constant 0.111111112 : f32
    %118 = vector.broadcast %cst_41 : f32 to vector<2x4xf32>
    %119 = arith.mulf %117, %118 : vector<2x4xf32>
    %120 = vector.shape_cast %103 : vector<2x4xf32> to vector<1x2x4xf32>
    %121 = vector.shape_cast %111 : vector<2x4xf32> to vector<1x2x4xf32>
    %122 = vector.shape_cast %119 : vector<2x4xf32> to vector<1x2x4xf32>
    %123 = tpu.concatenate %120, %121, %122 in 0 : vector<1x2x4xf32>, vector<1x2x4xf32>, vector<1x2x4xf32> -> vector<3x2x4xf32>
    %124 = vector.shape_cast %55 : vector<18x4xf32> to vector<1x18x4xf32>
    %125 = vector.shape_cast %124 : vector<1x18x4xf32> to vector<1x18x4xf32>
    %126 = vector.broadcast %125 : vector<1x18x4xf32> to vector<3x18x4xf32>
    %cst_42 = arith.constant dense<0.000000e+00> : vector<3x9x18xf32>
    %127 = tpu.matmul %47, %126, %cst_42 {dimension_numbers = #tpu.dot_dimension_numbers<[2], [2], [1], [1], [0, 0, 0, 1, 1, 1], [0], [0]>} : vector<3x9x4xf32>, vector<3x18x4xf32>, vector<3x9x18xf32> -> vector<3x9x18xf32>
    %cst_43 = arith.constant dense<0.000000e+00> : vector<3x18xf32>
    %128 = vector.multi_reduction <add>, %127, %cst_43 [1] : vector<3x9x18xf32> to vector<3x18xf32>
    %129 = vector.shape_cast %128 : vector<3x18xf32> to vector<3x1x18xf32>
    %cst_44 = arith.constant 9.000000e+00 : f32
    %130 = vector.broadcast %cst_44 : f32 to vector<3x1x18xf32>
    %131 = arith.divf %129, %130 : vector<3x1x18xf32>
    %132 = vector.broadcast %131 : vector<3x1x18xf32> to vector<3x9x18xf32>
    %133 = arith.subf %127, %132 : vector<3x9x18xf32>
    %134 = arith.mulf %133, %133 : vector<3x9x18xf32>
    %cst_45 = arith.constant dense<0.000000e+00> : vector<3x18xf32>
    %135 = vector.multi_reduction <add>, %134, %cst_45 [1] : vector<3x9x18xf32> to vector<3x18xf32>
    %136 = vector.shape_cast %135 : vector<3x18xf32> to vector<3x1x18xf32>
    %cst_46 = arith.constant 1.250000e-01 : f32
    %137 = vector.broadcast %cst_46 : f32 to vector<3x1x18xf32>
    %138 = arith.mulf %136, %137 : vector<3x1x18xf32>
    %cst_47 = arith.constant 9.99999974E-6 : f32
    %139 = vector.broadcast %cst_47 : f32 to vector<3x1x18xf32>
    %140 = arith.addf %138, %139 : vector<3x1x18xf32>
    %141 = math.rsqrt %140 : vector<3x1x18xf32>
    %142 = vector.broadcast %141 : vector<3x1x18xf32> to vector<3x9x18xf32>
    %143 = arith.mulf %133, %142 : vector<3x9x18xf32>
    %cst_48 = arith.constant 2.000000e-01 : f32
    %144 = vector.broadcast %cst_48 : f32 to vector<3x9x18xf32>
    %145 = arith.mulf %143, %144 : vector<3x9x18xf32>
    %cst_49 = arith.constant dense<0xFF800000> : vector<3x18xf32>
    %146 = vector.multi_reduction <maximumf>, %145, %cst_49 [1] : vector<3x9x18xf32> to vector<3x18xf32>
    %147 = vector.shape_cast %146 : vector<3x18xf32> to vector<3x1x18xf32>
    %148 = vector.broadcast %147 : vector<3x1x18xf32> to vector<3x9x18xf32>
    %149 = arith.subf %145, %148 : vector<3x9x18xf32>
    %150 = math.exp %149 : vector<3x9x18xf32>
    %cst_50 = arith.constant dense<0.000000e+00> : vector<3x18xf32>
    %151 = vector.multi_reduction <add>, %150, %cst_50 [1] : vector<3x9x18xf32> to vector<3x18xf32>
    %152 = vector.shape_cast %151 : vector<3x18xf32> to vector<3x1x18xf32>
    %153 = tpu.reciprocal %152 : vector<3x1x18xf32> -> vector<3x1x18xf32>
    %154 = vector.broadcast %153 : vector<3x1x18xf32> to vector<3x9x18xf32>
    %155 = arith.mulf %150, %154 : vector<3x9x18xf32>
    %156 = vector.extract_strided_slice %155 {offsets = [0, 0, 0], sizes = [3, 9, 9], strides = [1, 1, 1]} : vector<3x9x18xf32> to vector<3x9x9xf32>
    %cst_51 = arith.constant dense<0.000000e+00> : vector<3x9xf32>
    %157 = vector.multi_reduction <add>, %156, %cst_51 [2] : vector<3x9x9xf32> to vector<3x9xf32>
    %158 = vector.shape_cast %157 : vector<3x9xf32> to vector<3x9x1xf32>
    %159 = vector.broadcast %158 : vector<3x9x1xf32> to vector<3x9x4xf32>
    %160 = arith.mulf %159, %29 : vector<3x9x4xf32>
    %cst_52 = arith.constant dense<0.000000e+00> : vector<3x4xf32>
    %161 = vector.multi_reduction <add>, %160, %cst_52 [1] : vector<3x9x4xf32> to vector<3x4xf32>
    %cst_53 = arith.constant 0.111111112 : f32
    %162 = vector.broadcast %cst_53 : f32 to vector<3x4xf32>
    %163 = arith.mulf %161, %162 : vector<3x4xf32>
    %164 = vector.extract_strided_slice %155 {offsets = [0, 0, 9], sizes = [3, 9, 9], strides = [1, 1, 1]} : vector<3x9x18xf32> to vector<3x9x9xf32>
    %cst_54 = arith.constant dense<0.000000e+00> : vector<3x9xf32>
    %165 = vector.multi_reduction <add>, %164, %cst_54 [2] : vector<3x9x9xf32> to vector<3x9xf32>
    %166 = vector.shape_cast %165 : vector<3x9xf32> to vector<3x9x1xf32>
    %167 = vector.broadcast %166 : vector<3x9x1xf32> to vector<3x9x4xf32>
    %168 = arith.mulf %167, %29 : vector<3x9x4xf32>
    %cst_55 = arith.constant dense<0.000000e+00> : vector<3x4xf32>
    %169 = vector.multi_reduction <add>, %168, %cst_55 [1] : vector<3x9x4xf32> to vector<3x4xf32>
    %cst_56 = arith.constant 0.111111112 : f32
    %170 = vector.broadcast %cst_56 : f32 to vector<3x4xf32>
    %171 = arith.mulf %169, %170 : vector<3x4xf32>
    %172 = vector.shape_cast %163 : vector<3x4xf32> to vector<3x1x4xf32>
    %173 = vector.shape_cast %171 : vector<3x4xf32> to vector<3x1x4xf32>
    %174 = tpu.concatenate %172, %173 in 1 : vector<3x1x4xf32>, vector<3x1x4xf32> -> vector<3x2x4xf32>
    %175 = vector.extract_strided_slice %9 {offsets = [0, 0, 4], sizes = [2, 9, 8], strides = [1, 1, 1]} : vector<2x9x12xf32> to vector<2x9x8xf32>
    %176 = vector.extract_strided_slice %15 {offsets = [0, 0, 4], sizes = [3, 9, 8], strides = [1, 1, 1]} : vector<3x9x12xf32> to vector<3x9x8xf32>
    %177 = vector.extract_strided_slice %21 {offsets = [0, 4], sizes = [18, 8], strides = [1, 1]} : vector<18x12xf32> to vector<18x8xf32>
    %178 = vector.extract_strided_slice %27 {offsets = [0, 4], sizes = [27, 8], strides = [1, 1]} : vector<27x12xf32> to vector<27x8xf32>
    %179 = arith.mulf %175, %175 : vector<2x9x8xf32>
    %cst_57 = arith.constant dense<0.000000e+00> : vector<2x9xf32>
    %180 = vector.multi_reduction <add>, %179, %cst_57 [2] : vector<2x9x8xf32> to vector<2x9xf32>
    %181 = vector.shape_cast %180 : vector<2x9xf32> to vector<2x9x1xf32>
    %cst_58 = arith.constant 9.99999997E-7 : f32
    %182 = vector.broadcast %cst_58 : f32 to vector<2x9x1xf32>
    %183 = arith.addf %181, %182 : vector<2x9x1xf32>
    %184 = math.rsqrt %183 : vector<2x9x1xf32>
    %185 = vector.broadcast %184 : vector<2x9x1xf32> to vector<2x9x8xf32>
    %186 = arith.mulf %175, %185 : vector<2x9x8xf32>
    %187 = arith.mulf %176, %176 : vector<3x9x8xf32>
    %cst_59 = arith.constant dense<0.000000e+00> : vector<3x9xf32>
    %188 = vector.multi_reduction <add>, %187, %cst_59 [2] : vector<3x9x8xf32> to vector<3x9xf32>
    %189 = vector.shape_cast %188 : vector<3x9xf32> to vector<3x9x1xf32>
    %cst_60 = arith.constant 9.99999997E-7 : f32
    %190 = vector.broadcast %cst_60 : f32 to vector<3x9x1xf32>
    %191 = arith.addf %189, %190 : vector<3x9x1xf32>
    %192 = math.rsqrt %191 : vector<3x9x1xf32>
    %193 = vector.broadcast %192 : vector<3x9x1xf32> to vector<3x9x8xf32>
    %194 = arith.mulf %176, %193 : vector<3x9x8xf32>
    %195 = arith.mulf %177, %177 : vector<18x8xf32>
    %cst_61 = arith.constant dense<0.000000e+00> : vector<18xf32>
    %196 = vector.multi_reduction <add>, %195, %cst_61 [1] : vector<18x8xf32> to vector<18xf32>
    %197 = vector.shape_cast %196 : vector<18xf32> to vector<18x1xf32>
    %cst_62 = arith.constant 9.99999997E-7 : f32
    %198 = vector.broadcast %cst_62 : f32 to vector<18x1xf32>
    %199 = arith.addf %197, %198 : vector<18x1xf32>
    %200 = math.rsqrt %199 : vector<18x1xf32>
    %201 = vector.broadcast %200 : vector<18x1xf32> to vector<18x8xf32>
    %202 = arith.mulf %177, %201 : vector<18x8xf32>
    %203 = arith.mulf %178, %178 : vector<27x8xf32>
    %cst_63 = arith.constant dense<0.000000e+00> : vector<27xf32>
    %204 = vector.multi_reduction <add>, %203, %cst_63 [1] : vector<27x8xf32> to vector<27xf32>
    %205 = vector.shape_cast %204 : vector<27xf32> to vector<27x1xf32>
    %cst_64 = arith.constant 9.99999997E-7 : f32
    %206 = vector.broadcast %cst_64 : f32 to vector<27x1xf32>
    %207 = arith.addf %205, %206 : vector<27x1xf32>
    %208 = math.rsqrt %207 : vector<27x1xf32>
    %209 = vector.broadcast %208 : vector<27x1xf32> to vector<27x8xf32>
    %210 = arith.mulf %178, %209 : vector<27x8xf32>
    %211 = vector.shape_cast %210 : vector<27x8xf32> to vector<1x27x8xf32>
    %212 = vector.shape_cast %211 : vector<1x27x8xf32> to vector<1x27x8xf32>
    %213 = vector.broadcast %212 : vector<1x27x8xf32> to vector<2x27x8xf32>
    %cst_65 = arith.constant dense<0.000000e+00> : vector<2x9x27xf32>
    %214 = tpu.matmul %186, %213, %cst_65 {dimension_numbers = #tpu.dot_dimension_numbers<[2], [2], [1], [1], [0, 0, 0, 1, 1, 1], [0], [0]>} : vector<2x9x8xf32>, vector<2x27x8xf32>, vector<2x9x27xf32> -> vector<2x9x27xf32>
    %cst_66 = arith.constant dense<0.000000e+00> : vector<2x27xf32>
    %215 = vector.multi_reduction <add>, %214, %cst_66 [1] : vector<2x9x27xf32> to vector<2x27xf32>
    %216 = vector.shape_cast %215 : vector<2x27xf32> to vector<2x1x27xf32>
    %cst_67 = arith.constant 9.000000e+00 : f32
    %217 = vector.broadcast %cst_67 : f32 to vector<2x1x27xf32>
    %218 = arith.divf %216, %217 : vector<2x1x27xf32>
    %219 = vector.broadcast %218 : vector<2x1x27xf32> to vector<2x9x27xf32>
    %220 = arith.subf %214, %219 : vector<2x9x27xf32>
    %221 = arith.mulf %220, %220 : vector<2x9x27xf32>
    %cst_68 = arith.constant dense<0.000000e+00> : vector<2x27xf32>
    %222 = vector.multi_reduction <add>, %221, %cst_68 [1] : vector<2x9x27xf32> to vector<2x27xf32>
    %223 = vector.shape_cast %222 : vector<2x27xf32> to vector<2x1x27xf32>
    %cst_69 = arith.constant 1.250000e-01 : f32
    %224 = vector.broadcast %cst_69 : f32 to vector<2x1x27xf32>
    %225 = arith.mulf %223, %224 : vector<2x1x27xf32>
    %cst_70 = arith.constant 9.99999974E-6 : f32
    %226 = vector.broadcast %cst_70 : f32 to vector<2x1x27xf32>
    %227 = arith.addf %225, %226 : vector<2x1x27xf32>
    %228 = math.rsqrt %227 : vector<2x1x27xf32>
    %229 = vector.broadcast %228 : vector<2x1x27xf32> to vector<2x9x27xf32>
    %230 = arith.mulf %220, %229 : vector<2x9x27xf32>
    %cst_71 = arith.constant 2.000000e-01 : f32
    %231 = vector.broadcast %cst_71 : f32 to vector<2x9x27xf32>
    %232 = arith.mulf %230, %231 : vector<2x9x27xf32>
    %cst_72 = arith.constant dense<0xFF800000> : vector<2x27xf32>
    %233 = vector.multi_reduction <maximumf>, %232, %cst_72 [1] : vector<2x9x27xf32> to vector<2x27xf32>
    %234 = vector.shape_cast %233 : vector<2x27xf32> to vector<2x1x27xf32>
    %235 = vector.broadcast %234 : vector<2x1x27xf32> to vector<2x9x27xf32>
    %236 = arith.subf %232, %235 : vector<2x9x27xf32>
    %237 = math.exp %236 : vector<2x9x27xf32>
    %cst_73 = arith.constant dense<0.000000e+00> : vector<2x27xf32>
    %238 = vector.multi_reduction <add>, %237, %cst_73 [1] : vector<2x9x27xf32> to vector<2x27xf32>
    %239 = vector.shape_cast %238 : vector<2x27xf32> to vector<2x1x27xf32>
    %240 = tpu.reciprocal %239 : vector<2x1x27xf32> -> vector<2x1x27xf32>
    %241 = vector.broadcast %240 : vector<2x1x27xf32> to vector<2x9x27xf32>
    %242 = arith.mulf %237, %241 : vector<2x9x27xf32>
    %243 = vector.extract_strided_slice %242 {offsets = [0, 0, 0], sizes = [2, 9, 9], strides = [1, 1, 1]} : vector<2x9x27xf32> to vector<2x9x9xf32>
    %cst_74 = arith.constant dense<0.000000e+00> : vector<2x9xf32>
    %244 = vector.multi_reduction <add>, %243, %cst_74 [2] : vector<2x9x9xf32> to vector<2x9xf32>
    %245 = vector.shape_cast %244 : vector<2x9xf32> to vector<2x9x1xf32>
    %246 = vector.broadcast %245 : vector<2x9x1xf32> to vector<2x9x8xf32>
    %247 = arith.mulf %246, %175 : vector<2x9x8xf32>
    %cst_75 = arith.constant dense<0.000000e+00> : vector<2x8xf32>
    %248 = vector.multi_reduction <add>, %247, %cst_75 [1] : vector<2x9x8xf32> to vector<2x8xf32>
    %cst_76 = arith.constant 0.111111112 : f32
    %249 = vector.broadcast %cst_76 : f32 to vector<2x8xf32>
    %250 = arith.mulf %248, %249 : vector<2x8xf32>
    %251 = vector.extract_strided_slice %242 {offsets = [0, 0, 9], sizes = [2, 9, 9], strides = [1, 1, 1]} : vector<2x9x27xf32> to vector<2x9x9xf32>
    %cst_77 = arith.constant dense<0.000000e+00> : vector<2x9xf32>
    %252 = vector.multi_reduction <add>, %251, %cst_77 [2] : vector<2x9x9xf32> to vector<2x9xf32>
    %253 = vector.shape_cast %252 : vector<2x9xf32> to vector<2x9x1xf32>
    %254 = vector.broadcast %253 : vector<2x9x1xf32> to vector<2x9x8xf32>
    %255 = arith.mulf %254, %175 : vector<2x9x8xf32>
    %cst_78 = arith.constant dense<0.000000e+00> : vector<2x8xf32>
    %256 = vector.multi_reduction <add>, %255, %cst_78 [1] : vector<2x9x8xf32> to vector<2x8xf32>
    %cst_79 = arith.constant 0.111111112 : f32
    %257 = vector.broadcast %cst_79 : f32 to vector<2x8xf32>
    %258 = arith.mulf %256, %257 : vector<2x8xf32>
    %259 = vector.extract_strided_slice %242 {offsets = [0, 0, 18], sizes = [2, 9, 9], strides = [1, 1, 1]} : vector<2x9x27xf32> to vector<2x9x9xf32>
    %cst_80 = arith.constant dense<0.000000e+00> : vector<2x9xf32>
    %260 = vector.multi_reduction <add>, %259, %cst_80 [2] : vector<2x9x9xf32> to vector<2x9xf32>
    %261 = vector.shape_cast %260 : vector<2x9xf32> to vector<2x9x1xf32>
    %262 = vector.broadcast %261 : vector<2x9x1xf32> to vector<2x9x8xf32>
    %263 = arith.mulf %262, %175 : vector<2x9x8xf32>
    %cst_81 = arith.constant dense<0.000000e+00> : vector<2x8xf32>
    %264 = vector.multi_reduction <add>, %263, %cst_81 [1] : vector<2x9x8xf32> to vector<2x8xf32>
    %cst_82 = arith.constant 0.111111112 : f32
    %265 = vector.broadcast %cst_82 : f32 to vector<2x8xf32>
    %266 = arith.mulf %264, %265 : vector<2x8xf32>
    %267 = vector.shape_cast %250 : vector<2x8xf32> to vector<1x2x8xf32>
    %268 = vector.shape_cast %258 : vector<2x8xf32> to vector<1x2x8xf32>
    %269 = vector.shape_cast %266 : vector<2x8xf32> to vector<1x2x8xf32>
    %270 = tpu.concatenate %267, %268, %269 in 0 : vector<1x2x8xf32>, vector<1x2x8xf32>, vector<1x2x8xf32> -> vector<3x2x8xf32>
    %271 = vector.shape_cast %202 : vector<18x8xf32> to vector<1x18x8xf32>
    %272 = vector.shape_cast %271 : vector<1x18x8xf32> to vector<1x18x8xf32>
    %273 = vector.broadcast %272 : vector<1x18x8xf32> to vector<3x18x8xf32>
    %cst_83 = arith.constant dense<0.000000e+00> : vector<3x9x18xf32>
    %274 = tpu.matmul %194, %273, %cst_83 {dimension_numbers = #tpu.dot_dimension_numbers<[2], [2], [1], [1], [0, 0, 0, 1, 1, 1], [0], [0]>} : vector<3x9x8xf32>, vector<3x18x8xf32>, vector<3x9x18xf32> -> vector<3x9x18xf32>
    %cst_84 = arith.constant dense<0.000000e+00> : vector<3x18xf32>
    %275 = vector.multi_reduction <add>, %274, %cst_84 [1] : vector<3x9x18xf32> to vector<3x18xf32>
    %276 = vector.shape_cast %275 : vector<3x18xf32> to vector<3x1x18xf32>
    %cst_85 = arith.constant 9.000000e+00 : f32
    %277 = vector.broadcast %cst_85 : f32 to vector<3x1x18xf32>
    %278 = arith.divf %276, %277 : vector<3x1x18xf32>
    %279 = vector.broadcast %278 : vector<3x1x18xf32> to vector<3x9x18xf32>
    %280 = arith.subf %274, %279 : vector<3x9x18xf32>
    %281 = arith.mulf %280, %280 : vector<3x9x18xf32>
    %cst_86 = arith.constant dense<0.000000e+00> : vector<3x18xf32>
    %282 = vector.multi_reduction <add>, %281, %cst_86 [1] : vector<3x9x18xf32> to vector<3x18xf32>
    %283 = vector.shape_cast %282 : vector<3x18xf32> to vector<3x1x18xf32>
    %cst_87 = arith.constant 1.250000e-01 : f32
    %284 = vector.broadcast %cst_87 : f32 to vector<3x1x18xf32>
    %285 = arith.mulf %283, %284 : vector<3x1x18xf32>
    %cst_88 = arith.constant 9.99999974E-6 : f32
    %286 = vector.broadcast %cst_88 : f32 to vector<3x1x18xf32>
    %287 = arith.addf %285, %286 : vector<3x1x18xf32>
    %288 = math.rsqrt %287 : vector<3x1x18xf32>
    %289 = vector.broadcast %288 : vector<3x1x18xf32> to vector<3x9x18xf32>
    %290 = arith.mulf %280, %289 : vector<3x9x18xf32>
    %cst_89 = arith.constant 2.000000e-01 : f32
    %291 = vector.broadcast %cst_89 : f32 to vector<3x9x18xf32>
    %292 = arith.mulf %290, %291 : vector<3x9x18xf32>
    %cst_90 = arith.constant dense<0xFF800000> : vector<3x18xf32>
    %293 = vector.multi_reduction <maximumf>, %292, %cst_90 [1] : vector<3x9x18xf32> to vector<3x18xf32>
    %294 = vector.shape_cast %293 : vector<3x18xf32> to vector<3x1x18xf32>
    %295 = vector.broadcast %294 : vector<3x1x18xf32> to vector<3x9x18xf32>
    %296 = arith.subf %292, %295 : vector<3x9x18xf32>
    %297 = math.exp %296 : vector<3x9x18xf32>
    %cst_91 = arith.constant dense<0.000000e+00> : vector<3x18xf32>
    %298 = vector.multi_reduction <add>, %297, %cst_91 [1] : vector<3x9x18xf32> to vector<3x18xf32>
    %299 = vector.shape_cast %298 : vector<3x18xf32> to vector<3x1x18xf32>
    %300 = tpu.reciprocal %299 : vector<3x1x18xf32> -> vector<3x1x18xf32>
    %301 = vector.broadcast %300 : vector<3x1x18xf32> to vector<3x9x18xf32>
    %302 = arith.mulf %297, %301 : vector<3x9x18xf32>
    %303 = vector.extract_strided_slice %302 {offsets = [0, 0, 0], sizes = [3, 9, 9], strides = [1, 1, 1]} : vector<3x9x18xf32> to vector<3x9x9xf32>
    %cst_92 = arith.constant dense<0.000000e+00> : vector<3x9xf32>
    %304 = vector.multi_reduction <add>, %303, %cst_92 [2] : vector<3x9x9xf32> to vector<3x9xf32>
    %305 = vector.shape_cast %304 : vector<3x9xf32> to vector<3x9x1xf32>
    %306 = vector.broadcast %305 : vector<3x9x1xf32> to vector<3x9x8xf32>
    %307 = arith.mulf %306, %176 : vector<3x9x8xf32>
    %cst_93 = arith.constant dense<0.000000e+00> : vector<3x8xf32>
    %308 = vector.multi_reduction <add>, %307, %cst_93 [1] : vector<3x9x8xf32> to vector<3x8xf32>
    %cst_94 = arith.constant 0.111111112 : f32
    %309 = vector.broadcast %cst_94 : f32 to vector<3x8xf32>
    %310 = arith.mulf %308, %309 : vector<3x8xf32>
    %311 = vector.extract_strided_slice %302 {offsets = [0, 0, 9], sizes = [3, 9, 9], strides = [1, 1, 1]} : vector<3x9x18xf32> to vector<3x9x9xf32>
    %cst_95 = arith.constant dense<0.000000e+00> : vector<3x9xf32>
    %312 = vector.multi_reduction <add>, %311, %cst_95 [2] : vector<3x9x9xf32> to vector<3x9xf32>
    %313 = vector.shape_cast %312 : vector<3x9xf32> to vector<3x9x1xf32>
    %314 = vector.broadcast %313 : vector<3x9x1xf32> to vector<3x9x8xf32>
    %315 = arith.mulf %314, %176 : vector<3x9x8xf32>
    %cst_96 = arith.constant dense<0.000000e+00> : vector<3x8xf32>
    %316 = vector.multi_reduction <add>, %315, %cst_96 [1] : vector<3x9x8xf32> to vector<3x8xf32>
    %cst_97 = arith.constant 0.111111112 : f32
    %317 = vector.broadcast %cst_97 : f32 to vector<3x8xf32>
    %318 = arith.mulf %316, %317 : vector<3x8xf32>
    %319 = vector.shape_cast %310 : vector<3x8xf32> to vector<3x1x8xf32>
    %320 = vector.shape_cast %318 : vector<3x8xf32> to vector<3x1x8xf32>
    %321 = tpu.concatenate %319, %320 in 1 : vector<3x1x8xf32>, vector<3x1x8xf32> -> vector<3x2x8xf32>
    %322 = tpu.concatenate %123, %270 in 2 : vector<3x2x4xf32>, vector<3x2x8xf32> -> vector<3x2x12xf32>
    %323 = tpu.concatenate %174, %321 in 2 : vector<3x2x4xf32>, vector<3x2x8xf32> -> vector<3x2x12xf32>
    %324 = arith.mulf %322, %323 : vector<3x2x12xf32>
    %cst_98 = arith.constant dense<0.000000e+00> : vector<3x2xf32>
    %325 = vector.multi_reduction <add>, %324, %cst_98 [2] : vector<3x2x12xf32> to vector<3x2xf32>
    %326 = arith.mulf %322, %322 : vector<3x2x12xf32>
    %cst_99 = arith.constant dense<0.000000e+00> : vector<3x2xf32>
    %327 = vector.multi_reduction <add>, %326, %cst_99 [2] : vector<3x2x12xf32> to vector<3x2xf32>
    %328 = arith.mulf %323, %323 : vector<3x2x12xf32>
    %cst_100 = arith.constant dense<0.000000e+00> : vector<3x2xf32>
    %329 = vector.multi_reduction <add>, %328, %cst_100 [2] : vector<3x2x12xf32> to vector<3x2xf32>
    %330 = arith.mulf %327, %329 : vector<3x2xf32>
    %cst_101 = arith.constant 1.000000e-16 : f32
    %331 = vector.broadcast %cst_101 : f32 to vector<3x2xf32>
    %332 = arith.maximumf %330, %331 : vector<3x2xf32>
    %333 = math.rsqrt %332 : vector<3x2xf32>
    %334 = arith.mulf %325, %333 : vector<3x2xf32>
    %cst_102 = arith.constant 5.000000e+00 : f32
    %335 = vector.broadcast %cst_102 : f32 to vector<3x2xf32>
    %336 = arith.mulf %334, %335 : vector<3x2xf32>
    %c0_103 = arith.constant 0 : index
    %c0_104 = arith.constant 0 : index
    %337 = vector.load %arg4[%c0_103, %c0_104] : memref<3x2xf32, #tpu.memory_space<vmem>>, vector<3x2xf32>
    tpu.vector_store %arg4[%c0_103, %c0_104], %336 {strides = array<i32>} : memref<3x2xf32, #tpu.memory_space<vmem>>, vector<3x2xf32>,
    return
  }
}

</mosaic_0001>

<bundles_post_ra>
// kernel: tpu_custom_call.1
= control target key start
LH: loop header
LB: loop body
LE: loop exit
PB: predicated region body
PF: predicated region fallthrough
CT: control target
= control target key end

     0   :  { %vm112_vm0 = vcmask 92160   ;;  %vm34_vm1 = vcmask 97280   ;;  %vm93_vm2 = vcmask 91136   ;;  %vm38_vm3 = vcmask 90112   ;;  %s2908_s20 = smov 119   ;;  %s2909_s21 = smov 110   ;;  %s4024_s3 = inlined_call_operand.vmem [shape: f32[27,12], index: 3, kind: input, shape index: {}]   ;;  %s4025_s2 = inlined_call_operand.vmem [shape: f32[18,12], index: 2, kind: input, shape index: {}]   ;;  %s4026_s0 = inlined_call_operand.vmem [shape: f32[2,9,12], index: 0, kind: input, shape index: {}]   ;;  %s4027_s1 = inlined_call_operand.vmem [shape: f32[3,9,12], index: 1, kind: input, shape index: {}]   ;;  %s4028_s4 = inlined_call_operand.vmem [shape: f32[3,2], index: 4, kind: output, shape index: {}]  }
   0x1   :  { %v33_v0 = vld [vmem:[%s4024_s3 + $0x18] sm:$0x7]  ;;  %v31_v1 = vld [vmem:[%s4024_s3 + $0x8] sm:$0xff]  ;;  %v2944_v2 = vld [vmem:[%s4024_s3 + $0x10] sm:$0xff]  ;;  %vm231_vm4 = vcmask 26624   ;;  %vm128_vm5 = vcmask 31744  }
   0x2   :  { %v113_v3 = vsel %vm112_vm0, %v33_v0, 0.0  ;;  %v106_v4 = vsel %vm34_vm1, %v31_v1, 0.0  ;;  %v2950_v5 = vld [vmem:[%s4024_s3] sm:$0xff]  ;;  %v109_v6 = vsel %vm34_vm1, %v2944_v2, 0.0  ;;  %v2959_v8 = vld [vmem:[%s4025_s2 + $0x10] sm:$0x3] }
   0x3   :  { %114 = vadd.xlane.f32.xlu0 %v113_v3  ;;  %107 = vadd.xlane.f32.xlu1 %v106_v4  ;;  %v103_v7 = vsel %vm34_vm1, %v2950_v5, 0.0  ;;  %v2964_v9 = vld [vmem:[%s4026_s0] sm:$0xff]  ;;  %v94_v10 = vsel %vm93_vm2, %v2959_v8, 0.0  ;;  %v2973_v12 = vld [vmem:[%s4025_s2 + $0x8] sm:$0xff]  ;;  %v2987_v16 = vld [vmem:[%s4026_s0 + $0x10] sm:$0xff]  ;;  %vm1395_vm6 = vcmask 59392  }
   0x4   :  { %v35_v11 = vsel %vm34_vm1, %v2964_v9, 0.0  ;;  %v2978_v13 = vld [vmem:[%s4026_s0 + $0x8] sm:$0x1]  ;;  %v90_v14 = vsel %vm34_vm1, %v2973_v12, 0.0  ;;  %v2992_v17 = vld [vmem:[%s4025_s2] sm:$0xff]  ;;  %v42_v18 = vsel %vm34_vm1, %v2987_v16, 0.0 }
   0x5   :  { %v39_v15 = vsel %vm38_vm3, %v2978_v13, 0.0  ;;  %v87_v19 = vsel %vm34_vm1, %v2992_v17, 0.0  ;;  %v3001_v20 = vld [vmem:[%s4027_s1] sm:$0xff]  ;;  %v3006_v21 = vld [vmem:[%s4026_s0 + $0x18] sm:$0x1]  ;;  %v3015_v24 = vld [vmem:[%s4027_s1 + $0x10] sm:$0xff] }
   0x6   :  { %v57_v22 = vsel %vm34_vm1, %v3001_v20, 0.0  ;;  %v45_v23 = vsel %vm38_vm3, %v3006_v21, 0.0  ;;  %v3020_v25 = vld [vmem:[%s4027_s1 + $0x8] sm:$0x1]  ;;  %v63_v26 = vsel %vm34_vm1, %v3015_v24, 0.0  ;;  %v3029_v28 = vld [vmem:[%s4027_s1 + $0x20] sm:$0xff] }
   0x7   :  { %110 = vadd.xlane.f32.xlu0 %v109_v6  ;;  %104 = vadd.xlane.f32.xlu1 %v103_v7  ;;  %v60_v27 = vsel %vm38_vm3, %v3020_v25, 0.0  ;;  %v3034_v29 = vld [vmem:[%s4027_s1 + $0x18] sm:$0x1]  ;;  %v69_v30 = vsel %vm34_vm1, %v3029_v28, 0.0  ;;  %v3043_v32 = vld [vmem:[%s4027_s1 + $0x28] sm:$0x1] }
   0x8   :  { %v66_v31 = vsel %vm38_vm3, %v3034_v29, 0.0  ;;  %v72_v33 = vsel %vm38_vm3, %v3043_v32, 0.0  ;;  %s2907_s1 = smov 124   ;;  %vm1253_vm7 = vcmask 64512   ;;  %vm1357_vm8 = vcmask 58368  }
   0x9   :  { %vm1257_vm9 = vcmask 57344   ;;  %vm132_vm10 = vcmask 24576   ;;  %vm205_vm11 = vcmask 25600   ;;  %vm423_vm12 = vcmask 212992  }
   0xa   :  { %vm421_vm13 = vcmask 220160   ;;  %vm930_vm14 = vcmask 139264   ;;  %vm928_vm15 = vcmask 146432   ;;  %vm542_vm0 = vcmask 65536  }
   0xb   :  { %95 = vadd.xlane.f32.xlu1 %v94_v10  ;;  %36 = vadd.xlane.f32.xlu0 %v35_v11  ;;  %vm538_vm1 = vcmask 72704   ;;  %vm2436_vm3 = vcmask 1041409  }
   0xf   :  { %91 = vadd.xlane.f32.xlu1 %v90_v14  ;;  %40 = vadd.xlane.f32.xlu0 %v39_v15 }
  0x13   :  { %43 = vadd.xlane.f32.xlu1 %v42_v18  ;;  %88 = vadd.xlane.f32.xlu0 %v87_v19 }
  0x17   :  { %58 = vadd.xlane.f32.xlu1 %v57_v22  ;;  %46 = vadd.xlane.f32.xlu0 %v45_v23 }
  0x1b   :  { %64 = vadd.xlane.f32.xlu1 %v63_v26  ;;  %61 = vadd.xlane.f32.xlu0 %v60_v27 }
  0x1f   :  { %70 = vadd.xlane.f32.xlu1 %v69_v30  ;;  %67 = vadd.xlane.f32.xlu0 %v66_v31 }
  0x23   :  { %73 = vadd.xlane.f32.xlu0 %v72_v33 }
  0x8c   :  { %v115_v34 = vpop.xlane.xlu0 %114  ;;  %v108_v35 = vpop.xlane.xlu1 %107 }
  0x8d   :  { %v119_v36 = vmul.f32 0.083333336, %v115_v34  ;;  %v117_v37 = vmul.f32 0.083333336, %v108_v35 }
  0x8f   :  { %v3047_v38 = vsub.f32 %v33_v0, %v119_v36  ;;  %v3049_v39 = vsub.f32 %v31_v1, %v117_v37 }
  0x90   :  { %v111_v40 = vpop.xlane.xlu0 %110  ;;  %v105_v41 = vpop.xlane.xlu1 %104 }
  0x91   :  { %v118_v42 = vmul.f32 0.083333336, %v111_v40  ;;  %v116_v43 = vmul.f32 0.083333336, %v105_v41  ;;  %v3053_v44 = vmul.f32 %v3047_v38, %v3047_v38  ;;  %v3062_v47 = vmul.f32 %v3049_v39, %v3049_v39 }
  0x93   :  { %v3056_v45 = vsub.f32 %v2944_v2, %v118_v42  ;;  %1380 = vrot.lane.b32.xlu1 %v3053_v44, %s2907_s1  ;;  %v3065_v49 = vsub.f32 %v2950_v5, %v116_v43  ;;  %v232_v41 = vsel %vm231_vm4, %v3053_v44, 0.0  ;;  %v225_v42 = vsel %vm128_vm5, %v3062_v47, 0.0 }
  0x94   :  { %v96_v46 = vpop.xlane.xlu1 %95  ;;  %v37_v48 = vpop.xlane.xlu0 %36  ;;  %vm1233_vm4 = vcmask 1040384  }
  0x95   :  { %v99_v50 = vmul.f32 0.083333336, %v96_v46  ;;  %v3069_v51 = vmul.f32 %v3056_v45, %v3056_v45  ;;  %v49_v52 = vmul.f32 0.083333336, %v37_v48  ;;  %v3083_v58 = vmul.f32 %v3065_v49, %v3065_v49 }
  0x97   :  { %v3072_v53 = vsub.f32 %v2959_v8, %v99_v50  ;;  %1376 = vrot.lane.b32.xlu1 %v3062_v47, %s2907_s1  ;;  %1378 = vrot.lane.b32.xlu0 %v3069_v51, %s2907_s1  ;;  %v3079_v54 = vsub.f32 %v2964_v9, %v49_v52  ;;  %v222_v52 = vsel %vm128_vm5, %v3083_v58, 0.0 }
  0x98   :  { %v92_v55 = vpop.xlane.xlu1 %91  ;;  %v41_v56 = vpop.xlane.xlu0 %40 }
  0x99   :  { %v98_v57 = vmul.f32 0.083333336, %v92_v55  ;;  %v3087_v59 = vmul.f32 %v3072_v53, %v3072_v53  ;;  %v50_v60 = vmul.f32 0.083333336, %v41_v56  ;;  %v124_v63 = vmul.f32 %v3079_v54, %v3079_v54 }
  0x9b   :  { %v3090_v61 = vsub.f32 %v2973_v12, %v98_v57  ;;  %1374 = vrot.lane.b32.xlu1 %v3083_v58, %s2907_s1  ;;  %1346 = vrot.lane.b32.xlu0 %v3087_v59, %s2907_s1  ;;  %v3097_v62 = vsub.f32 %v2978_v13, %v50_v60  ;;  %v129_v43 = vsel %vm128_vm5, %v124_v63, 0.0 }
  0x9c   :  { %v44_v0 = vpop.xlane.xlu1 %43  ;;  %v89_v1 = vpop.xlane.xlu0 %88 }
  0x9d   :  { %v51_v2 = vmul.f32 0.083333336, %v44_v0  ;;  %v3103_v3 = vmul.f32 %v3090_v61, %v3090_v61  ;;  %v97_v4 = vmul.f32 0.083333336, %v89_v1  ;;  %v3116_v7 = vmul.f32 %v3097_v62, %v3097_v62 }
  0x9f   :  { %v3106_v5 = vsub.f32 %v2987_v16, %v51_v2  ;;  %1344 = vrot.lane.b32.xlu0 %v3103_v3, %s2907_s1  ;;  %1241 = vrot.lane.b32.xlu1 %v124_v63, %s2907_s1  ;;  %v3112_v6 = vsub.f32 %v2992_v17, %v97_v4 }
  0xa0   :  { %v59_v8 = vpop.xlane.xlu1 %58  ;;  %v47_v9 = vpop.xlane.xlu0 %46 }
  0xa1   :  { %v75_v10 = vmul.f32 0.083333336, %v59_v8  ;;  %v3120_v11 = vmul.f32 %v3106_v5, %v3106_v5  ;;  %v52_v12 = vmul.f32 0.083333336, %v47_v9  ;;  %v3134_v15 = vmul.f32 %v3112_v6, %v3112_v6 }
  0xa3   :  { %v3123_v13 = vsub.f32 %v3001_v20, %v75_v10  ;;  %1245 = vrot.lane.b32.xlu0 %v3120_v11, %s2907_s1  ;;  %1243 = vrot.lane.b32.xlu1 %v3116_v7, %s2907_s1  ;;  %v3130_v14 = vsub.f32 %v3006_v21, %v52_v12 }
  0xa4   :  { %v65_v16 = vpop.xlane.xlu1 %64  ;;  %v62_v17 = vpop.xlane.xlu0 %61 }
  0xa5   :  { %v77_v18 = vmul.f32 0.083333336, %v65_v16  ;;  %v3138_v19 = vmul.f32 %v3123_v13, %v3123_v13  ;;  %v76_v20 = vmul.f32 0.083333336, %v62_v17  ;;  %v3152_v23 = vmul.f32 %v3130_v14, %v3130_v14 }
  0xa6   :  { %v133_v16 = vsel %vm132_vm10, %v3116_v7, 0.0  ;;  %v206_v7 = vsel %vm205_vm11, %v3087_v59, 0.0  ;;  %v199_v59 = vsel %vm128_vm5, %v3134_v15, 0.0 }
  0xa7   :  { %v3141_v22 = vsub.f32 %v3015_v24, %v77_v18  ;;  %1285 = vrot.lane.b32.xlu0 %v3138_v19, %s2907_s1  ;;  %1342 = vrot.lane.b32.xlu1 %v3134_v15, %s2907_s1  ;;  %v3148_v21 = vsub.f32 %v3020_v25, %v76_v20 }
  0xa8   :  { %v71_v26 = vpop.xlane.xlu1 %70  ;;  %v68_v27 = vpop.xlane.xlu0 %67 }
  0xa9   :  { %v79_v30 = vmul.f32 0.083333336, %v71_v26  ;;  %v3156_v24 = vmul.f32 %v3141_v22, %v3141_v22  ;;  %v78_v31 = vmul.f32 0.083333336, %v68_v27  ;;  %v3170_v34 = vmul.f32 %v3148_v21, %v3148_v21 }
  0xab   :  { %v3159_v33 = vsub.f32 %v3029_v28, %v79_v30  ;;  %1289 = vrot.lane.b32.xlu0 %v3156_v24, %s2907_s1  ;;  %1247 = vrot.lane.b32.xlu1 %v3152_v23, %s2907_s1  ;;  %v3166_v25 = vsub.f32 %v3034_v29, %v78_v31  ;;  %v166_v15 = vsel %vm128_vm5, %v3156_v24, 0.0 }
  0xac   :  { %v74_v35 = vpop.xlane.xlu0 %73 }
  0xad   :  { %v3174_v36 = vmul.f32 %v3159_v33, %v3159_v33  ;;  %v80_v28 = vmul.f32 0.083333336, %v74_v35  ;;  %v3185_v29 = vmul.f32 %v3166_v25, %v3166_v25 }
  0xaf   :  { %1293 = vrot.lane.b32.xlu0 %v3174_v36, %s2907_s1  ;;  %1287 = vrot.lane.b32.xlu1 %v3170_v34, %s2907_s1  ;;  %v3181_v37 = vsub.f32 %v3043_v32, %v80_v28  ;;  %v228_v32 = vsel %vm128_vm5, %v3069_v51, 0.0 }
  0xb1   :  { %v3191_v40 = vmul.f32 %v3181_v37, %v3181_v37 }
  0xb3   :  { %1291 = vrot.lane.b32.xlu1 %v3185_v29, %s2907_s1 }
  0xb7   :  { %1295 = vrot.lane.b32.xlu1 %v3191_v40, %s2907_s1 }
  0xce   :  { %233 = vadd.xlane.f32.xlu0 %v232_v41 }
  0xd2   :  { %229 = vadd.xlane.f32.xlu0 %v228_v32 }
  0xdb   :  { %226 = vadd.xlane.f32.xlu1 %v225_v42 }
  0xdf   :  { %130 = vadd.xlane.f32.xlu1 %v129_v43  ;;  %v139_v43 = vsel %vm132_vm10, %v3152_v23, 0.0  ;;  %v202_v23 = vsel %vm128_vm5, %v3103_v3, 0.0  ;;  %v172_v3 = vsel %vm128_vm5, %v3174_v36, 0.0 }
 0x105   :  { %v1381_v46 = vpop.permute.xlu1 %1380 }
 0x106   :  { %v1396_v48 = vsel %vm1395_vm6, %v1381_v46, 0.0  ;;  %vm1731_vm6 = vcmask 97312  }
 0x107   :  { %1397 = vadd.xlane.f32.xlu0 %v1396_v48 }
 0x109   :  { %v1377_v50 = vpop.permute.xlu1 %1376  ;;  %v1379_v44 = vpop.permute.xlu0 %1378 }
 0x10a   :  { %v1392_v51 = vsel %vm1253_vm7, %v1379_v44, 0.0  ;;  %v1389_v56 = vsel %vm1253_vm7, %v1377_v50, 0.0  ;;  %v136_v50 = vsel %vm128_vm5, %v3120_v11, 0.0  ;;  %v163_v44 = vsel %vm132_vm10, %v3170_v34, 0.0 }
 0x10b   :  { %223 = vadd.xlane.f32.xlu0 %v222_v52  ;;  %1393 = vadd.xlane.f32.xlu1 %v1392_v51  ;;  %v169_v52 = vsel %vm132_vm10, %v3185_v29, 0.0  ;;  %v160_v51 = vsel %vm128_vm5, %v3138_v19, 0.0  ;;  %v175_v11 = vsel %vm132_vm10, %v3191_v40, 0.0 }
 0x10d   :  { %v1375_v47 = vpop.permute.xlu1 %1374  ;;  %v1347_v55 = vpop.permute.xlu0 %1346 }
 0x10e   :  { %v1358_v57 = vsel %vm1357_vm8, %v1347_v55, 0.0  ;;  %v1386_v0 = vsel %vm1253_vm7, %v1375_v47, 0.0 }
 0x10f   :  { %1390 = vadd.xlane.f32.xlu0 %v1389_v56  ;;  %1359 = vadd.xlane.f32.xlu1 %v1358_v57 }
 0x111   :  { %v1242_v60 = vpop.permute.xlu1 %1241  ;;  %v1345_v63 = vpop.permute.xlu0 %1344 }
 0x112   :  { %v1354_v1 = vsel %vm1253_vm7, %v1345_v63, 0.0  ;;  %v1254_v58 = vsel %vm1253_vm7, %v1242_v60, 0.0 }
 0x113   :  { %1387 = vadd.xlane.f32.xlu0 %v1386_v0  ;;  %1355 = vadd.xlane.f32.xlu1 %v1354_v1 }
 0x115   :  { %v1244_v2 = vpop.permute.xlu1 %1243  ;;  %v1246_v4 = vpop.permute.xlu0 %1245 }
 0x116   :  { %v1261_v8 = vsel %vm1253_vm7, %v1246_v4, 0.0  ;;  %v1258_v9 = vsel %vm1257_vm9, %v1244_v2, 0.0 }
 0x117   :  { %1255 = vadd.xlane.f32.xlu0 %v1254_v58  ;;  %1262 = vadd.xlane.f32.xlu1 %v1261_v8 }
 0x119   :  { %v1343_v10 = vpop.permute.xlu1 %1342  ;;  %v1286_v12 = vpop.permute.xlu0 %1285 }
 0x11a   :  { %v1351_v17 = vsel %vm1253_vm7, %v1343_v10, 0.0  ;;  %v1303_v18 = vsel %vm1253_vm7, %v1286_v12, 0.0 }
 0x11b   :  { %1259 = vadd.xlane.f32.xlu0 %v1258_v9  ;;  %134 = vadd.xlane.f32.xlu1 %v133_v16 }
 0x11d   :  { %v1248_v20 = vpop.permute.xlu1 %1247  ;;  %v1290_v31 = vpop.permute.xlu0 %1289 }
 0x11e   :  { %v1264_v26 = vsel %vm1257_vm9, %v1248_v20, 0.0  ;;  %v1309_v41 = vsel %vm1253_vm7, %v1290_v31, 0.0 }
 0x11f   :  { %1352 = vadd.xlane.f32.xlu0 %v1351_v17  ;;  %1304 = vadd.xlane.f32.xlu1 %v1303_v18 }
 0x121   :  { %v1288_v27 = vpop.permute.xlu1 %1287  ;;  %v1294_v42 = vpop.permute.xlu0 %1293 }
 0x122   :  { %v1306_v30 = vsel %vm1257_vm9, %v1288_v27, 0.0  ;;  %v1315_v48 = vsel %vm1253_vm7, %v1294_v42, 0.0 }
 0x123   :  { %1265 = vadd.xlane.f32.xlu0 %v1264_v26  ;;  %1307 = vadd.xlane.f32.xlu1 %v1306_v30 }
 0x125   :  { %v1292_v35 = vpop.permute.xlu1 %1291 }
 0x126   :  { %v1312_v28 = vsel %vm1257_vm9, %v1292_v35, 0.0 }
 0x127   :  { %207 = vadd.xlane.f32.xlu0 %v206_v7  ;;  %1313 = vadd.xlane.f32.xlu1 %v1312_v28 }
 0x129   :  { %v1296_v32 = vpop.permute.xlu1 %1295 }
 0x12a   :  { %v1318_v46 = vsel %vm1257_vm9, %v1296_v32, 0.0 }
 0x12b   :  { %140 = vadd.xlane.f32.xlu1 %v139_v43  ;;  %1310 = vadd.xlane.f32.xlu0 %v1309_v41 }
 0x12f   :  { %1319 = vadd.xlane.f32.xlu1 %v1318_v46  ;;  %1316 = vadd.xlane.f32.xlu0 %v1315_v48 }
 0x133   :  { %200 = vadd.xlane.f32.xlu1 %v199_v59  ;;  %137 = vadd.xlane.f32.xlu0 %v136_v50 }
 0x137   :  { %164 = vadd.xlane.f32.xlu1 %v163_v44  ;;  %203 = vadd.xlane.f32.xlu0 %v202_v23 }
 0x13b   :  { %170 = vadd.xlane.f32.xlu1 %v169_v52  ;;  %161 = vadd.xlane.f32.xlu0 %v160_v51 }
 0x13f   :  { %176 = vadd.xlane.f32.xlu1 %v175_v11  ;;  %167 = vadd.xlane.f32.xlu0 %v166_v15 }
 0x143   :  { %173 = vadd.xlane.f32.xlu0 %v172_v3 }
 0x157   :  { %v234_v34 = vpop.xlane.xlu0 %233 }
 0x158   :  { %v238_v47 = vadd.f32 1e-06, %v234_v34 }
 0x15a   :  { %2753 = vrsqrt.f32 %v238_v47 }
 0x15b   :  { %v230_v29 = vpop.xlane.xlu0 %229 }
 0x15c   :  { %v237_v55 = vadd.f32 1e-06, %v230_v29 }
 0x15e   :  { %2755 = vrsqrt.f32 %v237_v55 }
 0x164   :  { %v227_v19 = vpop.xlane.xlu1 %226 }
 0x165   :  { %v236_v56 = vadd.f32 1e-06, %v227_v19 }
 0x167   :  { %v2754_v57 = vpop.eup %2753  ;;  %2757 = vrsqrt.f32 %v236_v56 }
 0x168   :  { %v131_v40 = vpop.xlane.xlu1 %130  ;;  %v246_v60 = vmul.f32 %v2754_v57, %v3047_v38 }
 0x169   :  { %v142_v24 = vadd.f32 1e-06, %v131_v40 }
 0x16a   :  { %2652 = vmatprep.subr.msk.mxu0 %vm128_vm5, %v246_v60  ;;  %2663 = vmatprep.subr.msk.mxu1 %vm128_vm5, %v246_v60 }
 0x16b   :  { %v2756_v36 = vpop.eup %2755  ;;  %2759 = vrsqrt.f32 %v142_v24  ;;  %2653 = vmatpush3.xpose.msk.msra.mxu0 %vm128_vm5, %v246_v60  ;;  %2664 = vmatpush3.xpose.msk.msra.mxu1 %vm128_vm5, %v246_v60 }
 0x16c   :  { %v245_v63 = vmul.f32 %v2756_v36, %v3056_v45 }
 0x16e   :  { %2654 = vmatprep.subr.msk.mxu0 %vm128_vm5, %v245_v63  ;;  %2665 = vmatprep.subr.msk.mxu1 %vm128_vm5, %v245_v63 }
 0x16f   :  { %2655 = vmatpush3.xpose.msk.msra.mxu0 %vm128_vm5, %v245_v63  ;;  %2666 = vmatpush3.xpose.msk.msra.mxu1 %vm128_vm5, %v245_v63 }
 0x174   :  { %v2758_v0 = vpop.eup %2757 }
 0x175   :  { %v244_v1 = vmul.f32 %v2758_v0, %v3049_v39 }
 0x177   :  { %2656 = vmatprep.subr.msk.mxu0 %vm128_vm5, %v244_v1  ;;  %2667 = vmatprep.subr.msk.mxu1 %vm128_vm5, %v244_v1 }
 0x178   :  { %v2760_v58 = vpop.eup %2759  ;;  %2657 = vmatpush3.xpose.msk.msra.mxu0 %vm128_vm5, %v244_v1  ;;  %2668 = vmatpush3.xpose.msk.msra.mxu1 %vm128_vm5, %v244_v1 }
 0x179   :  { %v150_v2 = vmul.f32 %v2760_v58, %v3079_v54 }
 0x17b   :  { %2660 = vmatprep.mubr.msk.f32.mxu0 %vm128_vm5, %v150_v2 }
 0x190   :  { %v1398_v4 = vpop.xlane.xlu0 %1397 }
 0x191   :  { %v1402_v8 = vadd.f32 1e-06, %v1398_v4 }
 0x193   :  { %2761 = vrsqrt.f32 %v1402_v8 }
 0x194   :  { %v1394_v9 = vpop.xlane.xlu1 %1393  ;;  %v224_v10 = vpop.xlane.xlu0 %223 }
 0x195   :  { %v1401_v12 = vadd.f32 1e-06, %v1394_v9  ;;  %v235_v16 = vadd.f32 1e-06, %v224_v10 }
 0x197   :  { %2763 = vrsqrt.f32 %v1401_v12 }
 0x198   :  { %2765 = vrsqrt.f32 %v235_v16  ;;  %v1360_v17 = vpop.xlane.xlu1 %1359  ;;  %v1391_v18 = vpop.xlane.xlu0 %1390 }
 0x199   :  { %v1400_v20 = vadd.f32 1e-06, %v1391_v18  ;;  %v1363_v31 = vadd.f32 1e-06, %v1360_v17 }
 0x19b   :  { %2767 = vrsqrt.f32 %v1400_v20 }
 0x19c   :  { %v1356_v26 = vpop.xlane.xlu1 %1355  ;;  %v1388_v27 = vpop.xlane.xlu0 %1387 }
 0x19d   :  { %v1399_v30 = vadd.f32 1e-06, %v1388_v27  ;;  %v1362_v42 = vadd.f32 1e-06, %v1356_v26 }
 0x19f   :  { %2769 = vrsqrt.f32 %v1399_v30 }
 0x1a0   :  { %v2762_v35 = vpop.eup %2761  ;;  %v1263_v7 = vpop.xlane.xlu1 %1262  ;;  %2771 = vrsqrt.f32 %v1363_v31 }
 0x1a1   :  { %v1256_v28 = vpop.xlane.xlu0 %1255  ;;  %v1410_v32 = vmul.f32 %v2762_v35, %v3047_v38  ;;  %v1269_v52 = vadd.f32 1e-06, %v1263_v7 }
 0x1a2   :  { %v1267_v41 = vadd.f32 1e-06, %v1256_v28 }
 0x1a3   :  { %1427 = vrot.lane.b32.xlu0 %v1410_v32, %s2907_s1 }
 0x1a4   :  { %v2764_v43 = vpop.eup %2763  ;;  %2773 = vrsqrt.f32 %v1267_v41  ;;  %v135_v46 = vpop.xlane.xlu1 %134 }
 0x1a5   :  { %v1260_v48 = vpop.xlane.xlu0 %1259  ;;  %v2766_v59 = vpop.eup %2765  ;;  %v143_v50 = vadd.f32 1e-06, %v135_v46  ;;  %v1409_v23 = vmul.f32 %v2764_v43, %v3056_v45  ;;  %2775 = vrsqrt.f32 %v1362_v42 }
 0x1a6   :  { %v1268_v44 = vadd.f32 1e-06, %v1260_v48  ;;  %v243_v51 = vmul.f32 %v2766_v59, %v3065_v49 }
 0x1a7   :  { %2777 = vrsqrt.f32 %v143_v50  ;;  %1425 = vrot.lane.b32.xlu1 %v1409_v23, %s2907_s1 }
 0x1a8   :  { %2779 = vrsqrt.f32 %v1268_v44  ;;  %2658 = vmatprep.subr.msk.mxu0 %vm128_vm5, %v243_v51  ;;  %2669 = vmatprep.subr.msk.mxu1 %vm128_vm5, %v243_v51  ;;  %v1305_v38 = vpop.xlane.xlu1 %1304  ;;  %v2768_v15 = vpop.eup %2767 }
 0x1a9   :  { %v1353_v11 = vpop.xlane.xlu0 %1352  ;;  %2659 = vmatpush3.xpose.msk.msra.mxu0 %vm128_vm5, %v243_v51  ;;  %2670 = vmatpush3.xpose.msk.msra.mxu1 %vm128_vm5, %v243_v51  ;;  %2781 = vrsqrt.f32 %v1269_v52  ;;  %v1321_v3 = vadd.f32 1e-06, %v1305_v38  ;;  %v1408_v34 = vmul.f32 %v2768_v15, %v3049_v39 }
 0x1aa   :  { %v1361_v45 = vadd.f32 1e-06, %v1353_v11 }
 0x1ab   :  { %1423 = vrot.lane.b32.xlu1 %v1408_v34, %s2907_s1 }
 0x1ac   :  { %2783 = vrsqrt.f32 %v1361_v45  ;;  %v1308_v47 = vpop.xlane.xlu1 %1307  ;;  %v2770_v55 = vpop.eup %2769 }
 0x1ad   :  { %v1266_v29 = vpop.xlane.xlu0 %1265  ;;  %2785 = vrsqrt.f32 %v1321_v3  ;;  %v1322_v56 = vadd.f32 1e-06, %v1308_v47  ;;  %v1407_v57 = vmul.f32 %v2770_v55, %v3065_v49  ;;  %v2772_v40 = vpop.eup %2771 }
 0x1ae   :  { %v1270_v19 = vadd.f32 1e-06, %v1266_v29  ;;  %v1369_v0 = vmul.f32 %v2772_v40, %v3072_v53 }
 0x1af   :  { %1421 = vrot.lane.b32.xlu1 %v1407_v57, %s2907_s1 }
 0x1b0   :  { %2787 = vrsqrt.f32 %v1270_v19  ;;  %v1314_v60 = vpop.xlane.xlu1 %1313 }
 0x1b1   :  { %v208_v24 = vpop.xlane.xlu0 %207  ;;  %v2774_v36 = vpop.eup %2773  ;;  %2789 = vrsqrt.f32 %v1322_v56  ;;  %v1324_v39 = vadd.f32 1e-06, %v1314_v60 }
 0x1b2   :  { %v211_v63 = vadd.f32 1e-06, %v208_v24  ;;  %v1275_v1 = vmul.f32 %v2774_v36, %v3079_v54  ;;  %v2776_v58 = vpop.eup %2775 }
 0x1b3   :  { %1866 = vrot.lane.b32.xlu1 %v1369_v0, %s2907_s1  ;;  %v1368_v12 = vmul.f32 %v2776_v58, %v3090_v61 }
 0x1b4   :  { %v2778_v2 = vpop.eup %2777  ;;  %2791 = vrsqrt.f32 %v211_v63  ;;  %1413 = vrot.lane.b32.xlu0 %v1275_v1, %s2907_s1  ;;  %v141_v49 = vpop.xlane.xlu1 %140 }
 0x1b5   :  { %v1311_v4 = vpop.xlane.xlu0 %1310  ;;  %v2780_v8 = vpop.eup %2779  ;;  %v151_v10 = vmul.f32 %v2778_v2, %v3097_v62  ;;  %2793 = vrsqrt.f32 %v1324_v39  ;;  %v145_v28 = vadd.f32 1e-06, %v141_v49 }
 0x1b6   :  { %v1323_v9 = vadd.f32 1e-06, %v1311_v4  ;;  %v1276_v16 = vmul.f32 %v2780_v8, %v3097_v62  ;;  %v2782_v17 = vpop.eup %2781 }
 0x1b7   :  { %2661 = vmatmul.mubr.msk.f32.vlgmr.msra.gmra.mxu0 %vm128_vm5, %v151_v10  ;;  %1864 = vrot.lane.b32.xlu1 %v1368_v12, %s2907_s1  ;;  %v1277_v31 = vmul.f32 %v2782_v17, %v3106_v5 }
 0x1b8   :  { %2795 = vrsqrt.f32 %v1323_v9  ;;  %1415 = vrot.lane.b32.xlu0 %v1276_v16, %s2907_s1  ;;  %v1320_v18 = vpop.xlane.xlu1 %1319 }
 0x1b9   :  { %v1317_v20 = vpop.xlane.xlu0 %1316  ;;  %v2784_v26 = vpop.eup %2783  ;;  %v1326_v27 = vadd.f32 1e-06, %v1320_v18 }
 0x1ba   :  { %v1325_v30 = vadd.f32 1e-06, %v1317_v20  ;;  %v1367_v35 = vmul.f32 %v2784_v26, %v3112_v6  ;;  %v2786_v7 = vpop.eup %2785 }
 0x1bb   :  { %2797 = vrsqrt.f32 %v1326_v27  ;;  %1518 = vrot.lane.b32.xlu1 %v1277_v31, %s2907_s1  ;;  %v1333_v46 = vmul.f32 %v2786_v7, %v3123_v13 }
 0x1bc   :  { %2799 = vrsqrt.f32 %v1325_v30  ;;  %1862 = vrot.lane.b32.xlu0 %v1367_v35, %s2907_s1  ;;  %v201_v41 = vpop.xlane.xlu1 %200 }
 0x1bd   :  { %v138_v32 = vpop.xlane.xlu0 %137  ;;  %v2788_v42 = vpop.eup %2787  ;;  %2801 = vrsqrt.f32 %v145_v28  ;;  %v209_v50 = vadd.f32 1e-06, %v201_v41 }
 0x1be   :  { %v144_v43 = vadd.f32 1e-06, %v138_v32  ;;  %v1278_v48 = vmul.f32 %v2788_v42, %v3130_v14  ;;  %v2790_v59 = vpop.eup %2789 }
 0x1bf   :  { %1855 = vrot.lane.b32.xlu1 %v1333_v46, %s2907_s1  ;;  %v1334_v11 = vmul.f32 %v2790_v59, %v3148_v21 }
 0x1c0   :  { %2803 = vrsqrt.f32 %v144_v43  ;;  %1520 = vrot.lane.b32.xlu0 %v1278_v48, %s2907_s1  ;;  %v165_v44 = vpop.xlane.xlu1 %164 }
 0x1c1   :  { %v204_v23 = vpop.xlane.xlu0 %203  ;;  %v2792_v52 = vpop.eup %2791  ;;  %2805 = vrsqrt.f32 %v209_v50  ;;  %v179_v47 = vadd.f32 1e-06, %v165_v44 }
 0x1c2   :  { %v210_v51 = vadd.f32 1e-06, %v204_v23  ;;  %v3290_v38 = vmul.f32 %v2792_v52, %v3072_v53  ;;  %v2794_v15 = vpop.eup %2793 }
 0x1c3   :  { %v1336_v29 = vmul.f32 %v2794_v15, %v3166_v25 }
 0x1c4   :  { %2807 = vrsqrt.f32 %v210_v51  ;;  %1857 = vrot.lane.b32.xlu0 %v1334_v11, %s2907_s1  ;;  %2674 = vmatprep.subr.msk.mxu0 %vm128_vm5, %v3290_v38  ;;  %v171_v45 = vpop.xlane.xlu1 %170 }
 0x1c5   :  { %v162_v3 = vpop.xlane.xlu0 %161  ;;  %v2796_v34 = vpop.eup %2795  ;;  %2683 = vmatprep.subr.msk.mxu1 %vm128_vm5, %v3290_v38  ;;  %2675 = vmatpush3.xpose.msk.msra.mxu0 %vm128_vm5, %v3290_v38  ;;  %v181_v19 = vadd.f32 1e-06, %v171_v45 }
 0x1c6   :  { %v178_v53 = vadd.f32 1e-06, %v162_v3  ;;  %v1335_v55 = vmul.f32 %v2796_v34, %v3141_v22 }
 0x1c8   :  { %v2798_v56 = vpop.eup %2797  ;;  %2809 = vrsqrt.f32 %v178_v53  ;;  %1957 = vrot.lane.b32.xlu0 %v1336_v29, %s2907_s1  ;;  %1955 = vrot.lane.b32.xlu1 %v1335_v55, %s2907_s1  ;;  %v177_v2 = vpop.xlane.xlu1 %176 }
 0x1c9   :  { %v168_v57 = vpop.xlane.xlu0 %167  ;;  %v2800_v40 = vpop.eup %2799  ;;  %v1338_v24 = vmul.f32 %v2798_v56, %v3181_v37  ;;  %2811 = vrsqrt.f32 %v179_v47  ;;  %v183_v10 = vadd.f32 1e-06, %v177_v2 }
 0x1ca   :  { %v180_v60 = vadd.f32 1e-06, %v168_v57  ;;  %v1337_v36 = vmul.f32 %v2800_v40, %v3159_v33  ;;  %2813 = vrsqrt.f32 %v181_v19  ;;  %v2802_v63 = vpop.eup %2801 }
 0x1cb   :  { %v153_v49 = vmul.f32 %v2802_v63, %v3130_v14 }
 0x1cc   :  { %2815 = vrsqrt.f32 %v180_v60  ;;  %2042 = vrot.lane.b32.xlu0 %v1338_v24, %s2907_s1  ;;  %2040 = vrot.lane.b32.xlu1 %v1337_v36, %s2907_s1 }
 0x1cd   :  { %v174_v39 = vpop.xlane.xlu0 %173  ;;  %v2804_v0 = vpop.eup %2803 }
 0x1ce   :  { %v182_v1 = vadd.f32 1e-06, %v174_v39  ;;  %v152_v58 = vmul.f32 %v2804_v0, %v3106_v5  ;;  %v2806_v4 = vpop.eup %2805 }
 0x1cf   :  { %v215_v12 = vmul.f32 %v2806_v4, %v3112_v6 }
 0x1d0   :  { %2817 = vrsqrt.f32 %v182_v1  ;;  %2671 = vmatprep.mubr.msk.f32.mxu1 %vm128_vm5, %v152_v58 }
 0x1d1   :  { %v2808_v8 = vpop.eup %2807  ;;  %2672 = vmatmul.mubr.msk.f32.vlgmr.msra.gmra.mxu1 %vm128_vm5, %v153_v49  ;;  %2819 = vrsqrt.f32 %v183_v10 }
 0x1d2   :  { %v216_v9 = vmul.f32 %v2808_v8, %v3090_v61  ;;  %2684 = vmatpush3.xpose.msk.msra.mxu1 %vm128_vm5, %v3290_v38 }
 0x1d4   :  { %2676 = vmatprep.subr.msk.mxu0 %vm128_vm5, %v216_v9  ;;  %2685 = vmatprep.subr.msk.mxu1 %vm128_vm5, %v216_v9 }
 0x1d5   :  { %v2810_v16 = vpop.eup %2809  ;;  %2677 = vmatpush3.xpose.msk.msra.mxu0 %vm128_vm5, %v216_v9 }
 0x1d6   :  { %2686 = vmatpush3.xpose.msk.msra.mxu1 %vm128_vm5, %v216_v9  ;;  %2678 = vmatprep.subr.msk.mxu0 %vm128_vm5, %v215_v12  ;;  %v190_v61 = vmul.f32 %v2810_v16, %v3123_v13  ;;  %v2812_v17 = vpop.eup %2811 }
 0x1d7   :  { %2687 = vmatprep.subr.msk.mxu1 %vm128_vm5, %v215_v12  ;;  %v2814_v18 = vpop.eup %2813  ;;  %v191_v20 = vmul.f32 %v2812_v17, %v3148_v21 }
 0x1d8   :  { %2680 = vmatprep.mubr.msk.f32.mxu0 %vm128_vm5, %v190_v61  ;;  %v193_v27 = vmul.f32 %v2814_v18, %v3166_v25 }
 0x1d9   :  { %v2816_v6 = vpop.eup %2815  ;;  %2679 = vmatpush3.xpose.msk.msra.mxu0 %vm128_vm5, %v215_v12 }
 0x1da   :  { %2688 = vmatpush3.xpose.msk.msra.mxu1 %vm128_vm5, %v215_v12  ;;  %2692 = vmatprep.subr.msk.mxu0 %vm128_vm5, %v3290_v38  ;;  %v192_v26 = vmul.f32 %v2816_v6, %v3141_v22 }
 0x1dc   :  { %2681 = vmatmul.mubr.msk.f32.vlgmr.msra.gmra.mxu0 %vm128_vm5, %v191_v20  ;;  %2689 = vmatprep.mubr.msk.f32.mxu1 %vm128_vm5, %v192_v26 }
 0x1dd   :  { %v2818_v30 = vpop.eup %2817  ;;  %2690 = vmatmul.mubr.msk.f32.vlgmr.msra.gmra.mxu1 %vm128_vm5, %v193_v27  ;;  %2693 = vmatpush3.xpose.msk.msra.mxu0 %vm128_vm5, %v3290_v38 }
 0x1de   :  { %v194_v31 = vmul.f32 %v2818_v30, %v3159_v33  ;;  %2694 = vmatprep.subr.msk.mxu0 %vm128_vm5, %v216_v9  ;;  %v2820_v35 = vpop.eup %2819 }
 0x1df   :  { %v195_v7 = vmul.f32 %v2820_v35, %v3181_v37 }
 0x1e0   :  { %2698 = vmatprep.mubr.msk.f32.mxu0 %vm128_vm5, %v194_v31 }
 0x1e1   :  { %2695 = vmatpush3.xpose.msk.msra.mxu0 %vm128_vm5, %v216_v9 }
 0x1e2   :  { %2696 = vmatprep.subr.msk.mxu0 %vm128_vm5, %v215_v12 }
 0x1e5   :  { %2697 = vmatpush3.xpose.msk.msra.mxu0 %vm128_vm5, %v215_v12 }
 0x1e8   :  { %2699 = vmatmul.mubr.msk.f32.vlgmr.msra.gmra.mxu0 %vm128_vm5, %v195_v7 }
 0x215   :  { %v1428_v28 = vpop.permute.xlu0 %1427 }
 0x216   :  { %2701 = vmatprep.subr.msk.mxu1 %vm1253_vm7, %v1428_v28  ;;  %2712 = vmatprep.subr.msk.mxu0 %vm1253_vm7, %v1428_v28 }
 0x217   :  { %2702 = vmatpush3.xpose.msk.msra.mxu1 %vm1253_vm7, %v1428_v28  ;;  %2713 = vmatpush3.xpose.msk.msra.mxu0 %vm1253_vm7, %v1428_v28 }
 0x219   :  { %v1426_v41 = vpop.permute.xlu1 %1425 }
 0x21a   :  { %2703 = vmatprep.subr.msk.mxu1 %vm1253_vm7, %v1426_v41  ;;  %2714 = vmatprep.subr.msk.mxu0 %vm1253_vm7, %v1426_v41 }
 0x21b   :  { %2704 = vmatpush3.xpose.msk.msra.mxu1 %vm1253_vm7, %v1426_v41  ;;  %2715 = vmatpush3.xpose.msk.msra.mxu0 %vm1253_vm7, %v1426_v41 }
 0x21d   :  { %v1424_v32 = vpop.permute.xlu1 %1423 }
 0x21e   :  { %2705 = vmatprep.subr.msk.mxu1 %vm1253_vm7, %v1424_v32  ;;  %2716 = vmatprep.subr.msk.mxu0 %vm1253_vm7, %v1424_v32 }
 0x21f   :  { %2706 = vmatpush3.xpose.msk.msra.mxu1 %vm1253_vm7, %v1424_v32  ;;  %2717 = vmatpush3.xpose.msk.msra.mxu0 %vm1253_vm7, %v1424_v32 }
 0x221   :  { %v1422_v42 = vpop.permute.xlu1 %1421 }
 0x222   :  { %2707 = vmatprep.subr.msk.mxu1 %vm1253_vm7, %v1422_v42  ;;  %2718 = vmatprep.subr.msk.mxu0 %vm1253_vm7, %v1422_v42 }
 0x223   :  { %2708 = vmatpush3.xpose.msk.msra.mxu1 %vm1253_vm7, %v1422_v42  ;;  %2719 = vmatpush3.xpose.msk.msra.mxu0 %vm1253_vm7, %v1422_v42 }
 0x225   :  { %v1867_v43 = vpop.permute.xlu1 %1866 }
 0x226   :  { %v1414_v46 = vpop.permute.xlu0 %1413  ;;  %2723 = vmatprep.subr.msk.mxu1 %vm1253_vm7, %v1867_v43  ;;  %2732 = vmatprep.subr.msk.mxu0 %vm1253_vm7, %v1867_v43 }
 0x227   :  { %2709 = vmatprep.mubr.msk.f32.mxu1 %vm1253_vm7, %v1414_v46 }
 0x229   :  { %v1865_v48 = vpop.permute.xlu1 %1864 }
 0x22a   :  { %v1416_v59 = vpop.permute.xlu0 %1415 }
 0x22b   :  { %2710 = vmatmul.mubr.msk.f32.vlgmr.msra.gmra.mxu1 %vm1253_vm7, %v1416_v59 }
 0x22c   :  { %2724 = vmatpush3.xpose.msk.msra.mxu1 %vm1253_vm7, %v1867_v43 }
 0x22d   :  { %2725 = vmatprep.subr.msk.mxu1 %vm1253_vm7, %v1865_v48  ;;  %v1519_v50 = vpop.permute.xlu1 %1518 }
 0x22e   :  { %v1863_v44 = vpop.permute.xlu0 %1862  ;;  %2720 = vmatprep.mubr.msk.f32.mxu0 %vm1253_vm7, %v1519_v50 }
 0x230   :  { %2726 = vmatpush3.xpose.msk.msra.mxu1 %vm1253_vm7, %v1865_v48 }
 0x231   :  { %2727 = vmatprep.subr.msk.mxu1 %vm1253_vm7, %v1863_v44  ;;  %v1856_v23 = vpop.permute.xlu1 %1855 }
 0x232   :  { %v1521_v52 = vpop.permute.xlu0 %1520  ;;  %2729 = vmatprep.mubr.msk.f32.mxu1 %vm1253_vm7, %v1856_v23 }
 0x233   :  { %2721 = vmatmul.mubr.msk.f32.vlgmr.msra.gmra.mxu0 %vm1253_vm7, %v1521_v52 }
 0x234   :  { %2728 = vmatpush3.xpose.msk.msra.mxu1 %vm1253_vm7, %v1863_v44  ;;  %2733 = vmatpush3.xpose.msk.msra.mxu0 %vm1253_vm7, %v1867_v43 }
 0x235   :  { %2734 = vmatprep.subr.msk.mxu0 %vm1253_vm7, %v1865_v48  ;;  %2741 = vmatprep.subr.msk.mxu1 %vm1253_vm7, %v1867_v43 }
 0x236   :  { %v1858_v51 = vpop.permute.xlu0 %1857 }
 0x237   :  { %2730 = vmatmul.mubr.msk.f32.vlgmr.msra.gmra.mxu1 %vm1253_vm7, %v1858_v51 }
 0x238   :  { %2735 = vmatpush3.xpose.msk.msra.mxu0 %vm1253_vm7, %v1865_v48  ;;  %2742 = vmatpush3.xpose.msk.msra.mxu1 %vm1253_vm7, %v1867_v43 }
 0x239   :  { %2736 = vmatprep.subr.msk.mxu0 %vm1253_vm7, %v1863_v44  ;;  %2743 = vmatprep.subr.msk.mxu1 %vm1253_vm7, %v1865_v48 }
 0x23a   :  { %v1956_v38 = vpop.permute.xlu1 %1955  ;;  %v1958_v11 = vpop.permute.xlu0 %1957 }
 0x23b   :  { %2738 = vmatprep.mubr.msk.f32.mxu0 %vm1253_vm7, %v1956_v38 }
 0x23c   :  { %2737 = vmatpush3.xpose.msk.msra.mxu0 %vm1253_vm7, %v1863_v44  ;;  %2744 = vmatpush3.xpose.msk.msra.mxu1 %vm1253_vm7, %v1865_v48 }
 0x23d   :  { %2745 = vmatprep.subr.msk.mxu1 %vm1253_vm7, %v1863_v44 }
 0x23e   :  { %v2041_v15 = vpop.permute.xlu1 %2040  ;;  %v2043_v45 = vpop.permute.xlu0 %2042 }
 0x23f   :  { %2739 = vmatmul.mubr.msk.f32.vlgmr.msra.gmra.mxu0 %vm1253_vm7, %v1958_v11  ;;  %2747 = vmatprep.mubr.msk.f32.mxu1 %vm1253_vm7, %v2041_v15 }
 0x240   :  { %2746 = vmatpush3.xpose.msk.msra.mxu1 %vm1253_vm7, %v1863_v44 }
 0x243   :  { %2748 = vmatmul.mubr.msk.f32.vlgmr.msra.gmra.mxu1 %vm1253_vm7, %v2043_v45  ;;  %vm1733_vm7 = vcmask 90144  }
 0x277   :  { %v2662_v3 = vpop.f32.mrf.mxu0 }
 0x278   :  { %v424_v53 = vsel %vm423_vm12, %v2662_v3, 0.0 }
 0x279   :  { %v331_v34 = vpop.f32.mrf.mxu0 }
 0x27a   :  { %v422_v47 = vsel %vm421_vm13, %v331_v34, 0.0 }
 0x27b   :  { %v425_v29 = vadd.f32 %v424_v53, %v422_v47 }
 0x27d   :  { %v426_v55 = vrot.slane %v425_v29, 4 }
 0x27f   :  { %v427_v19 = vadd.f32 %v426_v55, %v425_v29 }
 0x281   :  { %v428_v56 = vrot.slane %v427_v19, 2 }
 0x283   :  { %v429_v57 = vadd.f32 %v428_v56, %v427_v19 }
 0x285   :  { %v430_v40 = vrot.slane %v429_v57, 1 }
 0x287   :  { %v431_v60 = vadd.f32 %v430_v40, %v429_v57 }
 0x289   :  { %v442_v24 = vmul.f32 0.11111111, %v431_v60 }
 0x28b   :  { %v3390_v36 = vsub.f32 %v331_v34, %v442_v24  ;;  %v3392_v63 = vsub.f32 %v2662_v3, %v442_v24 }
 0x28d   :  { %v448_v39 = vmul.f32 %v3390_v36, %v3390_v36  ;;  %v449_v0 = vmul.f32 %v3392_v63, %v3392_v63 }
 0x28f   :  { %v452_v1 = vsel %vm421_vm13, %v448_v39, 0.0  ;;  %v453_v58 = vsel %vm423_vm12, %v449_v0, 0.0 }
 0x290   :  { %v454_v2 = vadd.f32 %v453_v58, %v452_v1 }
 0x291   :  { %v2673_v49 = vpop.f32.mrf.mxu1 }
 0x292   :  { %v455_v4 = vrot.slane %v454_v2, 4  ;;  %v433_v10 = vsel %vm423_vm12, %v2673_v49, 0.0 }
 0x293   :  { %v412_v8 = vpop.f32.mrf.mxu1 }
 0x294   :  { %v456_v9 = vadd.f32 %v455_v4, %v454_v2  ;;  %v432_v12 = vsel %vm421_vm13, %v412_v8, 0.0 }
 0x295   :  { %v434_v16 = vadd.f32 %v433_v10, %v432_v12 }
 0x296   :  { %v457_v61 = vrot.slane %v456_v9, 2 }
 0x297   :  { %v435_v17 = vrot.slane %v434_v16, 4 }
 0x298   :  { %v458_v18 = vadd.f32 %v457_v61, %v456_v9 }
 0x299   :  { %v436_v6 = vadd.f32 %v435_v17, %v434_v16 }
 0x29a   :  { %v459_v20 = vrot.slane %v458_v18, 1 }
 0x29b   :  { %v437_v26 = vrot.slane %v436_v6, 2 }
 0x29c   :  { %v460_v27 = vadd.f32 %v459_v20, %v458_v18  ;;  %v2682_v30 = vpop.f32.mrf.mxu0 }
 0x29d   :  { %v438_v31 = vadd.f32 %v437_v26, %v436_v6  ;;  %v2691_v35 = vpop.f32.mrf.mxu1  ;;  %v931_v32 = vsel %vm930_vm14, %v2682_v30, 0.0 }
 0x29e   :  { %v470_v7 = vmul.f32 0.125, %v460_v27  ;;  %v757_v28 = vpop.f32.mrf.mxu0  ;;  %v940_v48 = vsel %vm930_vm14, %v2691_v35, 0.0 }
 0x29f   :  { %v439_v41 = vrot.slane %v438_v31, 1  ;;  %v929_v42 = vsel %vm928_vm15, %v757_v28, 0.0  ;;  %v838_v43 = vpop.f32.mrf.mxu1 }
 0x2a0   :  { %v472_v46 = vadd.f32 1e-05, %v470_v7  ;;  %v932_v59 = vadd.f32 %v931_v32, %v929_v42  ;;  %v939_v50 = vsel %vm928_vm15, %v838_v43, 0.0 }
 0x2a1   :  { %v440_v44 = vadd.f32 %v439_v41, %v438_v31  ;;  %v941_v23 = vadd.f32 %v940_v48, %v939_v50 }
 0x2a2   :  { %2821 = vrsqrt.f32 %v472_v46  ;;  %v933_v52 = vrot.slane %v932_v59, 4 }
 0x2a3   :  { %v443_v51 = vmul.f32 0.11111111, %v440_v44  ;;  %v942_v38 = vrot.slane %v941_v23, 4 }
 0x2a4   :  { %v934_v11 = vadd.f32 %v933_v52, %v932_v59 }
 0x2a5   :  { %v3406_v15 = vsub.f32 %v412_v8, %v443_v51  ;;  %v3408_v45 = vsub.f32 %v2673_v49, %v443_v51  ;;  %v943_v3 = vadd.f32 %v942_v38, %v941_v23 }
 0x2a6   :  { %v935_v34 = vrot.slane %v934_v11, 2 }
 0x2a7   :  { %v450_v53 = vmul.f32 %v3406_v15, %v3406_v15  ;;  %v451_v47 = vmul.f32 %v3408_v45, %v3408_v45  ;;  %v944_v29 = vrot.slane %v943_v3, 2 }
 0x2a8   :  { %v936_v55 = vadd.f32 %v935_v34, %v934_v11  ;;  %v3414_v19 = vpop.f32.mrf.mxu0 }
 0x2a9   :  { %v461_v56 = vsel %vm421_vm13, %v450_v53, 0.0  ;;  %v462_v57 = vsel %vm423_vm12, %v451_v47, 0.0  ;;  %v945_v40 = vadd.f32 %v944_v29, %v943_v3  ;;  %v949_v1 = vsel %vm930_vm14, %v3414_v19, 0.0 }
 0x2aa   :  { %v463_v60 = vadd.f32 %v462_v57, %v461_v56  ;;  %v937_v24 = vrot.slane %v936_v55, 1  ;;  %v919_v39 = vpop.f32.mrf.mxu0 }
 0x2ab   :  { %v946_v0 = vrot.slane %v945_v40, 1  ;;  %v948_v58 = vsel %vm928_vm15, %v919_v39, 0.0 }
 0x2ac   :  { %v464_v2 = vrot.slane %v463_v60, 4  ;;  %v938_v49 = vadd.f32 %v937_v24, %v936_v55  ;;  %v950_v4 = vadd.f32 %v949_v1, %v948_v58 }
 0x2ad   :  { %v947_v8 = vadd.f32 %v946_v0, %v945_v40 }
 0x2ae   :  { %v465_v9 = vadd.f32 %v464_v2, %v463_v60  ;;  %v957_v10 = vmul.f32 0.11111111, %v938_v49  ;;  %v951_v12 = vrot.slane %v950_v4, 4 }
 0x2af   :  { %v2822_v16 = vpop.eup %2821  ;;  %v958_v61 = vmul.f32 0.11111111, %v947_v8 }
 0x2b0   :  { %v476_v17 = vmul.f32 %v2822_v16, %v3390_v36  ;;  %v477_v18 = vmul.f32 %v2822_v16, %v3392_v63  ;;  %v466_v6 = vrot.slane %v465_v9, 2  ;;  %v3423_v20 = vsub.f32 %v757_v28, %v957_v10 }
 0x2b1   :  { %v3425_v26 = vsub.f32 %v2682_v30, %v957_v10  ;;  %v3427_v27 = vsub.f32 %v838_v43, %v958_v61  ;;  %v3429_v31 = vsub.f32 %v2691_v35, %v958_v61  ;;  %v952_v7 = vadd.f32 %v951_v12, %v950_v4 }
 0x2b2   :  { %v480_v41 = vmul.f32 0.2, %v476_v17  ;;  %v481_v32 = vmul.f32 0.2, %v477_v18  ;;  %v467_v42 = vadd.f32 %v466_v6, %v465_v9  ;;  %v966_v46 = vmul.f32 %v3423_v20, %v3423_v20 }
 0x2b3   :  { %v967_v36 = vmul.f32 %v3425_v26, %v3425_v26  ;;  %v968_v63 = vmul.f32 %v3427_v27, %v3427_v27  ;;  %v969_v30 = vmul.f32 %v3429_v31, %v3429_v31  ;;  %v953_v28 = vrot.slane %v952_v7, 2 }
 0x2b4   :  { %v484_v35 = vsel %vm421_vm13, %v480_v41, -inf  ;;  %v485_v43 = vsel %vm423_vm12, %v481_v32, -inf  ;;  %v468_v48 = vrot.slane %v467_v42, 1  ;;  %v972_v59 = vsel %vm928_vm15, %v966_v46, 0.0 }
 0x2b5   :  { %v486_v50 = vmax.f32 %v484_v35, %v485_v43  ;;  %v973_v44 = vsel %vm930_vm14, %v967_v36, 0.0  ;;  %v981_v23 = vsel %vm928_vm15, %v968_v63, 0.0  ;;  %v982_v52 = vsel %vm930_vm14, %v969_v30, 0.0 }
 0x2b6   :  { %v469_v51 = vadd.f32 %v468_v48, %v467_v42  ;;  %v974_v38 = vadd.f32 %v973_v44, %v972_v59  ;;  %v983_v11 = vadd.f32 %v982_v52, %v981_v23  ;;  %v954_v3 = vadd.f32 %v953_v28, %v952_v7 }
 0x2b7   :  { %v487_v34 = vrot.slane %v486_v50, 4 }
 0x2b8   :  { %v471_v53 = vmul.f32 0.125, %v469_v51  ;;  %v975_v47 = vrot.slane %v974_v38, 4  ;;  %v984_v29 = vrot.slane %v983_v11, 4  ;;  %v955_v55 = vrot.slane %v954_v3, 1 }
 0x2b9   :  { %v488_v56 = vmax.f32 %v486_v50, %v487_v34 }
 0x2ba   :  { %v473_v57 = vadd.f32 1e-05, %v471_v53  ;;  %v976_v40 = vadd.f32 %v975_v47, %v974_v38  ;;  %v985_v60 = vadd.f32 %v984_v29, %v983_v11  ;;  %v956_v24 = vadd.f32 %v955_v55, %v954_v3 }
 0x2bb   :  { %v489_v0 = vrot.slane %v488_v56, 2 }
 0x2bc   :  { %2823 = vrsqrt.f32 %v473_v57  ;;  %v977_v1 = vrot.slane %v976_v40, 2  ;;  %v959_v58 = vmul.f32 0.11111111, %v956_v24  ;;  %v986_v49 = vrot.slane %v985_v60, 2 }
 0x2bd   :  { %v490_v2 = vmax.f32 %v488_v56, %v489_v0 }
 0x2be   :  { %v978_v4 = vadd.f32 %v977_v1, %v976_v40  ;;  %v3445_v9 = vsub.f32 %v919_v39, %v959_v58  ;;  %v3448_v10 = vsub.f32 %v3414_v19, %v959_v58  ;;  %v987_v61 = vadd.f32 %v986_v49, %v985_v60 }
 0x2bf   :  { %v491_v8 = vrot.slane %v490_v2, 1 }
 0x2c0   :  { %v979_v12 = vrot.slane %v978_v4, 1  ;;  %v970_v7 = vmul.f32 %v3445_v9, %v3445_v9  ;;  %v971_v42 = vmul.f32 %v3448_v10, %v3448_v10  ;;  %v988_v39 = vrot.slane %v987_v61, 1 }
 0x2c1   :  { %v492_v16 = vmax.f32 %v490_v2, %v491_v8 }
 0x2c2   :  { %v980_v17 = vadd.f32 %v979_v12, %v978_v4  ;;  %v990_v19 = vsel %vm928_vm15, %v970_v7, 0.0  ;;  %v991_v28 = vsel %vm930_vm14, %v971_v42, 0.0 }
 0x2c3   :  { %v502_v18 = vsub.f32 %v480_v41, %v492_v16  ;;  %v503_v6 = vsub.f32 %v481_v32, %v492_v16  ;;  %v989_v41 = vadd.f32 %v988_v39, %v987_v61  ;;  %v992_v48 = vadd.f32 %v991_v28, %v990_v19 }
 0x2c4   :  { %v999_v46 = vmul.f32 0.125, %v980_v17 }
 0x2c5   :  { %v506_v36 = vmul.f32 1.442695, %v502_v18  ;;  %v508_v63 = vmul.f32 1.442695, %v503_v6  ;;  %v1000_v44 = vmul.f32 0.125, %v989_v41  ;;  %v993_v51 = vrot.slane %v992_v48, 4 }
 0x2c6   :  { %v1002_v30 = vadd.f32 1e-05, %v999_v46 }
 0x2c7   :  { %2825 = vpow2.f32 %v506_v36  ;;  %v1003_v3 = vadd.f32 1e-05, %v1000_v44  ;;  %v994_v34 = vadd.f32 %v993_v51, %v992_v48 }
 0x2c8   :  { %2827 = vpow2.f32 %v508_v63 }
 0x2c9   :  { %v2824_v35 = vpop.eup %2823  ;;  %2829 = vrsqrt.f32 %v1002_v30  ;;  %v995_v57 = vrot.slane %v994_v34, 2 }
 0x2ca   :  { %v478_v32 = vmul.f32 %v2824_v35, %v3406_v15  ;;  %v479_v43 = vmul.f32 %v2824_v35, %v3408_v45  ;;  %2831 = vrsqrt.f32 %v1003_v3 }
 0x2cb   :  { %v996_v4 = vadd.f32 %v995_v57, %v994_v34 }
 0x2cc   :  { %v482_v59 = vmul.f32 0.2, %v478_v32  ;;  %v483_v50 = vmul.f32 0.2, %v479_v43 }
 0x2cd   :  { %v997_v46 = vrot.slane %v996_v4, 1 }
 0x2ce   :  { %v493_v23 = vsel %vm421_vm13, %v482_v59, -inf  ;;  %v494_v52 = vsel %vm423_vm12, %v483_v50, -inf }
 0x2cf   :  { %v495_v38 = vmax.f32 %v493_v23, %v494_v52  ;;  %v998_v28 = vadd.f32 %v997_v46, %v996_v4 }
 0x2d1   :  { %v496_v11 = vrot.slane %v495_v38, 4 }
 0x2d3   :  { %v497_v53 = vmax.f32 %v495_v38, %v496_v11 }
 0x2d4   :  { %v3460_v47 = vpop.eup %2825 }
 0x2d5   :  { %v2828_v29 = vpop.eup %2827  ;;  %v514_v15 = vsel %vm421_vm13, %v3460_v47, 0.0  ;;  %v498_v45 = vrot.slane %v497_v53, 2 }
 0x2d6   :  { %v2830_v55 = vpop.eup %2829  ;;  %v515_v56 = vsel %vm423_vm12, %v2828_v29, 0.0 }
 0x2d7   :  { %v516_v40 = vadd.f32 %v515_v56, %v514_v15  ;;  %v499_v60 = vmax.f32 %v497_v53, %v498_v45  ;;  %v1008_v24 = vmul.f32 %v2830_v55, %v3423_v20  ;;  %v1009_v0 = vmul.f32 %v2830_v55, %v3425_v26  ;;  %v2832_v30 = vpop.eup %2831 }
 0x2d8   :  { %v1010_v32 = vmul.f32 %v2832_v30, %v3427_v27  ;;  %v1011_v43 = vmul.f32 %v2832_v30, %v3429_v31 }
 0x2d9   :  { %v517_v1 = vrot.slane %v516_v40, 4  ;;  %v500_v58 = vrot.slane %v499_v60, 1  ;;  %v1014_v2 = vmul.f32 0.2, %v1008_v24  ;;  %v1015_v49 = vmul.f32 0.2, %v1009_v0 }
 0x2da   :  { %v1016_v44 = vmul.f32 0.2, %v1010_v32  ;;  %v1017_v23 = vmul.f32 0.2, %v1011_v43 }
 0x2db   :  { %v501_v8 = vmax.f32 %v499_v60, %v500_v58  ;;  %v1020_v12 = vsel %vm928_vm15, %v1014_v2, -inf  ;;  %v1021_v16 = vsel %vm930_vm14, %v1015_v49, -inf  ;;  %v518_v61 = vadd.f32 %v517_v1, %v516_v40 }
 0x2dc   :  { %v1022_v17 = vmax.f32 %v1020_v12, %v1021_v16  ;;  %v1029_v11 = vsel %vm928_vm15, %v1016_v44, -inf  ;;  %v1030_v3 = vsel %vm930_vm14, %v1017_v23, -inf }
 0x2dd   :  { %v504_v18 = vsub.f32 %v482_v59, %v501_v8  ;;  %v505_v6 = vsub.f32 %v483_v50, %v501_v8  ;;  %v519_v7 = vrot.slane %v518_v61, 2  ;;  %v1001_v59 = vmul.f32 0.125, %v998_v28 }
 0x2de   :  { %v1023_v42 = vrot.slane %v1022_v17, 4  ;;  %v1031_v45 = vmax.f32 %v1029_v11, %v1030_v3 }
 0x2df   :  { %v510_v20 = vmul.f32 1.442695, %v504_v18  ;;  %v512_v36 = vmul.f32 1.442695, %v505_v6  ;;  %v520_v26 = vadd.f32 %v519_v7, %v518_v61  ;;  %v1004_v52 = vadd.f32 1e-05, %v1001_v59 }
 0x2e0   :  { %v1024_v63 = vmax.f32 %v1022_v17, %v1023_v42  ;;  %v1032_v0 = vrot.slane %v1031_v45, 4 }
 0x2e1   :  { %2833 = vpow2.f32 %v510_v20  ;;  %v521_v39 = vrot.slane %v520_v26, 1 }
 0x2e2   :  { %2835 = vpow2.f32 %v512_v36  ;;  %v1025_v19 = vrot.slane %v1024_v63, 2 }
 0x2e3   :  { %v522_v35 = vadd.f32 %v521_v39, %v520_v26 }
 0x2e4   :  { %v1026_v41 = vmax.f32 %v1024_v63, %v1025_v19 }
 0x2e5   :  { %2837 = vrcp.f32 %v522_v35 }
 0x2e6   :  { %v1027_v48 = vrot.slane %v1026_v41, 1  ;;  %2839 = vrsqrt.f32 %v1004_v52 }
 0x2e8   :  { %v1028_v50 = vmax.f32 %v1026_v41, %v1027_v48 }
 0x2ea   :  { %v1047_v51 = vsub.f32 %v1014_v2, %v1028_v50  ;;  %v1048_v38 = vsub.f32 %v1015_v49, %v1028_v50  ;;  %v1033_v2 = vmax.f32 %v1031_v45, %v1032_v0 }
 0x2eb   :  { %v2711_v0 = vpop.f32.mrf.mxu1 }
 0x2ec   :  { %v1053_v15 = vmul.f32 1.442695, %v1047_v51  ;;  %v1055_v56 = vmul.f32 1.442695, %v1048_v38  ;;  %v1034_v4 = vrot.slane %v1033_v2, 2 }
 0x2ee   :  { %v2834_v34 = vpop.eup %2833  ;;  %2841 = vpow2.f32 %v1053_v15  ;;  %v1035_v61 = vmax.f32 %v1033_v2, %v1034_v4 }
 0x2ef   :  { %v2836_v53 = vpop.eup %2835  ;;  %v523_v27 = vsel %vm421_vm13, %v2834_v34, 0.0  ;;  %2843 = vpow2.f32 %v1055_v56 }
 0x2f0   :  { %v524_v31 = vsel %vm423_vm12, %v2836_v53, 0.0  ;;  %v1036_v42 = vrot.slane %v1035_v61, 1 }
 0x2f1   :  { %v525_v55 = vadd.f32 %v524_v31, %v523_v27 }
 0x2f2   :  { %v2838_v57 = vpop.eup %2837  ;;  %v1037_v26 = vmax.f32 %v1035_v61, %v1036_v42 }
 0x2f3   :  { %v526_v40 = vrot.slane %v525_v55, 4  ;;  %v535_v60 = vmul.f32 %v2838_v57, %v2828_v29  ;;  %v3476_v24 = vmul.f32 %v2838_v57, %v3460_v47  ;;  %v2840_v29 = vpop.eup %2839 }
 0x2f4   :  { %v1012_v8 = vmul.f32 %v2840_v29, %v3445_v9  ;;  %v1013_v12 = vmul.f32 %v2840_v29, %v3448_v10  ;;  %v1049_v30 = vsub.f32 %v1016_v44, %v1037_v26  ;;  %v1050_v19 = vsub.f32 %v1017_v23, %v1037_v26  ;;  %v1507_v29 = vpop.f32.mrf.mxu1 }
 0x2f5   :  { %582 = vrot.lane.b32.xlu0 %v535_v60, %s2908_s20  ;;  %580 = vrot.lane.b32.xlu1 %v3476_v24, %s2908_s20  ;;  %v527_v1 = vadd.f32 %v526_v40, %v525_v55  ;;  %v543_v44 = vsel %vm542_vm0, %v535_v60, 0.0  ;;  %v2722_v55 = vpop.f32.mrf.mxu0 }
 0x2f6   :  { %v1018_v6 = vmul.f32 0.2, %v1012_v8  ;;  %v1019_v7 = vmul.f32 0.2, %v1013_v12  ;;  %v1057_v32 = vmul.f32 1.442695, %v1049_v30 }
 0x2f7   :  { %v528_v58 = vrot.slane %v527_v1, 2  ;;  %v1059_v48 = vmul.f32 1.442695, %v1050_v19  ;;  %v1611_v8 = vsel %vm423_vm12, %v2722_v55, 0.0  ;;  %v1601_v12 = vsel %vm421_vm13, %v1507_v29, 0.0 }
 0x2f8   :  { %v1038_v9 = vsel %vm928_vm15, %v1018_v6, -inf  ;;  %v1039_v10 = vsel %vm930_vm14, %v1019_v7, -inf }
 0x2f9   :  { %630 = vrot.lane.b32.xlu0 %v535_v60, %s2909_s21  ;;  %v529_v49 = vadd.f32 %v528_v58, %v527_v1  ;;  %v1040_v63 = vmax.f32 %v1038_v9, %v1039_v10  ;;  %v1592_v58 = vpop.f32.mrf.mxu0 }
 0x2fa   :  { %v1610_v4 = vsel %vm421_vm13, %v1592_v58, 0.0 }
 0x2fb   :  { %v530_v47 = vrot.slane %v529_v49, 1  ;;  %v3484_v17 = vpop.eup %2841  ;;  %v1041_v28 = vrot.slane %v1040_v63, 4 }
 0x2fc   :  { %v3486_v18 = vpop.eup %2843  ;;  %v1065_v46 = vsel %vm928_vm15, %v3484_v17, 0.0 }
 0x2fd   :  { %v531_v16 = vadd.f32 %v530_v47, %v529_v49  ;;  %v1066_v20 = vsel %vm930_vm14, %v3486_v18, 0.0  ;;  %v1042_v59 = vmax.f32 %v1040_v63, %v1041_v28 }
 0x2fe   :  { %v1067_v36 = vadd.f32 %v1066_v20, %v1065_v46 }
 0x2ff   :  { %2845 = vrcp.f32 %v531_v16  ;;  %v1043_v51 = vrot.slane %v1042_v59, 2  ;;  %v1612_v16 = vadd.f32 %v1611_v8, %v1610_v4 }
 0x300   :  { %v1068_v39 = vrot.slane %v1067_v36, 4  ;;  %2847 = vpow2.f32 %v1057_v32 }
 0x301   :  { %2849 = vpow2.f32 %v1059_v48  ;;  %v1044_v38 = vmax.f32 %v1042_v59, %v1043_v51  ;;  %v1613_v46 = vrot.slane %v1612_v16, 4 }
 0x302   :  { %v1069_v43 = vadd.f32 %v1068_v39, %v1067_v36 }
 0x303   :  { %v1614_v36 = vadd.f32 %v1613_v46, %v1612_v16 }
 0x304   :  { %v1070_v52 = vrot.slane %v1069_v43, 2 }
 0x305   :  { %v1615_v30 = vrot.slane %v1614_v36, 2 }
 0x306   :  { %v1071_v23 = vadd.f32 %v1070_v52, %v1069_v43  ;;  %v539_v52 = vsel %vm538_vm1, %v3476_v24, 0.0 }
 0x307   :  { %v1616_v32 = vadd.f32 %v1615_v30, %v1614_v36 }
 0x308   :  { %v1072_v3 = vrot.slane %v1071_v23, 1 }
 0x30a   :  { %v1073_v27 = vadd.f32 %v1072_v3, %v1071_v23 }
 0x30c   :  { %v2846_v35 = vpop.eup %2845  ;;  %2851 = vrcp.f32 %v1073_v27 }
 0x30d   :  { %v536_v41 = vmul.f32 %v2846_v35, %v2834_v34  ;;  %v537_v50 = vmul.f32 %v2846_v35, %v2836_v53  ;;  %v1045_v34 = vrot.slane %v1044_v38, 1  ;;  %v3502_v31 = vpop.eup %2847 }
 0x30e   :  { %v3505_v45 = vpop.eup %2849  ;;  %v1074_v56 = vsel %vm928_vm15, %v3502_v31, 0.0 }
 0x30f   :  { %584 = vrot.lane.b32.xlu1 %v536_v41, %s2908_s20  ;;  %v546_v11 = vsel %vm538_vm1, %v536_v41, 0.0  ;;  %v549_v53 = vsel %vm542_vm0, %v537_v50, 0.0  ;;  %v1046_v15 = vmax.f32 %v1044_v38, %v1045_v34  ;;  %v1075_v57 = vsel %vm930_vm14, %v3505_v45, 0.0 }
 0x310   :  { %v1076_v1 = vadd.f32 %v1075_v57, %v1074_v56 }
 0x311   :  { %v1051_v40 = vsub.f32 %v1018_v6, %v1046_v15  ;;  %v1052_v60 = vsub.f32 %v1019_v7, %v1046_v15  ;;  %v1602_v6 = vsel %vm423_vm12, %v2711_v0, 0.0 }
 0x312   :  { %v1077_v47 = vrot.slane %v1076_v1, 4  ;;  %v1603_v42 = vadd.f32 %v1602_v6, %v1601_v12 }
 0x313   :  { %586 = vrot.lane.b32.xlu1 %v537_v50, %s2908_s20  ;;  %v1061_v2 = vmul.f32 1.442695, %v1051_v40  ;;  %v1063_v49 = vmul.f32 1.442695, %v1052_v60 }
 0x314   :  { %v1078_v61 = vadd.f32 %v1077_v47, %v1076_v1  ;;  %v1604_v10 = vrot.slane %v1603_v42, 4 }
 0x315   :  { %2853 = vpow2.f32 %v1061_v2 }
 0x316   :  { %2855 = vpow2.f32 %v1063_v49  ;;  %v1079_v9 = vrot.slane %v1078_v61, 2  ;;  %v1605_v63 = vadd.f32 %v1604_v10, %v1603_v42  ;;  %v2731_v42 = vpop.f32.mrf.mxu1 }
 0x317   :  { %628 = vrot.lane.b32.xlu1 %v3476_v24, %s2909_s21 }
 0x318   :  { %544 = vadd.xlane.f32.xlu0 %v543_v44  ;;  %v1080_v26 = vadd.f32 %v1079_v9, %v1078_v61  ;;  %v1606_v35 = vrot.slane %v1605_v63, 2 }
 0x319   :  { %v2852_v7 = vpop.eup %2851 }
 0x31a   :  { %v1096_v20 = vmul.f32 %v2852_v7, %v3486_v18  ;;  %v1081_v28 = vrot.slane %v1080_v26, 1  ;;  %v1607_v59 = vadd.f32 %v1606_v35, %v1605_v63  ;;  %v1095_v2 = vmul.f32 %v2852_v7, %v3484_v17 }
 0x31b   :  { %632 = vrot.lane.b32.xlu1 %v536_v41, %s2909_s21  ;;  %v2124_v63 = vsel %vm930_vm14, %v2731_v42, 0.0 }
 0x31c   :  { %547 = vadd.xlane.f32.xlu0 %v546_v11  ;;  %v1082_v43 = vadd.f32 %v1081_v28, %v1080_v26  ;;  %v1608_v44 = vrot.slane %v1607_v59, 1  ;;  %v1104_v49 = vsel %vm542_vm0, %v1096_v20, 0.0  ;;  %v2740_v26 = vpop.f32.mrf.mxu0 }
 0x31e   :  { %2857 = vrcp.f32 %v1082_v43  ;;  %v1609_v11 = vadd.f32 %v1608_v44, %v1607_v59 }
 0x31f   :  { %634 = vrot.lane.b32.xlu1 %v537_v50, %s2909_s21  ;;  %v1617_v50 = vrot.slane %v1616_v32, 1 }
 0x320   :  { %550 = vadd.xlane.f32.xlu0 %v549_v53  ;;  %v1619_v34 = vmul.f32 0.11111111, %v1609_v11 }
 0x321   :  { %v1618_v23 = vadd.f32 %v1617_v50, %v1616_v32 }
 0x322   :  { %v3517_v39 = vpop.eup %2853  ;;  %v3531_v57 = vsub.f32 %v1507_v29, %v1619_v34  ;;  %v3533_v40 = vsub.f32 %v2711_v0, %v1619_v34 }
 0x323   :  { %v3519_v19 = vpop.eup %2855  ;;  %v1083_v41 = vsel %vm928_vm15, %v3517_v39, 0.0  ;;  %v1620_v3 = vmul.f32 0.11111111, %v1618_v23 }
 0x324   :  { %v1084_v18 = vsel %vm930_vm14, %v3519_v19, 0.0  ;;  %v1626_v0 = vmul.f32 %v3533_v40, %v3533_v40 }
 0x325   :  { %v1085_v48 = vadd.f32 %v1084_v18, %v1083_v41  ;;  %v3527_v27 = vsub.f32 %v1592_v58, %v1620_v3  ;;  %v3529_v15 = vsub.f32 %v2722_v55, %v1620_v3  ;;  %v1625_v55 = vmul.f32 %v3531_v57, %v3531_v57  ;;  %v2029_v41 = vpop.f32.mrf.mxu0 }
 0x326   :  { %v1630_v12 = vsel %vm423_vm12, %v1626_v0, 0.0 }
 0x327   :  { %v1086_v51 = vrot.slane %v1085_v48, 4  ;;  %v1627_v60 = vmul.f32 %v3527_v27, %v3527_v27  ;;  %v1628_v1 = vmul.f32 %v3529_v15, %v3529_v15 }
 0x329   :  { %v1087_v38 = vadd.f32 %v1086_v51, %v1085_v48  ;;  %v1638_v4 = vsel %vm421_vm13, %v1627_v60, 0.0  ;;  %v1639_v47 = vsel %vm423_vm12, %v1628_v1, 0.0  ;;  %v2132_v48 = vsel %vm928_vm15, %v2029_v41, 0.0 }
 0x32a   :  { %v1640_v16 = vadd.f32 %v1639_v47, %v1638_v4 }
 0x32b   :  { %v1088_v53 = vrot.slane %v1087_v38, 2  ;;  %v2858_v56 = vpop.eup %2857 }
 0x32c   :  { %v1098_v58 = vmul.f32 %v2858_v56, %v3505_v45  ;;  %v1097_v17 = vmul.f32 %v2858_v56, %v3502_v31  ;;  %v1629_v45 = vsel %vm421_vm13, %v1625_v55, 0.0  ;;  %v1641_v7 = vrot.slane %v1640_v16, 4  ;;  %v1944_v31 = vpop.f32.mrf.mxu1 }
 0x32d   :  { %v1089_v24 = vadd.f32 %v1088_v53, %v1087_v38  ;;  %v1631_v6 = vadd.f32 %v1630_v12, %v1629_v45  ;;  %v2123_v36 = vsel %vm928_vm15, %v1944_v31, 0.0 }
 0x32e   :  { %v1110_v8 = vsel %vm542_vm0, %v1098_v58, 0.0  ;;  %v2125_v28 = vadd.f32 %v2124_v63, %v2123_v36 }
 0x32f   :  { %v1090_v29 = vrot.slane %v1089_v24, 1  ;;  %v1632_v46 = vrot.slane %v1631_v6, 4 }
 0x330   :  { %v2126_v43 = vrot.slane %v2125_v28, 4 }
 0x331   :  { %v1091_v61 = vadd.f32 %v1090_v29, %v1089_v24  ;;  %v1633_v9 = vadd.f32 %v1632_v46, %v1631_v6  ;;  %v1101_v29 = vsel %vm538_vm1, %v1095_v2, 0.0 }
 0x332   :  { %v2127_v23 = vadd.f32 %v2126_v43, %v2125_v28 }
 0x333   :  { %2859 = vrcp.f32 %v1091_v61  ;;  %v1634_v30 = vrot.slane %v1633_v9, 2 }
 0x334   :  { %v2128_v34 = vrot.slane %v2127_v23, 2 }
 0x335   :  { %v1635_v32 = vadd.f32 %v1634_v30, %v1633_v9 }
 0x336   :  { %1163 = vrot.lane.b32.xlu0 %v1096_v20, %s2908_s20  ;;  %v1642_v20 = vadd.f32 %v1641_v7, %v1640_v16  ;;  %v2129_v60 = vadd.f32 %v2128_v34, %v2127_v23  ;;  %v3613_v34 = vpop.f32.mrf.mxu1 }
 0x337   :  { %v1636_v44 = vrot.slane %v1635_v32, 1 }
 0x338   :  { %v1643_v10 = vrot.slane %v1642_v20, 2  ;;  %v2130_v55 = vrot.slane %v2129_v60, 1 }
 0x339   :  { %v1637_v3 = vadd.f32 %v1636_v44, %v1635_v32 }
 0x33a   :  { %v1644_v35 = vadd.f32 %v1643_v10, %v1642_v20  ;;  %v2131_v0 = vadd.f32 %v2130_v55, %v2129_v60 }
 0x33b   :  { %v1647_v24 = vmul.f32 0.125, %v1637_v3 }
 0x33c   :  { %v1645_v59 = vrot.slane %v1644_v35, 1  ;;  %v2150_v47 = vmul.f32 0.11111111, %v2131_v0 }
 0x33e   :  { %v1646_v38 = vadd.f32 %v1645_v59, %v1644_v35  ;;  %v3568_v16 = vsub.f32 %v1944_v31, %v2150_v47  ;;  %v3570_v61 = vsub.f32 %v2731_v42, %v2150_v47 }
 0x340   :  { %v3557_v18 = vpop.eup %2859  ;;  %v1648_v53 = vmul.f32 0.125, %v1646_v38  ;;  %v2159_v20 = vmul.f32 %v3568_v16, %v3568_v16 }
 0x341   :  { %v1100_v50 = vmul.f32 %v3557_v18, %v3519_v19  ;;  %v3607_v44 = vmul.f32 %v3557_v18, %v3517_v39 }
 0x342   :  { %v1650_v1 = vadd.f32 1e-05, %v1648_v53  ;;  %v2165_v35 = vsel %vm928_vm15, %v2159_v20, 0.0 }
 0x343   :  { %540 = vadd.xlane.f32.xlu1 %v539_v52  ;;  %v2133_v52 = vsel %vm930_vm14, %v2740_v26, 0.0  ;;  %v1116_v36 = vsel %vm542_vm0, %v1100_v50, 0.0 }
 0x344   :  { %v2134_v51 = vadd.f32 %v2133_v52, %v2132_v48  ;;  %2861 = vrsqrt.f32 %v1650_v1 }
 0x346   :  { %v2135_v11 = vrot.slane %v2134_v51, 4 }
 0x348   :  { %v2136_v56 = vadd.f32 %v2135_v11, %v2134_v51 }
 0x351   :  { %v2862_v6 = vpop.eup %2861 }
 0x352   :  { %v1656_v10 = vmul.f32 %v2862_v6, %v3529_v15 }
 0x354   :  { %1161 = vrot.lane.b32.xlu1 %v1095_v2, %s2908_s20  ;;  %v2160_v2 = vmul.f32 %v3570_v61, %v3570_v61  ;;  %v3589_v15 = vmul.f32 0.2, %v1656_v10 }
 0x355   :  { %1105 = vadd.xlane.f32.xlu0 %v1104_v49  ;;  %v2137_v49 = vrot.slane %v2136_v56, 2 }
 0x356   :  { %v2166_v32 = vsel %vm930_vm14, %v2160_v2, 0.0  ;;  %v1671_v52 = vsel %vm423_vm12, %v3589_v15, -inf }
 0x357   :  { %v2138_v19 = vadd.f32 %v2137_v49, %v2136_v56  ;;  %v3622_v49 = vpop.f32.mrf.mxu1 }
 0x358   :  { %1165 = vrot.lane.b32.xlu1 %v1097_v17, %s2908_s20 }
 0x359   :  { %1111 = vadd.xlane.f32.xlu0 %v1110_v8  ;;  %v2139_v4 = vrot.slane %v2138_v19, 1  ;;  %v1107_v8 = vsel %vm538_vm1, %v1097_v17, 0.0  ;;  %v1655_v17 = vmul.f32 %v2862_v6, %v3527_v27  ;;  %v2142_v6 = vsel %vm930_vm14, %v3613_v34, 0.0 }
 0x35b   :  { %v2140_v12 = vadd.f32 %v2139_v4, %v2138_v19  ;;  %v3587_v27 = vmul.f32 0.2, %v1655_v17  ;;  %v2141_v4 = vsel %vm928_vm15, %v3622_v49, 0.0 }
 0x35c   :  { %1167 = vrot.lane.b32.xlu1 %v1098_v58, %s2908_s20  ;;  %v1649_v58 = vadd.f32 1e-05, %v1647_v24 }
 0x35d   :  { %v2151_v46 = vmul.f32 0.11111111, %v2140_v12 }
 0x35e   :  { %2863 = vrsqrt.f32 %v1649_v58 }
 0x35f   :  { %v3579_v42 = vsub.f32 %v2029_v41, %v2151_v46  ;;  %v3581_v63 = vsub.f32 %v2740_v26, %v2151_v46  ;;  %v2167_v41 = vadd.f32 %v2166_v32, %v2165_v35 }
 0x361   :  { %v2161_v26 = vmul.f32 %v3579_v42, %v3579_v42  ;;  %v2168_v38 = vrot.slane %v2167_v41, 4 }
 0x363   :  { %v2174_v11 = vsel %vm928_vm15, %v2161_v26, 0.0  ;;  %v2169_v1 = vadd.f32 %v2168_v38, %v2167_v41 }
 0x365   :  { %v2170_v47 = vrot.slane %v2169_v1, 2 }
 0x367   :  { %v3566_v45 = vpop.permute.xlu1 %580  ;;  %v583_v31 = vpop.permute.xlu0 %582  ;;  %v2171_v17 = vadd.f32 %v2170_v47, %v2169_v1 }
 0x368   :  { %v595_v48 = vsel %vm542_vm0, %v583_v31, 0.0 }
 0x369   :  { %v2172_v32 = vrot.slane %v2171_v17, 1 }
 0x36b   :  { %v2864_v9 = vpop.eup %2863  ;;  %v631_v60 = vpop.permute.xlu0 %630 }
 0x36c   :  { %v1653_v30 = vmul.f32 %v2864_v9, %v3531_v57  ;;  %v1654_v28 = vmul.f32 %v2864_v9, %v3533_v40  ;;  %v2162_v57 = vmul.f32 %v3581_v63, %v3581_v63  ;;  %v643_v0 = vsel %vm542_vm0, %v631_v60, 0.0 }
 0x36e   :  { %v3596_v40 = vmul.f32 0.2, %v1653_v30  ;;  %v3598_v59 = vmul.f32 0.2, %v1654_v28  ;;  %v2175_v3 = vsel %vm930_vm14, %v2162_v57, 0.0 }
 0x36f   :  { %1171 = vrot.lane.b32.xlu0 %v1100_v50, %s2908_s20  ;;  %v1670_v50 = vsel %vm421_vm13, %v3587_v27, -inf  ;;  %v2176_v24 = vadd.f32 %v2175_v3, %v2174_v11 }
 0x370   :  { %v1672_v53 = vmax.f32 %v1670_v50, %v1671_v52  ;;  %v1661_v56 = vsel %vm421_vm13, %v3596_v40, -inf  ;;  %v1662_v39 = vsel %vm423_vm12, %v3598_v59, -inf }
 0x371   :  { %v1663_v58 = vmax.f32 %v1661_v56, %v1662_v39 }
 0x372   :  { %v1673_v55 = vrot.slane %v1672_v53, 4 }
 0x374   :  { %v1674_v12 = vmax.f32 %v1672_v53, %v1673_v55 }
 0x380   :  { %1102 = vadd.xlane.f32.xlu1 %v1101_v29  ;;  %v2177_v29 = vrot.slane %v2176_v24, 4 }
 0x381   :  { %v585_v7 = vpop.permute.xlu1 %584 }
 0x382   :  { %v598_v51 = vsel %vm538_vm1, %v585_v7, 0.0  ;;  %v2143_v7 = vadd.f32 %v2142_v6, %v2141_v4  ;;  %v2178_v2 = vadd.f32 %v2177_v29, %v2176_v24 }
 0x384   :  { %1108 = vadd.xlane.f32.xlu1 %v1107_v8  ;;  %v1664_v8 = vrot.slane %v1663_v58, 4  ;;  %v2144_v31 = vrot.slane %v2143_v7, 4  ;;  %v2179_v35 = vrot.slane %v2178_v2, 2 }
 0x385   :  { %v587_v43 = vpop.permute.xlu1 %586 }
 0x386   :  { %v601_v18 = vsel %vm542_vm0, %v587_v43, 0.0  ;;  %v1665_v10 = vmax.f32 %v1663_v58, %v1664_v8  ;;  %v2145_v26 = vadd.f32 %v2144_v31, %v2143_v7  ;;  %v2180_v50 = vadd.f32 %v2179_v35, %v2178_v2 }
 0x388   :  { %v1666_v43 = vrot.slane %v1665_v10, 2  ;;  %v2146_v56 = vrot.slane %v2145_v26, 2  ;;  %v2181_v24 = vrot.slane %v2180_v50, 1 }
 0x389   :  { %v3609_v23 = vpop.permute.xlu1 %628 }
 0x38a   :  { %v1667_v38 = vmax.f32 %v1665_v10, %v1666_v43 }
 0x38c   :  { %v1668_v1 = vrot.slane %v1667_v38, 1 }
 0x38d   :  { %v633_v19 = vpop.permute.xlu1 %632 }
 0x38e   :  { %1117 = vadd.xlane.f32.xlu0 %v1116_v36  ;;  %v646_v46 = vsel %vm538_vm1, %v633_v19, 0.0  ;;  %v1675_v36 = vrot.slane %v1674_v12, 2  ;;  %v2147_v19 = vadd.f32 %v2146_v56, %v2145_v26  ;;  %v1669_v29 = vmax.f32 %v1667_v38, %v1668_v1 }
 0x390   :  { %v1679_v7 = vsub.f32 %v3596_v40, %v1669_v29  ;;  %v1680_v2 = vsub.f32 %v3598_v59, %v1669_v29  ;;  %v592_v40 = vsel %vm538_vm1, %v3566_v45, 0.0 }
 0x391   :  { %v635_v9 = vpop.permute.xlu1 %634 }
 0x392   :  { %596 = vadd.xlane.f32.xlu0 %v595_v48  ;;  %v649_v30 = vsel %vm542_vm0, %v635_v9, 0.0  ;;  %v1676_v48 = vmax.f32 %v1674_v12, %v1675_v36  ;;  %v2148_v12 = vrot.slane %v2147_v19, 1  ;;  %v1113_v36 = vsel %vm538_vm1, %v3607_v44, 0.0 }
 0x393   :  { %v1683_v31 = vmul.f32 1.442695, %v1679_v7 }
 0x394   :  { %v1677_v11 = vrot.slane %v1676_v48, 1 }
 0x395   :  { %1169 = vrot.lane.b32.xlu1 %v3607_v44, %s2908_s20  ;;  %v640_v44 = vsel %vm538_vm1, %v3609_v23, 0.0 }
 0x396   :  { %599 = vadd.xlane.f32.xlu0 %v598_v51  ;;  %v2173_v51 = vadd.f32 %v2172_v32, %v2171_v17  ;;  %v1678_v58 = vmax.f32 %v1676_v48, %v1677_v11  ;;  %v2149_v17 = vadd.f32 %v2148_v12, %v2147_v19 }
 0x398   :  { %v2192_v55 = vmul.f32 0.125, %v2173_v51  ;;  %v1681_v4 = vsub.f32 %v3587_v27, %v1678_v58  ;;  %v1682_v8 = vsub.f32 %v3589_v15, %v1678_v58  ;;  %v1685_v27 = vmul.f32 1.442695, %v1680_v2 }
 0x399   :  { %v2152_v15 = vmul.f32 0.11111111, %v2149_v17 }
 0x39a   :  { %602 = vadd.xlane.f32.xlu0 %v601_v18  ;;  %v2195_v47 = vadd.f32 1e-05, %v2192_v55  ;;  %v1689_v9 = vmul.f32 1.442695, %v1682_v8 }
 0x39b   :  { %v3647_v59 = vsub.f32 %v3622_v49, %v2152_v15 }
 0x39c   :  { %2865 = vrsqrt.f32 %v2195_v47 }
 0x39d   :  { %v2163_v32 = vmul.f32 %v3647_v59, %v3647_v59 }
 0x39e   :  { %644 = vadd.xlane.f32.xlu0 %v643_v0  ;;  %v2182_v0 = vadd.f32 %v2181_v24, %v2180_v50 }
 0x3a0   :  { %v2193_v6 = vmul.f32 0.125, %v2182_v0 }
 0x3a1   :  { %v3630_v20 = vpop.xlane.xlu0 %544 }
 0x3a2   :  { %647 = vadd.xlane.f32.xlu0 %v646_v46  ;;  %v1687_v46 = vmul.f32 1.442695, %v1681_v4  ;;  %v2196_v10 = vadd.f32 1e-05, %v2193_v6 }
 0x3a4   :  { %2867 = vpow2.f32 %v1687_v46 }
 0x3a5   :  { %v548_v28 = vpop.xlane.xlu0 %547  ;;  %2869 = vpow2.f32 %v1689_v9 }
 0x3a6   :  { %650 = vadd.xlane.f32.xlu0 %v649_v30  ;;  %v554_v41 = vmul.f32 %v548_v28, %v3106_v5  ;;  %2871 = vrsqrt.f32 %v2196_v10  ;;  %v3650_v30 = vsub.f32 %v3613_v34, %v2152_v15  ;;  %v2183_v34 = vsel %vm928_vm15, %v2163_v32, 0.0 }
 0x3a7   :  { %2873 = vpow2.f32 %v1683_v31 }
 0x3a8   :  { %v565_v3 = vsel %vm128_vm5, %v554_v41, 0.0  ;;  %2875 = vpow2.f32 %v1685_v27  ;;  %v2164_v45 = vmul.f32 %v3650_v30, %v3650_v30 }
 0x3a9   :  { %v551_v57 = vpop.xlane.xlu0 %550  ;;  %v2866_v35 = vpop.eup %2865 }
 0x3aa   :  { %v555_v52 = vmul.f32 %v551_v57, %v3130_v14  ;;  %v2201_v43 = vmul.f32 %v2866_v35, %v3568_v16  ;;  %v2184_v41 = vsel %vm930_vm14, %v2164_v45, 0.0  ;;  %v2202_v23 = vmul.f32 %v2866_v35, %v3570_v61 }
 0x3ac   :  { %v566_v53 = vsel %vm132_vm10, %v555_v52, 0.0  ;;  %v3666_v50 = vmul.f32 0.2, %v2201_v43  ;;  %v2185_v52 = vadd.f32 %v2184_v41, %v2183_v34  ;;  %v3678_v56 = vmul.f32 0.2, %v2202_v23 }
 0x3ad   :  { %v567_v39 = vadd.f32 %v566_v53, %v565_v3  ;;  %v1164_v18 = vpop.permute.xlu0 %1163  ;;  %v553_v3 = vmul.f32 %v3630_v20, %v3097_v62 }
 0x3ae   :  { %v1182_v60 = vsel %vm542_vm0, %v1164_v18, 0.0  ;;  %v2213_v1 = vsel %vm928_vm15, %v3666_v50, -inf  ;;  %v2186_v58 = vrot.slane %v2185_v52, 4 }
 0x3af   :  { %1183 = vadd.xlane.f32.xlu0 %v1182_v60  ;;  %v568_v28 = vrot.slane %v567_v39, 4  ;;  %v557_v0 = vsel %vm132_vm10, %v553_v3, 0.0 }
 0x3b0   :  { %v2187_v17 = vadd.f32 %v2186_v58, %v2185_v52 }
 0x3b1   :  { %v569_v48 = vadd.f32 %v568_v28, %v567_v39  ;;  %v3659_v49 = vpop.eup %2867 }
 0x3b2   :  { %v3663_v26 = vpop.eup %2869  ;;  %v1700_v16 = vsel %vm421_vm13, %v3659_v49, 0.0  ;;  %v2188_v43 = vrot.slane %v2187_v17, 2 }
 0x3b3   :  { %v2872_v57 = vpop.eup %2871  ;;  %v570_v51 = vrot.slane %v569_v48, 2  ;;  %v1701_v11 = vsel %vm423_vm12, %v3663_v26, 0.0 }
 0x3b4   :  { %v3668_v38 = vpop.eup %2873  ;;  %v2203_v61 = vmul.f32 %v2872_v57, %v3579_v42  ;;  %v2204_v39 = vmul.f32 %v2872_v57, %v3581_v63  ;;  %v1702_v60 = vadd.f32 %v1701_v11, %v1700_v16  ;;  %v2214_v63 = vsel %vm930_vm14, %v3678_v56, -inf }
 0x3b5   :  { %v3676_v53 = vpop.eup %2875  ;;  %v571_v55 = vadd.f32 %v570_v51, %v569_v48  ;;  %v1691_v20 = vsel %vm421_vm13, %v3668_v38, 0.0  ;;  %v2215_v9 = vmax.f32 %v2213_v1, %v2214_v63  ;;  %v2189_v3 = vadd.f32 %v2188_v43, %v2187_v17 }
 0x3b6   :  { %v1692_v19 = vsel %vm423_vm12, %v3676_v53, 0.0  ;;  %v3693_v29 = vmul.f32 0.2, %v2203_v61  ;;  %v3695_v4 = vmul.f32 0.2, %v2204_v39  ;;  %v1703_v7 = vrot.slane %v1702_v60, 4 }
 0x3b7   :  { %v1693_v6 = vadd.f32 %v1692_v19, %v1691_v20  ;;  %v572_v46 = vrot.slane %v571_v55, 1  ;;  %v2216_v32 = vrot.slane %v2215_v9, 4  ;;  %v2190_v20 = vrot.slane %v2189_v3, 1 }
 0x3b8   :  { %v2222_v10 = vsel %vm928_vm15, %v3693_v29, -inf }
 0x3b9   :  { %1114 = vadd.xlane.f32.xlu1 %v1113_v36  ;;  %v2223_v36 = vsel %vm930_vm14, %v3695_v4, -inf  ;;  %v573_v28 = vadd.f32 %v572_v46, %v571_v55  ;;  %v2217_v16 = vmax.f32 %v2215_v9, %v2216_v32 }
 0x3ba   :  { %v2224_v45 = vmax.f32 %v2222_v10, %v2223_v36 }
 0x3bb   :  { %v575_v57 = vmul.f32 0.11111111, %v573_v28  ;;  %v2218_v58 = vrot.slane %v2217_v16, 2 }
 0x3bc   :  { %v2225_v11 = vrot.slane %v2224_v45, 4 }
 0x3bd   :  { %593 = vadd.xlane.f32.xlu1 %v592_v40  ;;  %v1694_v40 = vrot.slane %v1693_v6, 4 }
 0x3be   :  { %v2226_v55 = vmax.f32 %v2224_v45, %v2225_v11 }
 0x3bf   :  { %v1695_v23 = vadd.f32 %v1694_v40, %v1693_v6 }
 0x3c1   :  { %641 = vadd.xlane.f32.xlu1 %v640_v44  ;;  %v1704_v44 = vadd.f32 %v1703_v7, %v1702_v60  ;;  %v1696_v1 = vrot.slane %v1695_v23, 2 }
 0x3c3   :  { %v1705_v51 = vrot.slane %v1704_v44, 2  ;;  %v1697_v63 = vadd.f32 %v1696_v1, %v1695_v23 }
 0x3c5   :  { %v1706_v60 = vadd.f32 %v1705_v51, %v1704_v44 }
 0x3cc   :  { %v541_v18 = vpop.xlane.xlu1 %540 }
 0x3cd   :  { %v552_v24 = vmul.f32 %v541_v18, %v3079_v54  ;;  %v2435_v18 = vrot.slane %v575_v57, 7 }
 0x3cf   :  { %v556_v42 = vsel %vm128_vm5, %v552_v24, 0.0 }
 0x3d0   :  { %v558_v47 = vadd.f32 %v557_v0, %v556_v42  ;;  %v1162_v8 = vpop.permute.xlu1 %1161  ;;  %v1707_v42 = vrot.slane %v1706_v60, 1 }
 0x3d1   :  { %v1179_v12 = vsel %vm538_vm1, %v1162_v8, 0.0  ;;  %v2227_v8 = vrot.slane %v2226_v55, 2 }
 0x3d2   :  { %v559_v2 = vrot.slane %v558_v47, 4  ;;  %1180 = vadd.xlane.f32.xlu1 %v1179_v12  ;;  %v2191_v12 = vadd.f32 %v2190_v20, %v2189_v3  ;;  %v1708_v46 = vadd.f32 %v1707_v42, %v1706_v60 }
 0x3d3   :  { %v2228_v17 = vmax.f32 %v2226_v55, %v2227_v8 }
 0x3d4   :  { %v560_v31 = vadd.f32 %v559_v2, %v558_v47  ;;  %v1166_v27 = vpop.permute.xlu1 %1165  ;;  %v2219_v47 = vmax.f32 %v2217_v16, %v2218_v58  ;;  %v1698_v2 = vrot.slane %v1697_v63, 1  ;;  %v2194_v10 = vmul.f32 0.125, %v2191_v12 }
 0x3d5   :  { %v1185_v15 = vsel %vm538_vm1, %v1166_v27, 0.0  ;;  %2877 = vrcp.f32 %v1708_v46  ;;  %v2229_v27 = vrot.slane %v2228_v17, 1 }
 0x3d6   :  { %v561_v35 = vrot.slane %v560_v31, 2  ;;  %1186 = vadd.xlane.f32.xlu0 %v1185_v15  ;;  %v2220_v9 = vrot.slane %v2219_v47, 1  ;;  %v1699_v36 = vadd.f32 %v1698_v2, %v1697_v63  ;;  %v2197_v15 = vadd.f32 1e-05, %v2194_v10 }
 0x3d7   :  { %v2230_v44 = vmax.f32 %v2228_v17, %v2229_v27 }
 0x3d8   :  { %v562_v48 = vadd.f32 %v561_v35, %v560_v31  ;;  %v1168_v34 = vpop.permute.xlu1 %1167  ;;  %v2221_v31 = vmax.f32 %v2219_v47, %v2220_v9  ;;  %2879 = vrcp.f32 %v1699_v36 }
 0x3d9   :  { %v1188_v41 = vsel %vm542_vm0, %v1168_v34, 0.0  ;;  %2881 = vrsqrt.f32 %v2197_v15  ;;  %v2242_v32 = vsub.f32 %v3693_v29, %v2230_v44  ;;  %v2243_v43 = vsub.f32 %v3695_v4, %v2230_v44 }
 0x3da   :  { %v563_v52 = vrot.slane %v562_v48, 1  ;;  %1189 = vadd.xlane.f32.xlu0 %v1188_v41  ;;  %v2240_v40 = vsub.f32 %v3666_v50, %v2221_v31  ;;  %v2241_v28 = vsub.f32 %v3678_v56, %v2221_v31 }
 0x3db   :  { %v2250_v34 = vmul.f32 1.442695, %v2242_v32  ;;  %v2252_v41 = vmul.f32 1.442695, %v2243_v43 }
 0x3dc   :  { %v564_v61 = vadd.f32 %v563_v52, %v562_v48  ;;  %v2246_v35 = vmul.f32 1.442695, %v2240_v40  ;;  %v2248_v45 = vmul.f32 1.442695, %v2241_v28 }
 0x3de   :  { %v3704_v39 = vpop.xlane.xlu0 %1105  ;;  %v574_v24 = vmul.f32 0.11111111, %v564_v61  ;;  %2883 = vpow2.f32 %v2246_v35 }
 0x3df   :  { %2885 = vpow2.f32 %v2248_v45  ;;  %v1120_v61 = vmul.f32 %v3704_v39, %v3148_v21 }
 0x3e0   :  { %v3709_v0 = vsel %vm2436_vm3, %v2435_v18, %v574_v24  ;;  %2887 = vpow2.f32 %v2250_v34 }
 0x3e1   :  { %2889 = vpow2.f32 %v2252_v41  ;;  %v1126_v42 = vsel %vm132_vm10, %v1120_v61, 0.0 }
 0x3e2   :  { %v3706_v19 = vpop.xlane.xlu0 %1111  ;;  %v3716_v48 = vpop.eup %2877 }
 0x3e3   :  { %v3720_v23 = vmul.f32 %v3716_v48, %v3663_v26  ;;  %v1122_v63 = vmul.f32 %v3706_v19, %v3166_v25 }
 0x3e5   :  { %v3722_v50 = vpop.eup %2879  ;;  %v1135_v2 = vsel %vm132_vm10, %v1122_v63, 0.0 }
 0x3e6   :  { %v1172_v6 = vpop.permute.xlu0 %1171  ;;  %v2882_v56 = vpop.eup %2881  ;;  %v1712_v29 = vmul.f32 %v3722_v50, %v3676_v53 }
 0x3e7   :  { %v1194_v7 = vsel %vm542_vm0, %v1172_v6, 0.0  ;;  %v2205_v4 = vmul.f32 %v2882_v56, %v3647_v59  ;;  %v2206_v57 = vmul.f32 %v2882_v56, %v3650_v30 }
 0x3e8   :  { %1195 = vadd.xlane.f32.xlu0 %v1194_v7 }
 0x3e9   :  { %v3731_v52 = vmul.f32 0.2, %v2205_v4  ;;  %v3735_v51 = vmul.f32 0.2, %v2206_v57 }
 0x3eb   :  { %v3733_v26 = vpop.eup %2883  ;;  %v2231_v11 = vsel %vm928_vm15, %v3731_v52, -inf  ;;  %v2232_v3 = vsel %vm930_vm14, %v3735_v51, -inf }
 0x3ec   :  { %v3738_v16 = vpop.eup %2885  ;;  %v2258_v59 = vsel %vm928_vm15, %v3733_v26, 0.0  ;;  %v2233_v55 = vmax.f32 %v2231_v11, %v2232_v3  ;;  %v1718_v3 = vsel %vm542_vm0, %v1712_v29, 0.0 }
 0x3ed   :  { %v3742_v53 = vpop.eup %2887  ;;  %v2259_v30 = vsel %vm930_vm14, %v3738_v16, 0.0 }
 0x3ee   :  { %v3752_v18 = vpop.eup %2889  ;;  %v2260_v1 = vadd.f32 %v2259_v30, %v2258_v59  ;;  %v2267_v58 = vsel %vm928_vm15, %v3742_v53, 0.0  ;;  %v2234_v46 = vrot.slane %v2233_v55, 4  ;;  %v3776_v59 = vmul.f32 %v3716_v48, %v3659_v49 }
 0x3ef   :  { %v2268_v20 = vsel %vm930_vm14, %v3752_v18, 0.0 }
 0x3f0   :  { %v2261_v6 = vrot.slane %v2260_v1, 4  ;;  %v2269_v7 = vadd.f32 %v2268_v20, %v2267_v58  ;;  %v2235_v27 = vmax.f32 %v2233_v55, %v2234_v46 }
 0x3f2   :  { %v2262_v19 = vadd.f32 %v2261_v6, %v2260_v1  ;;  %v2270_v31 = vrot.slane %v2269_v7, 4  ;;  %v2236_v44 = vrot.slane %v2235_v27, 2 }
 0x3f4   :  { %v2271_v40 = vadd.f32 %v2270_v31, %v2269_v7  ;;  %v2263_v28 = vrot.slane %v2262_v19, 2  ;;  %v2237_v45 = vmax.f32 %v2235_v27, %v2236_v44 }
 0x3f6   :  { %v2272_v32 = vrot.slane %v2271_v40, 2  ;;  %v2264_v43 = vadd.f32 %v2263_v28, %v2262_v19  ;;  %v2238_v41 = vrot.slane %v2237_v45, 1 }
 0x3f8   :  { %v2265_v56 = vrot.slane %v2264_v43, 1  ;;  %v2273_v4 = vadd.f32 %v2272_v32, %v2271_v40  ;;  %v2239_v61 = vmax.f32 %v2237_v45, %v2238_v41 }
 0x3fa   :  { %v2244_v49 = vsub.f32 %v3731_v52, %v2239_v61  ;;  %v3793_v52 = vmul.f32 %v3722_v50, %v3668_v38 }
 0x3fc   :  { %v2254_v63 = vmul.f32 1.442695, %v2244_v49 }
 0x3fe   :  { %1763 = vrot.lane.b32.xlu0 %v3720_v23, %s2908_s20 }
 0x402   :  { %1759 = vrot.lane.b32.xlu0 %v1712_v29, %s2908_s20 }
 0x406   :  { %1807 = vrot.lane.b32.xlu0 %v1712_v29, %s2909_s21 }
 0x409   :  { %v1103_v24 = vpop.xlane.xlu1 %1102 }
 0x40a   :  { %v1119_v60 = vmul.f32 %v1103_v24, %v3123_v13  ;;  %v2266_v24 = vadd.f32 %v2265_v56, %v2264_v43 }
 0x40c   :  { %v1125_v39 = vsel %vm128_vm5, %v1119_v60, 0.0  ;;  %v2274_v60 = vrot.slane %v2273_v4, 1  ;;  %2891 = vrcp.f32 %v2266_v24 }
 0x40d   :  { %v3763_v47 = vadd.f32 %v1126_v42, %v1125_v39  ;;  %v1109_v8 = vpop.xlane.xlu1 %1108  ;;  %v2245_v42 = vsub.f32 %v3735_v51, %v2239_v61 }
 0x40e   :  { %v1121_v12 = vmul.f32 %v1109_v8, %v3141_v22  ;;  %v2275_v48 = vadd.f32 %v2274_v60, %v2273_v4 }
 0x40f   :  { %v2256_v39 = vmul.f32 1.442695, %v2245_v42 }
 0x410   :  { %v1134_v9 = vsel %vm128_vm5, %v1121_v12, 0.0  ;;  %2893 = vrcp.f32 %v2275_v48 }
 0x411   :  { %v3768_v17 = vadd.f32 %v1135_v2, %v1134_v9  ;;  %v1170_v10 = vpop.permute.xlu1 %1169  ;;  %2895 = vpow2.f32 %v2254_v63 }
 0x412   :  { %v1191_v36 = vsel %vm538_vm1, %v1170_v10, 0.0  ;;  %2897 = vpow2.f32 %v2256_v39 }
 0x413   :  { %1192 = vadd.xlane.f32.xlu1 %v1191_v36 }
 0x417   :  { %v1118_v15 = vpop.xlane.xlu0 %1117 }
 0x418   :  { %v1124_v44 = vmul.f32 %v1118_v15, %v3181_v37 }
 0x419   :  { %v3800_v2 = vpop.eup %2891 }
 0x41a   :  { %v3806_v38 = vmul.f32 %v3800_v2, %v3738_v16 }
 0x41b   :  { %v3771_v35 = vpop.xlane.xlu0 %596 }
 0x41c   :  { %v605_v41 = vmul.f32 %v3771_v35, %v3097_v62 }
 0x41d   :  { %v3808_v50 = vpop.eup %2893 }
 0x41e   :  { %v3814_v9 = vmul.f32 %v3808_v50, %v3752_v18  ;;  %v3816_v10 = vpop.eup %2895  ;;  %v609_v61 = vsel %vm132_vm10, %v605_v41, 0.0 }
 0x41f   :  { %v600_v34 = vpop.xlane.xlu0 %599  ;;  %v3818_v19 = vpop.eup %2897  ;;  %v2276_v16 = vsel %vm928_vm15, %v3816_v10, 0.0 }
 0x420   :  { %v606_v57 = vmul.f32 %v600_v34, %v3106_v5  ;;  %v2277_v31 = vsel %vm930_vm14, %v3818_v19, 0.0  ;;  %v1144_v34 = vsel %vm132_vm10, %v1124_v44, 0.0 }
 0x421   :  { %v2278_v28 = vadd.f32 %v2277_v31, %v2276_v16 }
 0x422   :  { %v617_v1 = vsel %vm128_vm5, %v606_v57, 0.0 }
 0x423   :  { %v603_v11 = vpop.xlane.xlu0 %602 }
 0x424   :  { %v607_v30 = vmul.f32 %v603_v11, %v3130_v14  ;;  %1761 = vrot.lane.b32.xlu1 %v3776_v59, %s2908_s20  ;;  %v2279_v11 = vrot.slane %v2278_v28, 4 }
 0x425   :  { %1719 = vadd.xlane.f32.xlu0 %v1718_v3 }
 0x426   :  { %v618_v58 = vsel %vm132_vm10, %v607_v30, 0.0 }
 0x427   :  { %v619_v55 = vadd.f32 %v618_v58, %v617_v1  ;;  %v645_v20 = vpop.xlane.xlu0 %644 }
 0x428   :  { %1809 = vrot.lane.b32.xlu1 %v3776_v59, %s2909_s21  ;;  %v653_v24 = vmul.f32 %v645_v20, %v3097_v62 }
 0x429   :  { %v620_v36 = vrot.slane %v619_v55, 4 }
 0x42b   :  { %v648_v29 = vpop.xlane.xlu0 %647  ;;  %v621_v27 = vadd.f32 %v620_v36, %v619_v55  ;;  %v2280_v55 = vadd.f32 %v2279_v11, %v2278_v28 }
 0x42c   :  { %1811 = vrot.lane.b32.xlu1 %v3720_v23, %s2909_s21  ;;  %v654_v8 = vmul.f32 %v648_v29, %v3106_v5  ;;  %v657_v29 = vsel %vm132_vm10, %v653_v24, 0.0 }
 0x42d   :  { %v622_v45 = vrot.slane %v621_v27, 2 }
 0x42e   :  { %v665_v51 = vsel %vm128_vm5, %v654_v8, 0.0 }
 0x42f   :  { %v651_v12 = vpop.xlane.xlu0 %650  ;;  %v623_v15 = vadd.f32 %v622_v45, %v621_v27 }
 0x430   :  { %v655_v6 = vmul.f32 %v651_v12, %v3130_v14  ;;  %1757 = vrot.lane.b32.xlu1 %v3793_v52, %s2908_s20  ;;  %v2281_v12 = vrot.slane %v2280_v55, 2 }
 0x431   :  { %v624_v49 = vrot.slane %v623_v15, 1 }
 0x432   :  { %v666_v7 = vsel %vm132_vm10, %v655_v6, 0.0  ;;  %v2282_v16 = vadd.f32 %v2281_v12, %v2280_v55 }
 0x433   :  { %v667_v46 = vadd.f32 %v666_v7, %v665_v51  ;;  %v625_v6 = vadd.f32 %v624_v49, %v623_v15  ;;  %v1137_v49 = vrot.slane %v3768_v17, 4 }
 0x434   :  { %1805 = vrot.lane.b32.xlu1 %v3793_v52, %s2909_s21 }
 0x435   :  { %v668_v40 = vrot.slane %v667_v46, 4  ;;  %v627_v31 = vmul.f32 0.11111111, %v625_v6 }
 0x437   :  { %v669_v43 = vadd.f32 %v668_v40, %v667_v46  ;;  %v2438_v41 = vrot.slane %v627_v31, 7 }
 0x438   :  { %v1184_v45 = vpop.xlane.xlu0 %1183 }
 0x439   :  { %v670_v3 = vrot.slane %v669_v43, 2  ;;  %v1198_v15 = vmul.f32 %v1184_v45, %v3148_v21 }
 0x43b   :  { %2356 = vrot.lane.b32.xlu0 %v3806_v38, %s2908_s20  ;;  %v671_v48 = vadd.f32 %v670_v3, %v669_v43  ;;  %v1715_v43 = vsel %vm538_vm1, %v3793_v52, 0.0 }
 0x43d   :  { %v672_v51 = vrot.slane %v671_v48, 1 }
 0x43f   :  { %2360 = vrot.lane.b32.xlu0 %v3814_v9, %s2908_s20  ;;  %v673_v27 = vadd.f32 %v672_v51, %v671_v48 }
 0x442   :  { %v1115_v18 = vpop.xlane.xlu1 %1114 }
 0x443   :  { %v1123_v32 = vmul.f32 %v1115_v18, %v3159_v33  ;;  %v1128_v18 = vrot.slane %v3763_v47, 4 }
 0x445   :  { %v1143_v56 = vsel %vm128_vm5, %v1123_v32, 0.0 }
 0x446   :  { %v3832_v4 = vadd.f32 %v1144_v34, %v1143_v56  ;;  %v594_v57 = vpop.xlane.xlu1 %593  ;;  %v2283_v34 = vrot.slane %v2282_v16, 1  ;;  %v675_v56 = vmul.f32 0.11111111, %v673_v27 }
 0x447   :  { %v604_v30 = vmul.f32 %v594_v57, %v3079_v54 }
 0x448   :  { %v2440_v52 = vrot.slane %v675_v56, 7 }
 0x449   :  { %v608_v60 = vsel %vm128_vm5, %v604_v30, 0.0  ;;  %v1129_v30 = vadd.f32 %v1128_v18, %v3763_v47  ;;  %v1204_v47 = vsel %vm132_vm10, %v1198_v15, 0.0 }
 0x44a   :  { %v610_v1 = vadd.f32 %v609_v61, %v608_v60  ;;  %v642_v58 = vpop.xlane.xlu1 %641  ;;  %v1724_v60 = vsel %vm542_vm0, %v3720_v23, 0.0 }
 0x44b   :  { %v652_v35 = vmul.f32 %v642_v58, %v3079_v54 }
 0x44c   :  { %v611_v42 = vrot.slane %v610_v1, 4 }
 0x44d   :  { %v656_v63 = vsel %vm128_vm5, %v652_v35, 0.0  ;;  %v1130_v35 = vrot.slane %v1129_v30, 2 }
 0x44e   :  { %v612_v39 = vadd.f32 %v611_v42, %v610_v1  ;;  %v658_v8 = vadd.f32 %v657_v29, %v656_v63  ;;  %v2284_v1 = vadd.f32 %v2283_v34, %v2282_v16  ;;  %v2290_v34 = vmul.f32 %v3808_v50, %v3742_v53 }
 0x44f   :  { %v1131_v23 = vadd.f32 %v1130_v35, %v1129_v30 }
 0x450   :  { %v613_v20 = vrot.slane %v612_v39, 2  ;;  %v659_v7 = vrot.slane %v658_v8, 4  ;;  %2899 = vrcp.f32 %v2284_v1 }
 0x452   :  { %v614_v46 = vadd.f32 %v613_v20, %v612_v39  ;;  %v660_v36 = vadd.f32 %v659_v7, %v658_v8  ;;  %v1138_v39 = vadd.f32 %v1137_v49, %v3768_v17  ;;  %v1132_v7 = vrot.slane %v1131_v23, 1 }
 0x454   :  { %v615_v40 = vrot.slane %v614_v46, 1  ;;  %v661_v44 = vrot.slane %v660_v36, 2  ;;  %v1133_v17 = vadd.f32 %v1132_v7, %v1131_v23 }
 0x456   :  { %v616_v28 = vadd.f32 %v615_v40, %v614_v46  ;;  %v662_v32 = vadd.f32 %v661_v44, %v660_v36  ;;  %v1139_v46 = vrot.slane %v1138_v39, 2  ;;  %v2288_v44 = vmul.f32 %v3800_v2, %v3733_v26 }
 0x457   :  { %v1152_v56 = vmul.f32 0.11111111, %v1133_v17 }
 0x458   :  { %v626_v57 = vmul.f32 0.11111111, %v616_v28  ;;  %v663_v11 = vrot.slane %v662_v32, 1  ;;  %1716 = vadd.xlane.f32.xlu1 %v1715_v43  ;;  %v1140_v18 = vadd.f32 %v1139_v46, %v1138_v39  ;;  %v2294_v49 = vsel %vm538_vm1, %v2288_v44, 0.0 }
 0x45a   :  { %v664_v3 = vadd.f32 %v663_v11, %v662_v32  ;;  %v3847_v61 = vsel %vm2436_vm3, %v2438_v41, %v626_v57  ;;  %v1141_v57 = vrot.slane %v1140_v18, 1 }
 0x45b   :  { %v1181_v24 = vpop.xlane.xlu1 %1180 }
 0x45c   :  { %v674_v58 = vmul.f32 0.11111111, %v664_v3  ;;  %v1197_v55 = vmul.f32 %v1181_v24, %v3123_v13  ;;  %v1142_v24 = vadd.f32 %v1141_v57, %v1140_v18 }
 0x45d   :  { %v2900_v41 = vpop.eup %2899 }
 0x45e   :  { %1725 = vadd.xlane.f32.xlu0 %v1724_v60  ;;  %v1203_v48 = vsel %vm128_vm5, %v1197_v55, 0.0  ;;  %v3856_v42 = vsel %vm2436_vm3, %v2440_v52, %v674_v58  ;;  %v2292_v2 = vmul.f32 %v2900_v41, %v3816_v10  ;;  %v2293_v3 = vmul.f32 %v2900_v41, %v3818_v19 }
 0x45f   :  { %v1205_v29 = vadd.f32 %v1204_v47, %v1203_v48  ;;  %v1187_v63 = vpop.xlane.xlu0 %1186  ;;  %v1153_v50 = vmul.f32 0.11111111, %v1142_v24  ;;  %v2297_v10 = vsel %vm542_vm0, %v3806_v38, 0.0  ;;  %v1721_v58 = vsel %vm538_vm1, %v3776_v59, 0.0 }
 0x460   :  { %v1199_v12 = vmul.f32 %v1187_v63, %v3141_v22  ;;  %v2303_v19 = vsel %vm542_vm0, %v3814_v9, 0.0  ;;  %v1146_v55 = vrot.slane %v3832_v4, 4  ;;  %v2309_v47 = vsel %vm542_vm0, %v2293_v3, 0.0 }
 0x461   :  { %v1206_v8 = vrot.slane %v1205_v29, 4  ;;  %v2300_v59 = vsel %vm538_vm1, %v2290_v34, 0.0 }
 0x462   :  { %v1212_v16 = vsel %vm128_vm5, %v1199_v12, 0.0  ;;  %v1147_v38 = vadd.f32 %v1146_v55, %v3832_v4 }
 0x463   :  { %v1207_v6 = vadd.f32 %v1206_v8, %v1205_v29  ;;  %v1190_v51 = vpop.xlane.xlu0 %1189 }
 0x464   :  { %v1200_v20 = vmul.f32 %v1190_v51, %v3166_v25  ;;  %v1148_v63 = vrot.slane %v1147_v38, 2 }
 0x465   :  { %v1208_v36 = vrot.slane %v1207_v6, 2 }
 0x466   :  { %v1213_v31 = vsel %vm132_vm10, %v1200_v20, 0.0  ;;  %v1149_v51 = vadd.f32 %v1148_v63, %v1147_v38 }
 0x467   :  { %v1209_v27 = vadd.f32 %v1208_v36, %v1207_v6  ;;  %v1214_v40 = vadd.f32 %v1213_v31, %v1212_v16  ;;  %v2306_v6 = vsel %vm538_vm1, %v2292_v2, 0.0 }
 0x468   :  { %v1150_v36 = vrot.slane %v1149_v51, 1 }
 0x469   :  { %v1210_v28 = vrot.slane %v1209_v27, 1  ;;  %v1215_v32 = vrot.slane %v1214_v40, 4  ;;  %2354 = vrot.lane.b32.xlu1 %v2288_v44, %s2908_s20 }
 0x46a   :  { %v1151_v17 = vadd.f32 %v1150_v36, %v1149_v51 }
 0x46b   :  { %v1211_v45 = vadd.f32 %v1210_v28, %v1209_v27  ;;  %v1216_v43 = vadd.f32 %v1215_v32, %v1214_v40 }
 0x46d   :  { %v1230_v11 = vmul.f32 0.11111111, %v1211_v45  ;;  %v1217_v30 = vrot.slane %v1216_v43, 2  ;;  %2358 = vrot.lane.b32.xlu1 %v2290_v34, %s2908_s20  ;;  %v1154_v34 = vmul.f32 0.11111111, %v1151_v17 }
 0x46f   :  { %v1218_v26 = vadd.f32 %v1217_v30, %v1216_v43  ;;  %v3871_v15 = vsel %vm1233_vm4, %v1152_v56, %v1230_v11 }
 0x471   :  { %v1219_v60 = vrot.slane %v1218_v26, 1  ;;  %2362 = vrot.lane.b32.xlu1 %v2292_v2, %s2908_s20  ;;  %v1196_v35 = vpop.xlane.xlu0 %1195 }
 0x472   :  { %v1202_v48 = vmul.f32 %v1196_v35, %v3181_v37 }
 0x473   :  { %v1220_v53 = vadd.f32 %v1219_v60, %v1218_v26 }
 0x474   :  { %2364 = vrot.lane.b32.xlu0 %v2293_v3, %s2908_s20  ;;  %v1222_v23 = vsel %vm132_vm10, %v1202_v48, 0.0 }
 0x475   :  { %v1231_v1 = vmul.f32 0.11111111, %v1220_v53  ;;  %v1764_v16 = vpop.permute.xlu0 %1763 }
 0x476   :  { %v1778_v2 = vsel %vm542_vm0, %v1764_v16, 0.0 }
 0x477   :  { %v3877_v52 = vsel %vm1233_vm4, %v1153_v50, %v1231_v1 }
 0x479   :  { %v1760_v28 = vpop.permute.xlu0 %1759 }
 0x47a   :  { %v1772_v11 = vsel %vm542_vm0, %v1760_v28, 0.0 }
 0x47d   :  { %v1808_v26 = vpop.permute.xlu0 %1807 }
 0x47e   :  { %v1820_v53 = vsel %vm542_vm0, %v1808_v26, 0.0 }
 0x493   :  { %2298 = vadd.xlane.f32.xlu0 %v2297_v10 }
 0x495   :  { %1722 = vadd.xlane.f32.xlu1 %v1721_v58 }
 0x497   :  { %2304 = vadd.xlane.f32.xlu0 %v2303_v19 }
 0x499   :  { %2295 = vadd.xlane.f32.xlu1 %v2294_v49 }
 0x49b   :  { %2310 = vadd.xlane.f32.xlu0 %v2309_v47 }
 0x49c   :  { %v1193_v29 = vpop.xlane.xlu1 %1192 }
 0x49d   :  { %v1201_v9 = vmul.f32 %v1193_v29, %v3159_v33  ;;  %2301 = vadd.xlane.f32.xlu1 %v2300_v59 }
 0x49f   :  { %v1221_v39 = vsel %vm128_vm5, %v1201_v9, 0.0 }
 0x4a0   :  { %v1223_v8 = vadd.f32 %v1222_v23, %v1221_v39  ;;  %v1762_v12 = vpop.permute.xlu1 %1761 }
 0x4a1   :  { %2307 = vadd.xlane.f32.xlu1 %v2306_v6  ;;  %v1775_v7 = vsel %vm538_vm1, %v1762_v12, 0.0 }
 0x4a2   :  { %v1224_v4 = vrot.slane %v1223_v8, 4 }
 0x4a4   :  { %v1225_v20 = vadd.f32 %v1224_v4, %v1223_v8  ;;  %v1810_v46 = vpop.permute.xlu1 %1809 }
 0x4a5   :  { %1776 = vadd.xlane.f32.xlu1 %v1775_v7  ;;  %v1823_v40 = vsel %vm538_vm1, %v1810_v46, 0.0 }
 0x4a6   :  { %v1226_v31 = vrot.slane %v1225_v20, 2 }
 0x4a8   :  { %v1227_v27 = vadd.f32 %v1226_v31, %v1225_v20  ;;  %v1812_v44 = vpop.permute.xlu1 %1811 }
 0x4a9   :  { %1824 = vadd.xlane.f32.xlu1 %v1823_v40  ;;  %v1826_v24 = vsel %vm542_vm0, %v1812_v44, 0.0 }
 0x4aa   :  { %v1228_v18 = vrot.slane %v1227_v27, 1 }
 0x4ac   :  { %v1229_v32 = vadd.f32 %v1228_v18, %v1227_v27  ;;  %v1758_v45 = vpop.permute.xlu1 %1757 }
 0x4ad   :  { %v1769_v43 = vsel %vm538_vm1, %v1758_v45, 0.0 }
 0x4ae   :  { %v1232_v41 = vmul.f32 0.11111111, %v1229_v32  ;;  %1770 = vadd.xlane.f32.xlu0 %v1769_v43  ;;  %v1720_v3 = vpop.xlane.xlu0 %1719 }
 0x4af   :  { %v1728_v63 = vmul.f32 %v1720_v3, %v3097_v62 }
 0x4b0   :  { %v1806_v56 = vpop.permute.xlu1 %1805  ;;  %v3899_v57 = vsel %vm1233_vm4, %v1154_v34, %v1232_v41 }
 0x4b1   :  { %v1817_v30 = vsel %vm538_vm1, %v1806_v56, 0.0  ;;  %v1734_v39 = vsel %vm1733_vm7, %v1728_v63, 0.0 }
 0x4b2   :  { %1818 = vadd.xlane.f32.xlu1 %v1817_v30  ;;  %1773 = vadd.xlane.f32.xlu0 %v1772_v11  ;;  %v2357_v60 = vpop.permute.xlu0 %2356 }
 0x4b3   :  { %v2375_v50 = vsel %vm542_vm0, %v2357_v60, 0.0 }
 0x4b6   :  { %1779 = vadd.xlane.f32.xlu0 %v1778_v2  ;;  %v2361_v1 = vpop.permute.xlu0 %2360 }
 0x4b7   :  { %v2381_v10 = vsel %vm542_vm0, %v2361_v1, 0.0 }
 0x4ba   :  { %1827 = vadd.xlane.f32.xlu0 %v1826_v24 }
 0x4be   :  { %1821 = vadd.xlane.f32.xlu0 %v1820_v53 }
 0x4c2   :  { %2376 = vadd.xlane.f32.xlu0 %v2375_v50 }
 0x4c6   :  { %2382 = vadd.xlane.f32.xlu0 %v2381_v10 }
 0x4e1   :  { %v1717_v58 = vpop.xlane.xlu1 %1716 }
 0x4e2   :  { %v1727_v9 = vmul.f32 %v1717_v58, %v3079_v54 }
 0x4e4   :  { %v1732_v23 = vsel %vm1731_vm6, %v1727_v9, 0.0 }
 0x4e5   :  { %v2355_v19 = vpop.permute.xlu1 %2354  ;;  %v1735_v8 = vadd.f32 %v1734_v39, %v1732_v23 }
 0x4e6   :  { %v2372_v35 = vsel %vm538_vm1, %v2355_v19, 0.0 }
 0x4e7   :  { %v1726_v55 = vpop.xlane.xlu0 %1725  ;;  %2373 = vadd.xlane.f32.xlu1 %v2372_v35  ;;  %v1736_v12 = vrot.slane %v1735_v8, 4 }
 0x4e8   :  { %v1730_v6 = vmul.f32 %v1726_v55, %v3130_v14 }
 0x4e9   :  { %v2359_v49 = vpop.permute.xlu1 %2358  ;;  %v1737_v51 = vadd.f32 %v1736_v12, %v1735_v8 }
 0x4ea   :  { %v2378_v38 = vsel %vm538_vm1, %v2359_v49, 0.0  ;;  %v1743_v7 = vsel %vm1733_vm7, %v1730_v6, 0.0 }
 0x4eb   :  { %v2365_v47 = vpop.permute.xlu0 %2364  ;;  %2379 = vadd.xlane.f32.xlu1 %v2378_v38  ;;  %v1738_v36 = vrot.slane %v1737_v51, 2 }
 0x4ec   :  { %v2387_v48 = vsel %vm542_vm0, %v2365_v47, 0.0 }
 0x4ed   :  { %2388 = vadd.xlane.f32.xlu0 %v2387_v48  ;;  %v2363_v29 = vpop.permute.xlu1 %2362  ;;  %v1739_v27 = vadd.f32 %v1738_v36, %v1737_v51 }
 0x4ee   :  { %v2384_v59 = vsel %vm538_vm1, %v2363_v29, 0.0 }
 0x4ef   :  { %2385 = vadd.xlane.f32.xlu1 %v2384_v59  ;;  %v1740_v28 = vrot.slane %v1739_v27, 1 }
 0x4f1   :  { %v1741_v41 = vadd.f32 %v1740_v28, %v1739_v27 }
 0x4f3   :  { %v1751_v30 = vmul.f32 0.11111111, %v1741_v41 }
 0x51c   :  { %v3920_v44 = vpop.xlane.xlu0 %2298 }
 0x51e   :  { %v1723_v4 = vpop.xlane.xlu1 %1722 }
 0x51f   :  { %v1729_v20 = vmul.f32 %v1723_v4, %v3106_v5 }
 0x520   :  { %v3924_v43 = vpop.xlane.xlu0 %2304 }
 0x521   :  { %v1742_v46 = vsel %vm1731_vm6, %v1729_v20, 0.0 }
 0x522   :  { %v1744_v16 = vadd.f32 %v1743_v7, %v1742_v46  ;;  %v3922_v17 = vpop.xlane.xlu1 %2295 }
 0x524   :  { %v1745_v31 = vrot.slane %v1744_v16, 4  ;;  %v3928_v2 = vpop.xlane.xlu0 %2310 }
 0x526   :  { %v1746_v40 = vadd.f32 %v1745_v31, %v1744_v16  ;;  %v3926_v34 = vpop.xlane.xlu1 %2301 }
 0x528   :  { %v1747_v18 = vrot.slane %v1746_v40, 2 }
 0x52a   :  { %v1748_v32 = vadd.f32 %v1747_v18, %v1746_v40  ;;  %v3930_v3 = vpop.xlane.xlu1 %2307 }
 0x52c   :  { %v1749_v45 = vrot.slane %v1748_v32, 1 }
 0x52e   :  { %v1750_v56 = vadd.f32 %v1749_v45, %v1748_v32  ;;  %v1777_v10 = vpop.xlane.xlu1 %1776 }
 0x52f   :  { %v1783_v35 = vmul.f32 %v1777_v10, %v3106_v5 }
 0x530   :  { %v1752_v11 = vmul.f32 0.11111111, %v1750_v56 }
 0x531   :  { %v1794_v9 = vsel %vm1731_vm6, %v1783_v35, 0.0 }
 0x532   :  { %v2451_v26 = vrot.slane %v1752_v11, 7  ;;  %v1825_v47 = vpop.xlane.xlu1 %1824 }
 0x533   :  { %v1831_v63 = vmul.f32 %v1825_v47, %v3106_v5 }
 0x534   :  { %v2452_v24 = vsel %vm2436_vm3, %v2451_v26, %v1751_v30 }
 0x535   :  { %v3935_v60 = vsel %vm128_vm5, %v3709_v0, %v2452_v24  ;;  %v1842_v7 = vsel %vm1731_vm6, %v1831_v63, 0.0 }
 0x536   :  { %v2478_v53 = vmul.f32 %v3935_v60, %v3935_v60 }
 0x537   :  { %v1771_v50 = vpop.xlane.xlu0 %1770 }
 0x538   :  { %v2481_v1 = vsel %vm93_vm2, %v2478_v53, 0.0  ;;  %v1781_v58 = vmul.f32 %v1771_v50, %v3079_v54 }
 0x539   :  { %2482 = vadd.xlane.f32.xlu0 %v2481_v1 }
 0x53a   :  { %v1785_v49 = vsel %vm1731_vm6, %v1781_v58, 0.0 }
 0x53b   :  { %v1774_v19 = vpop.xlane.xlu0 %1773  ;;  %v1819_v39 = vpop.xlane.xlu1 %1818 }
 0x53c   :  { %v1782_v55 = vmul.f32 %v1774_v19, %v3097_v62  ;;  %v1829_v46 = vmul.f32 %v1819_v39, %v3079_v54 }
 0x53e   :  { %v1786_v0 = vsel %vm1733_vm7, %v1782_v55, 0.0  ;;  %v1833_v32 = vsel %vm1731_vm6, %v1829_v46, 0.0 }
 0x53f   :  { %v1787_v38 = vadd.f32 %v1786_v0, %v1785_v49  ;;  %v1780_v48 = vpop.xlane.xlu0 %1779 }
 0x540   :  { %v1784_v29 = vmul.f32 %v1780_v48, %v3130_v14 }
 0x541   :  { %v1788_v59 = vrot.slane %v1787_v38, 4 }
 0x542   :  { %v1795_v23 = vsel %vm1733_vm7, %v1784_v29, 0.0 }
 0x543   :  { %v1789_v8 = vadd.f32 %v1788_v59, %v1787_v38  ;;  %v1796_v12 = vadd.f32 %v1795_v23, %v1794_v9  ;;  %v1828_v6 = vpop.xlane.xlu0 %1827 }
 0x544   :  { %v1832_v51 = vmul.f32 %v1828_v6, %v3130_v14 }
 0x545   :  { %v1790_v4 = vrot.slane %v1789_v8, 2  ;;  %v1797_v20 = vrot.slane %v1796_v12, 4 }
 0x546   :  { %v1843_v36 = vsel %vm1733_vm7, %v1832_v51, 0.0  ;;  %v2313_v51 = vmul.f32 %v3920_v44, %v3148_v21 }
 0x547   :  { %v1791_v16 = vadd.f32 %v1790_v4, %v1789_v8  ;;  %v1798_v31 = vadd.f32 %v1797_v20, %v1796_v12  ;;  %v1844_v27 = vadd.f32 %v1843_v36, %v1842_v7  ;;  %v1822_v5 = vpop.xlane.xlu0 %1821  ;;  %v2314_v20 = vmul.f32 %v3926_v34, %v3141_v22 }
 0x548   :  { %v1830_v40 = vmul.f32 %v1822_v5, %v3097_v62  ;;  %v2315_v7 = vmul.f32 %v3924_v43, %v3166_v25 }
 0x549   :  { %v1799_v18 = vrot.slane %v1798_v31, 2  ;;  %v1845_v28 = vrot.slane %v1844_v27, 4  ;;  %v1792_v45 = vrot.slane %v1791_v16, 1  ;;  %v2327_v36 = vsel %vm1731_vm6, %v2314_v20, 0.0 }
 0x54a   :  { %v1834_v14 = vsel %vm1733_vm7, %v1830_v40, 0.0 }
 0x54b   :  { %v1800_v41 = vadd.f32 %v1799_v18, %v1798_v31  ;;  %v1846_v56 = vadd.f32 %v1845_v28, %v1844_v27  ;;  %v1835_v11 = vadd.f32 %v1834_v14, %v1833_v32  ;;  %v1793_v24 = vadd.f32 %v1792_v45, %v1791_v16  ;;  %v2377_v5 = vpop.xlane.xlu0 %2376 }
 0x54c   :  { %v2328_v16 = vsel %vm1733_vm7, %v2315_v7, 0.0  ;;  %v2317_v31 = vmul.f32 %v3928_v2, %v3181_v37  ;;  %v2391_v32 = vmul.f32 %v2377_v5, %v3148_v21 }
 0x54d   :  { %v1801_v30 = vrot.slane %v1800_v41, 1  ;;  %v1847_v54 = vrot.slane %v1846_v56, 2  ;;  %v1836_v26 = vrot.slane %v1835_v11, 4  ;;  %v1803_v19 = vmul.f32 0.11111111, %v1793_v24 }
 0x54e   :  { %v2329_v27 = vadd.f32 %v2328_v16, %v2327_v36  ;;  %v2337_v18 = vsel %vm1733_vm7, %v2317_v31, 0.0  ;;  %v2397_v2 = vsel %vm1733_vm7, %v2391_v32, 0.0 }
 0x54f   :  { %v1802_v53 = vadd.f32 %v1801_v30, %v1800_v41  ;;  %v1848_v50 = vadd.f32 %v1847_v54, %v1846_v56  ;;  %v1837_v1 = vadd.f32 %v1836_v26, %v1835_v11  ;;  %v2383_v14 = vpop.xlane.xlu0 %2382 }
 0x550   :  { %v2330_v43 = vrot.slane %v2329_v27, 4  ;;  %v2393_v30 = vmul.f32 %v2383_v14, %v3166_v25 }
 0x551   :  { %v1804_v10 = vmul.f32 0.11111111, %v1802_v53  ;;  %v1849_v58 = vrot.slane %v1848_v50, 1  ;;  %v1838_v62 = vrot.slane %v1837_v1, 2 }
 0x552   :  { %v2331_v41 = vadd.f32 %v2330_v43, %v2329_v27 }
 0x553   :  { %v2453_v55 = vrot.slane %v1804_v10, 7  ;;  %v1850_v35 = vadd.f32 %v1849_v58, %v1848_v50  ;;  %v1839_v49 = vadd.f32 %v1838_v62, %v1837_v1 }
 0x554   :  { %v2332_v1 = vrot.slane %v2331_v41, 2 }
 0x555   :  { %v1852_v0 = vmul.f32 0.11111111, %v1850_v35  ;;  %v1840_v47 = vrot.slane %v1839_v49, 1  ;;  %v2454_v38 = vsel %vm2436_vm3, %v2453_v55, %v1803_v19 }
 0x556   :  { %v3959_v48 = vsel %vm128_vm5, %v3847_v61, %v2454_v38  ;;  %v2312_v61 = vmul.f32 %v3922_v17, %v3123_v13  ;;  %v2316_v17 = vmul.f32 %v3930_v3, %v3159_v33 }
 0x557   :  { %v1841_v29 = vadd.f32 %v1840_v47, %v1839_v49  ;;  %v2479_v59 = vmul.f32 %v3959_v48, %v3959_v48  ;;  %v2455_v9 = vrot.slane %v1852_v0, 7  ;;  %v2333_v0 = vadd.f32 %v2332_v1, %v2331_v41 }
 0x558   :  { %v2318_v4 = vsel %vm1731_vm6, %v2312_v61, 0.0  ;;  %v2336_v34 = vsel %vm1731_vm6, %v2316_v17, 0.0 }
 0x559   :  { %v1851_v63 = vmul.f32 0.11111111, %v1841_v29  ;;  %v2484_v23 = vsel %vm93_vm2, %v2479_v59, 0.0  ;;  %v2338_v28 = vadd.f32 %v2337_v18, %v2336_v34 }
 0x55a   :  { %2485 = vadd.xlane.f32.xlu1 %v2484_v23 }
 0x55b   :  { %v2456_v39 = vsel %vm2436_vm3, %v2455_v9, %v1851_v63  ;;  %v2339_v11 = vrot.slane %v2338_v28, 4 }
 0x55c   :  { %v3967_v8 = vsel %vm128_vm5, %v3856_v42, %v2456_v39  ;;  %v2319_v42 = vsel %vm1733_vm7, %v2313_v51, 0.0 }
 0x55d   :  { %v2480_v12 = vmul.f32 %v3967_v8, %v3967_v8  ;;  %v2320_v46 = vadd.f32 %v2319_v42, %v2318_v4  ;;  %v2340_v58 = vadd.f32 %v2339_v11, %v2338_v28 }
 0x55f   :  { %v2487_v6 = vsel %vm93_vm2, %v2480_v12, 0.0  ;;  %v2321_v44 = vrot.slane %v2320_v46, 4  ;;  %v2341_v29 = vrot.slane %v2340_v58, 2  ;;  %v2334_v12 = vrot.slane %v2333_v0, 1 }
 0x560   :  { %2488 = vadd.xlane.f32.xlu0 %v2487_v6 }
 0x561   :  { %v2322_v40 = vadd.f32 %v2321_v44, %v2320_v46  ;;  %v2342_v61 = vadd.f32 %v2341_v29, %v2340_v58  ;;  %v2335_v36 = vadd.f32 %v2334_v12, %v2333_v0  ;;  %v2520_v29 = vlaneseq }
 0x563   :  { %v2323_v3 = vrot.slane %v2322_v40, 2  ;;  %v2346_v34 = vmul.f32 0.11111111, %v2335_v36 }
 0x565   :  { %v2324_v50 = vadd.f32 %v2323_v3, %v2322_v40 }
 0x567   :  { %v2325_v49 = vrot.slane %v2324_v50, 1 }
 0x569   :  { %v2326_v39 = vadd.f32 %v2325_v49, %v2324_v50 }
 0x56b   :  { %v2345_v46 = vmul.f32 0.11111111, %v2326_v39 }
 0x570   :  { %v2374_v45 = vpop.xlane.xlu1 %2373 }
 0x571   :  { %v2390_v56 = vmul.f32 %v2374_v45, %v3123_v13  ;;  %v2406_v13 = vsel %vm1733_vm7, %v2393_v30, 0.0 }
 0x573   :  { %v2396_v54 = vsel %vm1731_vm6, %v2390_v56, 0.0 }
 0x574   :  { %v2398_v26 = vadd.f32 %v2397_v2, %v2396_v54  ;;  %v2380_v24 = vpop.xlane.xlu1 %2379 }
 0x575   :  { %v2392_v21 = vmul.f32 %v2380_v24, %v3141_v22 }
 0x576   :  { %v2389_v53 = vpop.xlane.xlu0 %2388  ;;  %v2399_v62 = vrot.slane %v2398_v26, 4 }
 0x577   :  { %v2395_v10 = vmul.f32 %v2389_v53, %v3181_v37  ;;  %v2405_v19 = vsel %vm1731_vm6, %v2392_v21, 0.0 }
 0x578   :  { %v2400_v55 = vadd.f32 %v2399_v62, %v2398_v26  ;;  %v2407_v35 = vadd.f32 %v2406_v13, %v2405_v19  ;;  %v2386_v25 = vpop.xlane.xlu1 %2385 }
 0x579   :  { %v2415_v47 = vsel %vm1733_vm7, %v2395_v10, 0.0  ;;  %v2394_v38 = vmul.f32 %v2386_v25, %v3159_v33  ;;  %v2343_v33 = vrot.slane %v2342_v61, 1 }
 0x57a   :  { %v2401_v59 = vrot.slane %v2400_v55, 2  ;;  %v2408_v22 = vrot.slane %v2407_v35, 4 }
 0x57b   :  { %v2414_v37 = vsel %vm1731_vm6, %v2394_v38, 0.0  ;;  %v2344_v18 = vadd.f32 %v2343_v33, %v2342_v61 }
 0x57c   :  { %v2402_v9 = vadd.f32 %v2401_v59, %v2400_v55  ;;  %v2409_v63 = vadd.f32 %v2408_v22, %v2407_v35  ;;  %v2416_v23 = vadd.f32 %v2415_v47, %v2414_v37  ;;  %v2521_v37 = vand.u32 127, %v2520_v29 }
 0x57d   :  { %v2347_v11 = vmul.f32 0.11111111, %v2344_v18 }
 0x57e   :  { %v2403_v6 = vrot.slane %v2402_v9, 1  ;;  %v2410_v51 = vrot.slane %v2409_v63, 2  ;;  %v2417_v4 = vrot.slane %v2416_v23, 4 }
 0x580   :  { %v2404_v20 = vadd.f32 %v2403_v6, %v2402_v9  ;;  %v2411_v42 = vadd.f32 %v2410_v51, %v2409_v63  ;;  %v2418_v7 = vadd.f32 %v2417_v4, %v2416_v23  ;;  %v2523_v9 = vshrl.u32 %v2520_v29, 7 }
 0x582   :  { %v2423_v17 = vmul.f32 0.11111111, %v2404_v20  ;;  %v2412_v16 = vrot.slane %v2411_v42, 1  ;;  %v2419_v44 = vrot.slane %v2418_v7, 2  ;;  %v2524_v61 = vsub.s32 %v2521_v37, %v2523_v9 }
 0x584   :  { %v2413_v31 = vadd.f32 %v2412_v16, %v2411_v42  ;;  %v2420_v27 = vadd.f32 %v2419_v44, %v2418_v7  ;;  %v2426_v5 = vsel %vm1233_vm4, %v2345_v46, %v2423_v17 }
 0x585   :  { %v2463_v40 = vsel %vm128_vm5, %v3871_v15, %v2426_v5 }
 0x586   :  { %v2424_v43 = vmul.f32 0.11111111, %v2413_v31  ;;  %v2421_v28 = vrot.slane %v2420_v27, 1  ;;  %v2466_v32 = vmul.f32 %v2463_v40, %v3935_v60  ;;  %v2490_v3 = vmul.f32 %v2463_v40, %v2463_v40 }
 0x588   :  { %v2422_v14 = vadd.f32 %v2421_v28, %v2420_v27  ;;  %v2469_v45 = vsel %vm93_vm2, %v2466_v32, 0.0  ;;  %v2427_v41 = vsel %vm1233_vm4, %v2346_v34, %v2424_v43  ;;  %v2493_v15 = vsel %vm93_vm2, %v2490_v3, 0.0 }
 0x589   :  { %2470 = vadd.xlane.f32.xlu1 %v2469_v45  ;;  %v2464_v56 = vsel %vm128_vm5, %v3877_v52, %v2427_v41 }
 0x58a   :  { %v2425_v2 = vmul.f32 0.11111111, %v2422_v14  ;;  %v2467_v30 = vmul.f32 %v2464_v56, %v3959_v48  ;;  %v2491_v26 = vmul.f32 %v2464_v56, %v2464_v56 }
 0x58c   :  { %v2472_v54 = vsel %vm93_vm2, %v2467_v30, 0.0  ;;  %v2428_v60 = vsel %vm1233_vm4, %v2347_v11, %v2425_v2  ;;  %v2496_v52 = vsel %vm93_vm2, %v2491_v26, 0.0 }
 0x58d   :  { %2494 = vadd.xlane.f32.xlu1 %v2493_v15  ;;  %2473 = vadd.xlane.f32.xlu0 %v2472_v54  ;;  %v2465_v24 = vsel %vm128_vm5, %v3899_v57, %v2428_v60  ;;  %vm2538_vm5 = vcmask 10240  }
 0x58e   :  { %v2468_v53 = vmul.f32 %v2465_v24, %v3967_v8  ;;  %v2492_v1 = vmul.f32 %v2465_v24, %v2465_v24 }
 0x590   :  { %v2475_v50 = vsel %vm93_vm2, %v2468_v53, 0.0  ;;  %v2499_v48 = vsel %vm93_vm2, %v2492_v1, 0.0  ;;  %vm2535_vm2 = vcmask 1042434  }
 0x591   :  { %2497 = vadd.xlane.f32.xlu0 %v2496_v52  ;;  %2476 = vadd.xlane.f32.xlu1 %v2475_v50 }
 0x595   :  { %2500 = vadd.xlane.f32.xlu1 %v2499_v48 }
 0x5c2   :  { %v2483_v21 = vpop.xlane.xlu0 %2482 }
 0x5e3   :  { %v2486_v10 = vpop.xlane.xlu1 %2485 }
 0x5e9   :  { %v2489_v58 = vpop.xlane.xlu0 %2488 }
 0x612   :  { %v2471_v62 = vpop.xlane.xlu1 %2470 }
 0x616   :  { %v2495_v13 = vpop.xlane.xlu1 %2494  ;;  %v2474_v19 = vpop.xlane.xlu0 %2473 }
 0x617   :  { %v2502_v55 = vmul.f32 %v2495_v13, %v2483_v21 }
 0x619   :  { %v2505_v57 = vmax.f32 %v2502_v55, 1e-16 }
 0x61a   :  { %v2477_v35 = vpop.xlane.xlu1 %2476  ;;  %v2498_v8 = vpop.xlane.xlu0 %2497 }
 0x61b   :  { %v2503_v25 = vmul.f32 %v2498_v8, %v2486_v10  ;;  %2901 = vrsqrt.f32 %v2505_v57 }
 0x61d   :  { %v2506_v49 = vmax.f32 %v2503_v25, 1e-16 }
 0x61e   :  { %v2501_v0 = vpop.xlane.xlu1 %2500 }
 0x61f   :  { %2903 = vrsqrt.f32 %v2506_v49  ;;  %v2504_v47 = vmul.f32 %v2501_v0, %v2489_v58 }
 0x621   :  { %v2507_v38 = vmax.f32 %v2504_v47, 1e-16 }
 0x623   :  { %2905 = vrsqrt.f32 %v2507_v38 }
 0x628   :  { %v2902_v59 = vpop.eup %2901 }
 0x629   :  { %v2511_v63 = vmul.f32 %v2902_v59, %v2471_v62 }
 0x62b   :  { %v2514_v6 = vmul.f32 5.0, %v2511_v63 }
 0x62c   :  { %v2904_v22 = vpop.eup %2903 }
 0x62d   :  { %v2512_v23 = vmul.f32 %v2904_v22, %v2474_v19  ;;  %v2525_v42 = vrot.slane %v2514_v6, %v2524_v61 }
 0x62f   :  { %v2515_v39 = vmul.f32 5.0, %v2512_v23 }
 0x630   :  { %v2906_v12 = vpop.eup %2905 }
 0x631   :  { %v2513_v51 = vmul.f32 %v2906_v12, %v2477_v35  ;;  %v2529_v4 = vrot.slane %v2515_v39, %v2524_v61 }
 0x633   :  { %v2516_v20 = vmul.f32 5.0, %v2513_v51  ;;  %v2534_v46 = vsel %vm2436_vm3, %v2529_v4, %v2525_v42 }
 0x635   :  { %v2533_v7 = vrot.slane %v2516_v20, %v2524_v61 }
 0x637   :  { %v2536_v36 = vsel %vm2535_vm2, %v2533_v7, %v2534_v46 }
 0x638   :  { %2539 = vst.msk [vmem:[%s4028_s4] sm:$0x7] %vm2538_vm5, %v2536_v36 }

</bundles_post_ra>
